<compile_context>
chip_gen: v7x
topology: tpu7x:2x2x1
jax: 0.10.0
libtpu: 0.0.40
codegen_flags: <defaults>
</compile_context>

<pallas_src>
import functools

import numpy as np

import jax
import jax.numpy as jnp
from jax.experimental import pallas as pl
from jax.experimental.pallas import tpu as pltpu

_K = 3          # conv kernel
_STRIDE = 2
_PAD = 1
_BN_EPS = 0.8   # BatchNorm2d(out_filters, 0.8): 2nd positional arg is eps
_LEAKY = 0.2
_HIDDEN = 300
_CLASSES = 2


def _conv_out(s):
    return (s + 2 * _PAD - _K) // _STRIDE + 1


# ----------------------------------------------------------------------------
# The single fused kernel.
# ----------------------------------------------------------------------------
def _discriminator_kernel(*refs, meta):
    refs = list(refs)
    out_ref = refs.pop()                       # (batch, n_classes) probabilities
    idx = 0
    x = refs[idx][...]                         # (H0*N, W0*C0) bf16
    idx += 1

    # ---- conv trunk -------------------------------------------------------
    for lm in meta["conv"]:
        r_ref, b_ref, bias_ref = refs[idx], refs[idx + 1], refs[idx + 2]
        idx += 3
        x_bf = x.astype(jnp.bfloat16)
        acc = None
        for di in range(_K):
            # Row selection is exact in bf16 (0/1 entries), so the cast back to
            # bf16 before the weight matmul is lossless.
            sel = jnp.dot(r_ref[di], x_bf,
                          preferred_element_type=jnp.float32).astype(jnp.bfloat16)
            part = jnp.dot(sel, b_ref[di], preferred_element_type=jnp.float32)
            acc = part if acc is None else acc + part
        y = acc + bias_ref[...]                           # (Ho*N, Wo*Cout) f32
        y = jnp.where(y >= 0.0, y, _LEAKY * y)            # LeakyReLU(0.2); Dropout2d(0)=id

        if lm["bn"]:
            gamma_ref, beta_ref = refs[idx], refs[idx + 1]
            fold_ref, bcast_ref = refs[idx + 2], refs[idx + 3]
            idx += 4
            cnt = float(lm["rows"] * lm["wo"])            # N*Ho*Wo elements / channel
            colsum = jnp.sum(y, axis=0, keepdims=True)                       # (1, Wo*C)
            mean_c = jnp.dot(colsum, fold_ref[...],
                             preferred_element_type=jnp.float32) / cnt       # (1, C)
            mean_b = jnp.dot(mean_c, bcast_ref[...],
                             preferred_element_type=jnp.float32)             # (1, Wo*C)
            d = y - mean_b
            var_c = jnp.dot(jnp.sum(d * d, axis=0, keepdims=True), fold_ref[...],
                            preferred_element_type=jnp.float32) / cnt        # biased var
            scale_c = gamma_ref[...] * jax.lax.rsqrt(var_c + meta["eps"])
            scale_b = jnp.dot(scale_c, bcast_ref[...],
                              preferred_element_type=jnp.float32)
            y = d * scale_b + beta_ref[...]               # beta pre-tiled to (1, Wo*C)
        x = y

    # ---- classifier head ----------------------------------------------------
    w1_ref, b1_ref, w2_ref, b2_ref = refs[idx:idx + 4]
    n = meta["batch"]
    h1 = None
    for h in range(meta["h_last"]):                       # fc1 as H4 row-block matmuls
        blk = x[h * n:(h + 1) * n, :].astype(jnp.bfloat16)        # (N, W4*C4)
        part = jnp.dot(blk, w1_ref[h], preferred_element_type=jnp.float32)
        h1 = part if h1 is None else h1 + part
    h1 = jnp.maximum(h1 + b1_ref[...], 0.0)                       # ReLU
    logits = jnp.dot(h1.astype(jnp.bfloat16), w2_ref[...],
                     preferred_element_type=jnp.float32) + b2_ref[...]
    m = jnp.max(logits, axis=-1, keepdims=True)                   # softmax(dim=1)
    e = jnp.exp(logits - m)
    inv = pl.reciprocal(jnp.sum(e, axis=-1, keepdims=True), approx=True)
    out_ref[...] = e * inv


# ----------------------------------------------------------------------------
# Parameters (PyTorch layouts) + one-time operand preparation.
# ----------------------------------------------------------------------------
def init_params(key, channels, img_size):
    blocks = [(channels, 16, False), (16, 32, True), (32, 64, True), (64, 128, True)]
    conv = []
    for cin, cout, bn in blocks:
        key, k1, k2 = jax.random.split(key, 3)
        conv.append(dict(
            w=jax.random.normal(k1, (cout, cin, _K, _K), jnp.float32) * 0.05,  # OIHW
            b=jax.random.normal(k2, (cout,), jnp.float32) * 0.05,
            gamma=jnp.ones((cout,), jnp.float32),
            beta=jnp.zeros((cout,), jnp.float32),
            bn=bn))
    ds = img_size // 2 ** 4
    fin = 128 * ds * ds
    key, k1, k2, k3, k4 = jax.random.split(key, 5)
    return dict(
        conv=conv,
        fc1_w=jax.random.normal(k1, (_HIDDEN, fin), jnp.float32) * 0.1,
        fc1_b=jax.random.normal(k2, (_HIDDEN,), jnp.float32) * 0.1,
        fc2_w=jax.random.normal(k3, (_CLASSES, _HIDDEN), jnp.float32) * 0.25,
        fc2_b=jax.random.normal(k4, (_CLASSES,), jnp.float32) * 0.1,
    )


def prepare_operands(params, batch, channels, img_size):
    """One-time weight/layout transforms: selection matrices encoding the
    stride-2/pad-1 patch extraction, tiled biases, BN fold/broadcast matrices,
    and fc1 rows pre-permuted to the kernel's (h,n)x(w,c) activation layout."""
    operands = []
    meta = {"conv": [], "eps": _BN_EPS, "batch": batch}
    h, cin = img_size, channels
    for layer in params["conv"]:
        w, b = layer["w"], layer["b"]
        cout = w.shape[0]
        ho = _conv_out(h)
        wi, wo = h, ho                                    # square images

        # Row selection for tap di: (ho,n) <- (2*ho+di-1, n); zero rows = padding.
        R = np.zeros((_K, ho * batch, h * batch), np.float32)
        for di in range(_K):
            for o in range(ho):
                hi = _STRIDE * o + di - _PAD
                if 0 <= hi < h:
                    for n in range(batch):
                        R[di, o * batch + n, hi * batch + n] = 1.0

        # Column selection over dj folded with the (Cin, Cout) tap weights.
        Csel = np.zeros((_K, wi, wo), np.float32)
        for dj in range(_K):
            for ow in range(wo):
                iw = _STRIDE * ow + dj - _PAD
                if 0 <= iw < wi:
                    Csel[dj, iw, ow] = 1.0
        B = jnp.einsum("jvw,oidj->dviwo", jnp.asarray(Csel), w)   # (K, wi, cin, wo, cout)
        B = B.reshape(_K, wi * cin, wo * cout)

        bias_t = jnp.tile(b, wo).reshape(1, wo * cout)
        operands += [jnp.asarray(R, jnp.bfloat16), B.astype(jnp.bfloat16),
                     bias_t.astype(jnp.float32)]

        lm = {"bn": layer["bn"], "rows": batch * ho, "wo": wo}
        if layer["bn"]:
            fold = np.tile(np.eye(cout, dtype=np.float32), (wo, 1))   # (wo*cout, cout)
            operands += [layer["gamma"].reshape(1, cout).astype(jnp.float32),
                         jnp.tile(layer["beta"], wo).reshape(1, wo * cout).astype(jnp.float32),
                         jnp.asarray(fold),
                         jnp.asarray(np.ascontiguousarray(fold.T))]
        meta["conv"].append(lm)
        h, cin = ho, cout

    h4, c4 = h, cin
    meta["h_last"] = h4
    # fc1 weight is (300, c4*h4*w4) over the NCHW flatten order (c, h, w);
    # permute its rows to the kernel's per-h (w, c) layout.
    w1 = params["fc1_w"].reshape(_HIDDEN, c4, h4, h4)
    w1p = jnp.transpose(w1, (2, 3, 1, 0)).reshape(h4, h4 * c4, _HIDDEN)
    operands += [w1p.astype(jnp.bfloat16),
                 params["fc1_b"].reshape(1, _HIDDEN).astype(jnp.float32),
                 jnp.transpose(params["fc2_w"]).astype(jnp.bfloat16),
                 params["fc2_b"].reshape(1, _CLASSES).astype(jnp.float32)]
    return operands, meta


def make_forward(params, batch, channels, img_size):
    operands, meta = prepare_operands(params, batch, channels, img_size)
    kernel = functools.partial(_discriminator_kernel, meta=meta)

    def _full_spec(a):
        return pl.BlockSpec(a.shape, lambda i, _nd=a.ndim: (0,) * _nd)

    @jax.jit
    def forward(img, ops):
        n, c, hh, ww = img.shape
        # single layout op: NCHW -> rows (h, n) x cols (w, c); bf16 matmul operand
        x2d = jnp.transpose(img, (2, 0, 3, 1)).reshape(hh * n, ww * c)
        x2d = x2d.astype(jnp.bfloat16)
        inputs = (x2d,) + tuple(ops)
        return pl.pallas_call(
            kernel,
            out_shape=jax.ShapeDtypeStruct((n, _CLASSES), jnp.float32),
            grid=(1,),
            in_specs=[_full_spec(a) for a in inputs],
            out_specs=pl.BlockSpec((n, _CLASSES), lambda i: (0, 0)),
            compiler_params=pltpu.CompilerParams(
                dimension_semantics=("arbitrary",)),
        )(*inputs)

    return lambda img: forward(img, tuple(operands))


# ----------------------------------------------------------------------------
# Pure-JAX f32 reference (mirrors the PyTorch module) for validation.
# ----------------------------------------------------------------------------
def reference_forward(params, img):
    x = img.astype(jnp.float32)
    for layer in params["conv"]:
        x = jax.lax.conv_general_dilated(
            x, layer["w"], window_strides=(_STRIDE, _STRIDE),
            padding=((_PAD, _PAD), (_PAD, _PAD)),
            dimension_numbers=("NCHW", "OIHW", "NCHW"))
        x = x + layer["b"].reshape(1, -1, 1, 1)
        x = jnp.where(x >= 0.0, x, _LEAKY * x)
        if layer["bn"]:
            mean = jnp.mean(x, axis=(0, 2, 3), keepdims=True)
            var = jnp.mean((x - mean) ** 2, axis=(0, 2, 3), keepdims=True)
            x = (x - mean) / jnp.sqrt(var + _BN_EPS)
            x = x * layer["gamma"].reshape(1, -1, 1, 1) + layer["beta"].reshape(1, -1, 1, 1)
    flat = x.reshape(x.shape[0], -1)
    h = jnp.maximum(flat @ params["fc1_w"].T + params["fc1_b"], 0.0)
    logits = h @ params["fc2_w"].T + params["fc2_b"]
    return jax.nn.softmax(logits, axis=-1)


if __name__ == "__main__":
    batch, channels, img_size = 2, 3, 32     # CIFAR10-like; img_size divisible by 16

    key = jax.random.PRNGKey(0)
    key, pk, xk = jax.random.split(key, 3)
    params = init_params(pk, channels, img_size)
    img = jax.random.normal(xk, (batch, channels, img_size, img_size), jnp.float32)

    fwd = make_forward(params, batch, channels, img_size)
    out = jax.block_until_ready(fwd(img))

    assert out.shape == (batch, _CLASSES)
    # softmax rows sum to 1 (approx reciprocal -> loose tolerance)
    assert float(jnp.max(jnp.abs(jnp.sum(out, axis=-1) - 1.0))) < 5e-3
    # compare against the pure-JAX f32 reference (kernel uses bf16 matmul operands)
    ref = jax.block_until_ready(reference_forward(params, img))
    assert float(jnp.max(jnp.abs(out - ref))) < 2e-2
    print("KERNEL_OK")
</pallas_src>

<mosaic_0001>
module attributes {stable_mosaic.version = 11 : i64} {
  func.func @_discriminator_kernel(%arg0: i32, %arg1: memref<64x96xbf16, #tpu.memory_space<vmem>>, %arg2: memref<3x32x64xbf16, #tpu.memory_space<vmem>>, %arg3: memref<3x96x256xbf16, #tpu.memory_space<vmem>>, %arg4: memref<1x256xf32, #tpu.memory_space<vmem>>, %arg5: memref<3x16x32xbf16, #tpu.memory_space<vmem>>, %arg6: memref<3x256x256xbf16, #tpu.memory_space<vmem>>, %arg7: memref<1x256xf32, #tpu.memory_space<vmem>>, %arg8: memref<1x32xf32, #tpu.memory_space<vmem>>, %arg9: memref<1x256xf32, #tpu.memory_space<vmem>>, %arg10: memref<256x32xf32, #tpu.memory_space<vmem>>, %arg11: memref<32x256xf32, #tpu.memory_space<vmem>>, %arg12: memref<3x8x16xbf16, #tpu.memory_space<vmem>>, %arg13: memref<3x256x256xbf16, #tpu.memory_space<vmem>>, %arg14: memref<1x256xf32, #tpu.memory_space<vmem>>, %arg15: memref<1x64xf32, #tpu.memory_space<vmem>>, %arg16: memref<1x256xf32, #tpu.memory_space<vmem>>, %arg17: memref<256x64xf32, #tpu.memory_space<vmem>>, %arg18: memref<64x256xf32, #tpu.memory_space<vmem>>, %arg19: memref<3x4x8xbf16, #tpu.memory_space<vmem>>, %arg20: memref<3x256x256xbf16, #tpu.memory_space<vmem>>, %arg21: memref<1x256xf32, #tpu.memory_space<vmem>>, %arg22: memref<1x128xf32, #tpu.memory_space<vmem>>, %arg23: memref<1x256xf32, #tpu.memory_space<vmem>>, %arg24: memref<256x128xf32, #tpu.memory_space<vmem>>, %arg25: memref<128x256xf32, #tpu.memory_space<vmem>>, %arg26: memref<2x256x300xbf16, #tpu.memory_space<vmem>>, %arg27: memref<1x300xf32, #tpu.memory_space<vmem>>, %arg28: memref<300x2xbf16, #tpu.memory_space<vmem>>, %arg29: memref<1x2xf32, #tpu.memory_space<vmem>>, %arg30: memref<2x2xf32, #tpu.memory_space<vmem>>) attributes {dimension_semantics = [#tpu.dimension_semantics<arbitrary>], iteration_bounds = array<i64: 1>, scalar_prefetch = 0 : i64, scratch_operands = 0 : i64, tpu.core_type = #tpu.core_type<tc>, window_params = [{pipeline_mode = #tpu.pipeline_mode<synchronous>, transform_indices = @transform_0, window_bounds = array<i64: 64, 96>}, {pipeline_mode = #tpu.pipeline_mode<synchronous>, transform_indices = @transform_1, window_bounds = array<i64: 3, 32, 64>}, {pipeline_mode = #tpu.pipeline_mode<synchronous>, transform_indices = @transform_2, window_bounds = array<i64: 3, 96, 256>}, {pipeline_mode = #tpu.pipeline_mode<synchronous>, transform_indices = @transform_3, window_bounds = array<i64: 1, 256>}, {pipeline_mode = #tpu.pipeline_mode<synchronous>, transform_indices = @transform_4, window_bounds = array<i64: 3, 16, 32>}, {pipeline_mode = #tpu.pipeline_mode<synchronous>, transform_indices = @transform_5, window_bounds = array<i64: 3, 256, 256>}, {pipeline_mode = #tpu.pipeline_mode<synchronous>, transform_indices = @transform_6, window_bounds = array<i64: 1, 256>}, {pipeline_mode = #tpu.pipeline_mode<synchronous>, transform_indices = @transform_7, window_bounds = array<i64: 1, 32>}, {pipeline_mode = #tpu.pipeline_mode<synchronous>, transform_indices = @transform_8, window_bounds = array<i64: 1, 256>}, {pipeline_mode = #tpu.pipeline_mode<synchronous>, transform_indices = @transform_9, window_bounds = array<i64: 256, 32>}, {pipeline_mode = #tpu.pipeline_mode<synchronous>, transform_indices = @transform_10, window_bounds = array<i64: 32, 256>}, {pipeline_mode = #tpu.pipeline_mode<synchronous>, transform_indices = @transform_11, window_bounds = array<i64: 3, 8, 16>}, {pipeline_mode = #tpu.pipeline_mode<synchronous>, transform_indices = @transform_12, window_bounds = array<i64: 3, 256, 256>}, {pipeline_mode = #tpu.pipeline_mode<synchronous>, transform_indices = @transform_13, window_bounds = array<i64: 1, 256>}, {pipeline_mode = #tpu.pipeline_mode<synchronous>, transform_indices = @transform_14, window_bounds = array<i64: 1, 64>}, {pipeline_mode = #tpu.pipeline_mode<synchronous>, transform_indices = @transform_15, window_bounds = array<i64: 1, 256>}, {pipeline_mode = #tpu.pipeline_mode<synchronous>, transform_indices = @transform_16, window_bounds = array<i64: 256, 64>}, {pipeline_mode = #tpu.pipeline_mode<synchronous>, transform_indices = @transform_17, window_bounds = array<i64: 64, 256>}, {pipeline_mode = #tpu.pipeline_mode<synchronous>, transform_indices = @transform_18, window_bounds = array<i64: 3, 4, 8>}, {pipeline_mode = #tpu.pipeline_mode<synchronous>, transform_indices = @transform_19, window_bounds = array<i64: 3, 256, 256>}, {pipeline_mode = #tpu.pipeline_mode<synchronous>, transform_indices = @transform_20, window_bounds = array<i64: 1, 256>}, {pipeline_mode = #tpu.pipeline_mode<synchronous>, transform_indices = @transform_21, window_bounds = array<i64: 1, 128>}, {pipeline_mode = #tpu.pipeline_mode<synchronous>, transform_indices = @transform_22, window_bounds = array<i64: 1, 256>}, {pipeline_mode = #tpu.pipeline_mode<synchronous>, transform_indices = @transform_23, window_bounds = array<i64: 256, 128>}, {pipeline_mode = #tpu.pipeline_mode<synchronous>, transform_indices = @transform_24, window_bounds = array<i64: 128, 256>}, {pipeline_mode = #tpu.pipeline_mode<synchronous>, transform_indices = @transform_25, window_bounds = array<i64: 2, 256, 300>}, {pipeline_mode = #tpu.pipeline_mode<synchronous>, transform_indices = @transform_26, window_bounds = array<i64: 1, 300>}, {pipeline_mode = #tpu.pipeline_mode<synchronous>, transform_indices = @transform_27, window_bounds = array<i64: 300, 2>}, {pipeline_mode = #tpu.pipeline_mode<synchronous>, transform_indices = @transform_28, window_bounds = array<i64: 1, 2>}, {pipeline_mode = #tpu.pipeline_mode<synchronous>, transform_indices = @transform_29, window_bounds = array<i64: 2, 2>}]} {
    %c0 = arith.constant 0 : index
    %c0_0 = arith.constant 0 : index
    %0 = vector.load %arg1[%c0, %c0_0] : memref<64x96xbf16, #tpu.memory_space<vmem>>, vector<64x96xbf16>
    %c0_1 = arith.constant 0 : index
    %c0_2 = arith.constant 0 : index
    %c0_3 = arith.constant 0 : index
    %1 = vector.load %arg2[%c0_1, %c0_2, %c0_3] : memref<3x32x64xbf16, #tpu.memory_space<vmem>>, vector<1x32x64xbf16>
    %2 = vector.shape_cast %1 : vector<1x32x64xbf16> to vector<32x64xbf16>
    %cst = arith.constant dense<0.000000e+00> : vector<32x96xf32>
    %3 = tpu.matmul %2, %0, %cst {dimension_numbers = #tpu.dot_dimension_numbers<[1], [0], [0], [1], [0, 0, 1, 1], [], []>} : vector<32x64xbf16>, vector<64x96xbf16>, vector<32x96xf32> -> vector<32x96xf32>
    %4 = arith.truncf %3 : vector<32x96xf32> to vector<32x96xbf16>
    %c0_4 = arith.constant 0 : index
    %c0_5 = arith.constant 0 : index
    %c0_6 = arith.constant 0 : index
    %5 = vector.load %arg3[%c0_4, %c0_5, %c0_6] : memref<3x96x256xbf16, #tpu.memory_space<vmem>>, vector<1x96x256xbf16>
    %6 = vector.shape_cast %5 : vector<1x96x256xbf16> to vector<96x256xbf16>
    %cst_7 = arith.constant dense<0.000000e+00> : vector<32x256xf32>
    %7 = tpu.matmul %4, %6, %cst_7 {dimension_numbers = #tpu.dot_dimension_numbers<[1], [0], [0], [1], [0, 0, 1, 1], [], []>} : vector<32x96xbf16>, vector<96x256xbf16>, vector<32x256xf32> -> vector<32x256xf32>
    %c1 = arith.constant 1 : index
    %c0_8 = arith.constant 0 : index
    %c0_9 = arith.constant 0 : index
    %8 = vector.load %arg2[%c1, %c0_8, %c0_9] : memref<3x32x64xbf16, #tpu.memory_space<vmem>>, vector<1x32x64xbf16>
    %9 = vector.shape_cast %8 : vector<1x32x64xbf16> to vector<32x64xbf16>
    %cst_10 = arith.constant dense<0.000000e+00> : vector<32x96xf32>
    %10 = tpu.matmul %9, %0, %cst_10 {dimension_numbers = #tpu.dot_dimension_numbers<[1], [0], [0], [1], [0, 0, 1, 1], [], []>} : vector<32x64xbf16>, vector<64x96xbf16>, vector<32x96xf32> -> vector<32x96xf32>
    %11 = arith.truncf %10 : vector<32x96xf32> to vector<32x96xbf16>
    %c1_11 = arith.constant 1 : index
    %c0_12 = arith.constant 0 : index
    %c0_13 = arith.constant 0 : index
    %12 = vector.load %arg3[%c1_11, %c0_12, %c0_13] : memref<3x96x256xbf16, #tpu.memory_space<vmem>>, vector<1x96x256xbf16>
    %13 = vector.shape_cast %12 : vector<1x96x256xbf16> to vector<96x256xbf16>
    %cst_14 = arith.constant dense<0.000000e+00> : vector<32x256xf32>
    %14 = tpu.matmul %11, %13, %cst_14 {dimension_numbers = #tpu.dot_dimension_numbers<[1], [0], [0], [1], [0, 0, 1, 1], [], []>} : vector<32x96xbf16>, vector<96x256xbf16>, vector<32x256xf32> -> vector<32x256xf32>
    %15 = arith.addf %7, %14 : vector<32x256xf32>
    %c2 = arith.constant 2 : index
    %c0_15 = arith.constant 0 : index
    %c0_16 = arith.constant 0 : index
    %16 = vector.load %arg2[%c2, %c0_15, %c0_16] : memref<3x32x64xbf16, #tpu.memory_space<vmem>>, vector<1x32x64xbf16>
    %17 = vector.shape_cast %16 : vector<1x32x64xbf16> to vector<32x64xbf16>
    %cst_17 = arith.constant dense<0.000000e+00> : vector<32x96xf32>
    %18 = tpu.matmul %17, %0, %cst_17 {dimension_numbers = #tpu.dot_dimension_numbers<[1], [0], [0], [1], [0, 0, 1, 1], [], []>} : vector<32x64xbf16>, vector<64x96xbf16>, vector<32x96xf32> -> vector<32x96xf32>
    %19 = arith.truncf %18 : vector<32x96xf32> to vector<32x96xbf16>
    %c2_18 = arith.constant 2 : index
    %c0_19 = arith.constant 0 : index
    %c0_20 = arith.constant 0 : index
    %20 = vector.load %arg3[%c2_18, %c0_19, %c0_20] : memref<3x96x256xbf16, #tpu.memory_space<vmem>>, vector<1x96x256xbf16>
    %21 = vector.shape_cast %20 : vector<1x96x256xbf16> to vector<96x256xbf16>
    %cst_21 = arith.constant dense<0.000000e+00> : vector<32x256xf32>
    %22 = tpu.matmul %19, %21, %cst_21 {dimension_numbers = #tpu.dot_dimension_numbers<[1], [0], [0], [1], [0, 0, 1, 1], [], []>} : vector<32x96xbf16>, vector<96x256xbf16>, vector<32x256xf32> -> vector<32x256xf32>
    %23 = arith.addf %15, %22 : vector<32x256xf32>
    %c0_22 = arith.constant 0 : index
    %c0_23 = arith.constant 0 : index
    %24 = vector.load %arg4[%c0_22, %c0_23] : memref<1x256xf32, #tpu.memory_space<vmem>>, vector<1x256xf32>
    %25 = vector.broadcast %24 : vector<1x256xf32> to vector<32x256xf32>
    %26 = arith.addf %23, %25 : vector<32x256xf32>
    %cst_24 = arith.constant 0.000000e+00 : f32
    %27 = vector.broadcast %cst_24 : f32 to vector<32x256xf32>
    %28 = arith.cmpf oge, %26, %27 : vector<32x256xf32>
    %cst_25 = arith.constant 2.000000e-01 : f32
    %29 = vector.broadcast %cst_25 : f32 to vector<32x256xf32>
    %30 = arith.mulf %29, %26 : vector<32x256xf32>
    %31 = arith.select %28, %26, %30 : vector<32x256xi1>, vector<32x256xf32>
    %32 = arith.truncf %31 : vector<32x256xf32> to vector<32x256xbf16>
    %c0_26 = arith.constant 0 : index
    %c0_27 = arith.constant 0 : index
    %c0_28 = arith.constant 0 : index
    %33 = vector.load %arg5[%c0_26, %c0_27, %c0_28] : memref<3x16x32xbf16, #tpu.memory_space<vmem>>, vector<1x16x32xbf16>
    %34 = vector.shape_cast %33 : vector<1x16x32xbf16> to vector<16x32xbf16>
    %cst_29 = arith.constant dense<0.000000e+00> : vector<16x256xf32>
    %35 = tpu.matmul %34, %32, %cst_29 {dimension_numbers = #tpu.dot_dimension_numbers<[1], [0], [0], [1], [0, 0, 1, 1], [], []>} : vector<16x32xbf16>, vector<32x256xbf16>, vector<16x256xf32> -> vector<16x256xf32>
    %36 = arith.truncf %35 : vector<16x256xf32> to vector<16x256xbf16>
    %c0_30 = arith.constant 0 : index
    %c0_31 = arith.constant 0 : index
    %c0_32 = arith.constant 0 : index
    %37 = vector.load %arg6[%c0_30, %c0_31, %c0_32] : memref<3x256x256xbf16, #tpu.memory_space<vmem>>, vector<1x256x256xbf16>
    %38 = vector.shape_cast %37 : vector<1x256x256xbf16> to vector<256x256xbf16>
    %cst_33 = arith.constant dense<0.000000e+00> : vector<16x256xf32>
    %39 = tpu.matmul %36, %38, %cst_33 {dimension_numbers = #tpu.dot_dimension_numbers<[1], [0], [0], [1], [0, 0, 1, 1], [], []>} : vector<16x256xbf16>, vector<256x256xbf16>, vector<16x256xf32> -> vector<16x256xf32>
    %c1_34 = arith.constant 1 : index
    %c0_35 = arith.constant 0 : index
    %c0_36 = arith.constant 0 : index
    %40 = vector.load %arg5[%c1_34, %c0_35, %c0_36] : memref<3x16x32xbf16, #tpu.memory_space<vmem>>, vector<1x16x32xbf16>
    %41 = vector.shape_cast %40 : vector<1x16x32xbf16> to vector<16x32xbf16>
    %cst_37 = arith.constant dense<0.000000e+00> : vector<16x256xf32>
    %42 = tpu.matmul %41, %32, %cst_37 {dimension_numbers = #tpu.dot_dimension_numbers<[1], [0], [0], [1], [0, 0, 1, 1], [], []>} : vector<16x32xbf16>, vector<32x256xbf16>, vector<16x256xf32> -> vector<16x256xf32>
    %43 = arith.truncf %42 : vector<16x256xf32> to vector<16x256xbf16>
    %c1_38 = arith.constant 1 : index
    %c0_39 = arith.constant 0 : index
    %c0_40 = arith.constant 0 : index
    %44 = vector.load %arg6[%c1_38, %c0_39, %c0_40] : memref<3x256x256xbf16, #tpu.memory_space<vmem>>, vector<1x256x256xbf16>
    %45 = vector.shape_cast %44 : vector<1x256x256xbf16> to vector<256x256xbf16>
    %cst_41 = arith.constant dense<0.000000e+00> : vector<16x256xf32>
    %46 = tpu.matmul %43, %45, %cst_41 {dimension_numbers = #tpu.dot_dimension_numbers<[1], [0], [0], [1], [0, 0, 1, 1], [], []>} : vector<16x256xbf16>, vector<256x256xbf16>, vector<16x256xf32> -> vector<16x256xf32>
    %47 = arith.addf %39, %46 : vector<16x256xf32>
    %c2_42 = arith.constant 2 : index
    %c0_43 = arith.constant 0 : index
    %c0_44 = arith.constant 0 : index
    %48 = vector.load %arg5[%c2_42, %c0_43, %c0_44] : memref<3x16x32xbf16, #tpu.memory_space<vmem>>, vector<1x16x32xbf16>
    %49 = vector.shape_cast %48 : vector<1x16x32xbf16> to vector<16x32xbf16>
    %cst_45 = arith.constant dense<0.000000e+00> : vector<16x256xf32>
    %50 = tpu.matmul %49, %32, %cst_45 {dimension_numbers = #tpu.dot_dimension_numbers<[1], [0], [0], [1], [0, 0, 1, 1], [], []>} : vector<16x32xbf16>, vector<32x256xbf16>, vector<16x256xf32> -> vector<16x256xf32>
    %51 = arith.truncf %50 : vector<16x256xf32> to vector<16x256xbf16>
    %c2_46 = arith.constant 2 : index
    %c0_47 = arith.constant 0 : index
    %c0_48 = arith.constant 0 : index
    %52 = vector.load %arg6[%c2_46, %c0_47, %c0_48] : memref<3x256x256xbf16, #tpu.memory_space<vmem>>, vector<1x256x256xbf16>
    %53 = vector.shape_cast %52 : vector<1x256x256xbf16> to vector<256x256xbf16>
    %cst_49 = arith.constant dense<0.000000e+00> : vector<16x256xf32>
    %54 = tpu.matmul %51, %53, %cst_49 {dimension_numbers = #tpu.dot_dimension_numbers<[1], [0], [0], [1], [0, 0, 1, 1], [], []>} : vector<16x256xbf16>, vector<256x256xbf16>, vector<16x256xf32> -> vector<16x256xf32>
    %55 = arith.addf %47, %54 : vector<16x256xf32>
    %c0_50 = arith.constant 0 : index
    %c0_51 = arith.constant 0 : index
    %56 = vector.load %arg7[%c0_50, %c0_51] : memref<1x256xf32, #tpu.memory_space<vmem>>, vector<1x256xf32>
    %57 = vector.broadcast %56 : vector<1x256xf32> to vector<16x256xf32>
    %58 = arith.addf %55, %57 : vector<16x256xf32>
    %cst_52 = arith.constant 0.000000e+00 : f32
    %59 = vector.broadcast %cst_52 : f32 to vector<16x256xf32>
    %60 = arith.cmpf oge, %58, %59 : vector<16x256xf32>
    %cst_53 = arith.constant 2.000000e-01 : f32
    %61 = vector.broadcast %cst_53 : f32 to vector<16x256xf32>
    %62 = arith.mulf %61, %58 : vector<16x256xf32>
    %63 = arith.select %60, %58, %62 : vector<16x256xi1>, vector<16x256xf32>
    %cst_54 = arith.constant dense<0.000000e+00> : vector<256xf32>
    %64 = vector.multi_reduction <add>, %63, %cst_54 [0] : vector<16x256xf32> to vector<256xf32>
    %65 = vector.shape_cast %64 : vector<256xf32> to vector<1x256xf32>
    %c0_55 = arith.constant 0 : index
    %c0_56 = arith.constant 0 : index
    %66 = vector.load %arg10[%c0_55, %c0_56] : memref<256x32xf32, #tpu.memory_space<vmem>>, vector<256x32xf32>
    %cst_57 = arith.constant dense<0.000000e+00> : vector<1x32xf32>
    %67 = tpu.matmul %65, %66, %cst_57 {dimension_numbers = #tpu.dot_dimension_numbers<[1], [0], [0], [1], [0, 0, 1, 1], [], []>} : vector<1x256xf32>, vector<256x32xf32>, vector<1x32xf32> -> vector<1x32xf32>
    %cst_58 = arith.constant 1.280000e+02 : f32
    %68 = vector.broadcast %cst_58 : f32 to vector<1x32xf32>
    %69 = arith.divf %67, %68 : vector<1x32xf32>
    %c0_59 = arith.constant 0 : index
    %c0_60 = arith.constant 0 : index
    %70 = vector.load %arg11[%c0_59, %c0_60] : memref<32x256xf32, #tpu.memory_space<vmem>>, vector<32x256xf32>
    %cst_61 = arith.constant dense<0.000000e+00> : vector<1x256xf32>
    %71 = tpu.matmul %69, %70, %cst_61 {dimension_numbers = #tpu.dot_dimension_numbers<[1], [0], [0], [1], [0, 0, 1, 1], [], []>} : vector<1x32xf32>, vector<32x256xf32>, vector<1x256xf32> -> vector<1x256xf32>
    %72 = vector.broadcast %71 : vector<1x256xf32> to vector<16x256xf32>
    %73 = arith.subf %63, %72 : vector<16x256xf32>
    %74 = arith.mulf %73, %73 : vector<16x256xf32>
    %cst_62 = arith.constant dense<0.000000e+00> : vector<256xf32>
    %75 = vector.multi_reduction <add>, %74, %cst_62 [0] : vector<16x256xf32> to vector<256xf32>
    %76 = vector.shape_cast %75 : vector<256xf32> to vector<1x256xf32>
    %c0_63 = arith.constant 0 : index
    %c0_64 = arith.constant 0 : index
    %77 = vector.load %arg10[%c0_63, %c0_64] : memref<256x32xf32, #tpu.memory_space<vmem>>, vector<256x32xf32>
    %cst_65 = arith.constant dense<0.000000e+00> : vector<1x32xf32>
    %78 = tpu.matmul %76, %77, %cst_65 {dimension_numbers = #tpu.dot_dimension_numbers<[1], [0], [0], [1], [0, 0, 1, 1], [], []>} : vector<1x256xf32>, vector<256x32xf32>, vector<1x32xf32> -> vector<1x32xf32>
    %cst_66 = arith.constant 1.280000e+02 : f32
    %79 = vector.broadcast %cst_66 : f32 to vector<1x32xf32>
    %80 = arith.divf %78, %79 : vector<1x32xf32>
    %c0_67 = arith.constant 0 : index
    %c0_68 = arith.constant 0 : index
    %81 = vector.load %arg8[%c0_67, %c0_68] : memref<1x32xf32, #tpu.memory_space<vmem>>, vector<1x32xf32>
    %cst_69 = arith.constant 8.000000e-01 : f32
    %82 = vector.broadcast %cst_69 : f32 to vector<1x32xf32>
    %83 = arith.addf %80, %82 : vector<1x32xf32>
    %84 = math.rsqrt %83 : vector<1x32xf32>
    %85 = arith.mulf %81, %84 : vector<1x32xf32>
    %c0_70 = arith.constant 0 : index
    %c0_71 = arith.constant 0 : index
    %86 = vector.load %arg11[%c0_70, %c0_71] : memref<32x256xf32, #tpu.memory_space<vmem>>, vector<32x256xf32>
    %cst_72 = arith.constant dense<0.000000e+00> : vector<1x256xf32>
    %87 = tpu.matmul %85, %86, %cst_72 {dimension_numbers = #tpu.dot_dimension_numbers<[1], [0], [0], [1], [0, 0, 1, 1], [], []>} : vector<1x32xf32>, vector<32x256xf32>, vector<1x256xf32> -> vector<1x256xf32>
    %88 = vector.broadcast %87 : vector<1x256xf32> to vector<16x256xf32>
    %89 = arith.mulf %73, %88 : vector<16x256xf32>
    %c0_73 = arith.constant 0 : index
    %c0_74 = arith.constant 0 : index
    %90 = vector.load %arg9[%c0_73, %c0_74] : memref<1x256xf32, #tpu.memory_space<vmem>>, vector<1x256xf32>
    %91 = vector.broadcast %90 : vector<1x256xf32> to vector<16x256xf32>
    %92 = arith.addf %89, %91 : vector<16x256xf32>
    %93 = arith.truncf %92 : vector<16x256xf32> to vector<16x256xbf16>
    %c0_75 = arith.constant 0 : index
    %c0_76 = arith.constant 0 : index
    %c0_77 = arith.constant 0 : index
    %94 = vector.load %arg12[%c0_75, %c0_76, %c0_77] : memref<3x8x16xbf16, #tpu.memory_space<vmem>>, vector<1x8x16xbf16>
    %95 = vector.shape_cast %94 : vector<1x8x16xbf16> to vector<8x16xbf16>
    %cst_78 = arith.constant dense<0.000000e+00> : vector<8x256xf32>
    %96 = tpu.matmul %95, %93, %cst_78 {dimension_numbers = #tpu.dot_dimension_numbers<[1], [0], [0], [1], [0, 0, 1, 1], [], []>} : vector<8x16xbf16>, vector<16x256xbf16>, vector<8x256xf32> -> vector<8x256xf32>
    %97 = arith.truncf %96 : vector<8x256xf32> to vector<8x256xbf16>
    %c0_79 = arith.constant 0 : index
    %c0_80 = arith.constant 0 : index
    %c0_81 = arith.constant 0 : index
    %98 = vector.load %arg13[%c0_79, %c0_80, %c0_81] : memref<3x256x256xbf16, #tpu.memory_space<vmem>>, vector<1x256x256xbf16>
    %99 = vector.shape_cast %98 : vector<1x256x256xbf16> to vector<256x256xbf16>
    %cst_82 = arith.constant dense<0.000000e+00> : vector<8x256xf32>
    %100 = tpu.matmul %97, %99, %cst_82 {dimension_numbers = #tpu.dot_dimension_numbers<[1], [0], [0], [1], [0, 0, 1, 1], [], []>} : vector<8x256xbf16>, vector<256x256xbf16>, vector<8x256xf32> -> vector<8x256xf32>
    %c1_83 = arith.constant 1 : index
    %c0_84 = arith.constant 0 : index
    %c0_85 = arith.constant 0 : index
    %101 = vector.load %arg12[%c1_83, %c0_84, %c0_85] : memref<3x8x16xbf16, #tpu.memory_space<vmem>>, vector<1x8x16xbf16>
    %102 = vector.shape_cast %101 : vector<1x8x16xbf16> to vector<8x16xbf16>
    %cst_86 = arith.constant dense<0.000000e+00> : vector<8x256xf32>
    %103 = tpu.matmul %102, %93, %cst_86 {dimension_numbers = #tpu.dot_dimension_numbers<[1], [0], [0], [1], [0, 0, 1, 1], [], []>} : vector<8x16xbf16>, vector<16x256xbf16>, vector<8x256xf32> -> vector<8x256xf32>
    %104 = arith.truncf %103 : vector<8x256xf32> to vector<8x256xbf16>
    %c1_87 = arith.constant 1 : index
    %c0_88 = arith.constant 0 : index
    %c0_89 = arith.constant 0 : index
    %105 = vector.load %arg13[%c1_87, %c0_88, %c0_89] : memref<3x256x256xbf16, #tpu.memory_space<vmem>>, vector<1x256x256xbf16>
    %106 = vector.shape_cast %105 : vector<1x256x256xbf16> to vector<256x256xbf16>
    %cst_90 = arith.constant dense<0.000000e+00> : vector<8x256xf32>
    %107 = tpu.matmul %104, %106, %cst_90 {dimension_numbers = #tpu.dot_dimension_numbers<[1], [0], [0], [1], [0, 0, 1, 1], [], []>} : vector<8x256xbf16>, vector<256x256xbf16>, vector<8x256xf32> -> vector<8x256xf32>
    %108 = arith.addf %100, %107 : vector<8x256xf32>
    %c2_91 = arith.constant 2 : index
    %c0_92 = arith.constant 0 : index
    %c0_93 = arith.constant 0 : index
    %109 = vector.load %arg12[%c2_91, %c0_92, %c0_93] : memref<3x8x16xbf16, #tpu.memory_space<vmem>>, vector<1x8x16xbf16>
    %110 = vector.shape_cast %109 : vector<1x8x16xbf16> to vector<8x16xbf16>
    %cst_94 = arith.constant dense<0.000000e+00> : vector<8x256xf32>
    %111 = tpu.matmul %110, %93, %cst_94 {dimension_numbers = #tpu.dot_dimension_numbers<[1], [0], [0], [1], [0, 0, 1, 1], [], []>} : vector<8x16xbf16>, vector<16x256xbf16>, vector<8x256xf32> -> vector<8x256xf32>
    %112 = arith.truncf %111 : vector<8x256xf32> to vector<8x256xbf16>
    %c2_95 = arith.constant 2 : index
    %c0_96 = arith.constant 0 : index
    %c0_97 = arith.constant 0 : index
    %113 = vector.load %arg13[%c2_95, %c0_96, %c0_97] : memref<3x256x256xbf16, #tpu.memory_space<vmem>>, vector<1x256x256xbf16>
    %114 = vector.shape_cast %113 : vector<1x256x256xbf16> to vector<256x256xbf16>
    %cst_98 = arith.constant dense<0.000000e+00> : vector<8x256xf32>
    %115 = tpu.matmul %112, %114, %cst_98 {dimension_numbers = #tpu.dot_dimension_numbers<[1], [0], [0], [1], [0, 0, 1, 1], [], []>} : vector<8x256xbf16>, vector<256x256xbf16>, vector<8x256xf32> -> vector<8x256xf32>
    %116 = arith.addf %108, %115 : vector<8x256xf32>
    %c0_99 = arith.constant 0 : index
    %c0_100 = arith.constant 0 : index
    %117 = vector.load %arg14[%c0_99, %c0_100] : memref<1x256xf32, #tpu.memory_space<vmem>>, vector<1x256xf32>
    %118 = vector.broadcast %117 : vector<1x256xf32> to vector<8x256xf32>
    %119 = arith.addf %116, %118 : vector<8x256xf32>
    %cst_101 = arith.constant 0.000000e+00 : f32
    %120 = vector.broadcast %cst_101 : f32 to vector<8x256xf32>
    %121 = arith.cmpf oge, %119, %120 : vector<8x256xf32>
    %cst_102 = arith.constant 2.000000e-01 : f32
    %122 = vector.broadcast %cst_102 : f32 to vector<8x256xf32>
    %123 = arith.mulf %122, %119 : vector<8x256xf32>
    %124 = arith.select %121, %119, %123 : vector<8x256xi1>, vector<8x256xf32>
    %cst_103 = arith.constant dense<0.000000e+00> : vector<256xf32>
    %125 = vector.multi_reduction <add>, %124, %cst_103 [0] : vector<8x256xf32> to vector<256xf32>
    %126 = vector.shape_cast %125 : vector<256xf32> to vector<1x256xf32>
    %c0_104 = arith.constant 0 : index
    %c0_105 = arith.constant 0 : index
    %127 = vector.load %arg17[%c0_104, %c0_105] : memref<256x64xf32, #tpu.memory_space<vmem>>, vector<256x64xf32>
    %cst_106 = arith.constant dense<0.000000e+00> : vector<1x64xf32>
    %128 = tpu.matmul %126, %127, %cst_106 {dimension_numbers = #tpu.dot_dimension_numbers<[1], [0], [0], [1], [0, 0, 1, 1], [], []>} : vector<1x256xf32>, vector<256x64xf32>, vector<1x64xf32> -> vector<1x64xf32>
    %cst_107 = arith.constant 3.200000e+01 : f32
    %129 = vector.broadcast %cst_107 : f32 to vector<1x64xf32>
    %130 = arith.divf %128, %129 : vector<1x64xf32>
    %c0_108 = arith.constant 0 : index
    %c0_109 = arith.constant 0 : index
    %131 = vector.load %arg18[%c0_108, %c0_109] : memref<64x256xf32, #tpu.memory_space<vmem>>, vector<64x256xf32>
    %cst_110 = arith.constant dense<0.000000e+00> : vector<1x256xf32>
    %132 = tpu.matmul %130, %131, %cst_110 {dimension_numbers = #tpu.dot_dimension_numbers<[1], [0], [0], [1], [0, 0, 1, 1], [], []>} : vector<1x64xf32>, vector<64x256xf32>, vector<1x256xf32> -> vector<1x256xf32>
    %133 = vector.broadcast %132 : vector<1x256xf32> to vector<8x256xf32>
    %134 = arith.subf %124, %133 : vector<8x256xf32>
    %135 = arith.mulf %134, %134 : vector<8x256xf32>
    %cst_111 = arith.constant dense<0.000000e+00> : vector<256xf32>
    %136 = vector.multi_reduction <add>, %135, %cst_111 [0] : vector<8x256xf32> to vector<256xf32>
    %137 = vector.shape_cast %136 : vector<256xf32> to vector<1x256xf32>
    %c0_112 = arith.constant 0 : index
    %c0_113 = arith.constant 0 : index
    %138 = vector.load %arg17[%c0_112, %c0_113] : memref<256x64xf32, #tpu.memory_space<vmem>>, vector<256x64xf32>
    %cst_114 = arith.constant dense<0.000000e+00> : vector<1x64xf32>
    %139 = tpu.matmul %137, %138, %cst_114 {dimension_numbers = #tpu.dot_dimension_numbers<[1], [0], [0], [1], [0, 0, 1, 1], [], []>} : vector<1x256xf32>, vector<256x64xf32>, vector<1x64xf32> -> vector<1x64xf32>
    %cst_115 = arith.constant 3.200000e+01 : f32
    %140 = vector.broadcast %cst_115 : f32 to vector<1x64xf32>
    %141 = arith.divf %139, %140 : vector<1x64xf32>
    %c0_116 = arith.constant 0 : index
    %c0_117 = arith.constant 0 : index
    %142 = vector.load %arg15[%c0_116, %c0_117] : memref<1x64xf32, #tpu.memory_space<vmem>>, vector<1x64xf32>
    %cst_118 = arith.constant 8.000000e-01 : f32
    %143 = vector.broadcast %cst_118 : f32 to vector<1x64xf32>
    %144 = arith.addf %141, %143 : vector<1x64xf32>
    %145 = math.rsqrt %144 : vector<1x64xf32>
    %146 = arith.mulf %142, %145 : vector<1x64xf32>
    %c0_119 = arith.constant 0 : index
    %c0_120 = arith.constant 0 : index
    %147 = vector.load %arg18[%c0_119, %c0_120] : memref<64x256xf32, #tpu.memory_space<vmem>>, vector<64x256xf32>
    %cst_121 = arith.constant dense<0.000000e+00> : vector<1x256xf32>
    %148 = tpu.matmul %146, %147, %cst_121 {dimension_numbers = #tpu.dot_dimension_numbers<[1], [0], [0], [1], [0, 0, 1, 1], [], []>} : vector<1x64xf32>, vector<64x256xf32>, vector<1x256xf32> -> vector<1x256xf32>
    %149 = vector.broadcast %148 : vector<1x256xf32> to vector<8x256xf32>
    %150 = arith.mulf %134, %149 : vector<8x256xf32>
    %c0_122 = arith.constant 0 : index
    %c0_123 = arith.constant 0 : index
    %151 = vector.load %arg16[%c0_122, %c0_123] : memref<1x256xf32, #tpu.memory_space<vmem>>, vector<1x256xf32>
    %152 = vector.broadcast %151 : vector<1x256xf32> to vector<8x256xf32>
    %153 = arith.addf %150, %152 : vector<8x256xf32>
    %154 = arith.truncf %153 : vector<8x256xf32> to vector<8x256xbf16>
    %c0_124 = arith.constant 0 : index
    %c0_125 = arith.constant 0 : index
    %c0_126 = arith.constant 0 : index
    %155 = vector.load %arg19[%c0_124, %c0_125, %c0_126] : memref<3x4x8xbf16, #tpu.memory_space<vmem>>, vector<1x4x8xbf16>
    %156 = vector.shape_cast %155 : vector<1x4x8xbf16> to vector<4x8xbf16>
    %cst_127 = arith.constant dense<0.000000e+00> : vector<4x256xf32>
    %157 = tpu.matmul %156, %154, %cst_127 {dimension_numbers = #tpu.dot_dimension_numbers<[1], [0], [0], [1], [0, 0, 1, 1], [], []>} : vector<4x8xbf16>, vector<8x256xbf16>, vector<4x256xf32> -> vector<4x256xf32>
    %158 = arith.truncf %157 : vector<4x256xf32> to vector<4x256xbf16>
    %c0_128 = arith.constant 0 : index
    %c0_129 = arith.constant 0 : index
    %c0_130 = arith.constant 0 : index
    %159 = vector.load %arg20[%c0_128, %c0_129, %c0_130] : memref<3x256x256xbf16, #tpu.memory_space<vmem>>, vector<1x256x256xbf16>
    %160 = vector.shape_cast %159 : vector<1x256x256xbf16> to vector<256x256xbf16>
    %cst_131 = arith.constant dense<0.000000e+00> : vector<4x256xf32>
    %161 = tpu.matmul %158, %160, %cst_131 {dimension_numbers = #tpu.dot_dimension_numbers<[1], [0], [0], [1], [0, 0, 1, 1], [], []>} : vector<4x256xbf16>, vector<256x256xbf16>, vector<4x256xf32> -> vector<4x256xf32>
    %c1_132 = arith.constant 1 : index
    %c0_133 = arith.constant 0 : index
    %c0_134 = arith.constant 0 : index
    %162 = vector.load %arg19[%c1_132, %c0_133, %c0_134] : memref<3x4x8xbf16, #tpu.memory_space<vmem>>, vector<1x4x8xbf16>
    %163 = vector.shape_cast %162 : vector<1x4x8xbf16> to vector<4x8xbf16>
    %cst_135 = arith.constant dense<0.000000e+00> : vector<4x256xf32>
    %164 = tpu.matmul %163, %154, %cst_135 {dimension_numbers = #tpu.dot_dimension_numbers<[1], [0], [0], [1], [0, 0, 1, 1], [], []>} : vector<4x8xbf16>, vector<8x256xbf16>, vector<4x256xf32> -> vector<4x256xf32>
    %165 = arith.truncf %164 : vector<4x256xf32> to vector<4x256xbf16>
    %c1_136 = arith.constant 1 : index
    %c0_137 = arith.constant 0 : index
    %c0_138 = arith.constant 0 : index
    %166 = vector.load %arg20[%c1_136, %c0_137, %c0_138] : memref<3x256x256xbf16, #tpu.memory_space<vmem>>, vector<1x256x256xbf16>
    %167 = vector.shape_cast %166 : vector<1x256x256xbf16> to vector<256x256xbf16>
    %cst_139 = arith.constant dense<0.000000e+00> : vector<4x256xf32>
    %168 = tpu.matmul %165, %167, %cst_139 {dimension_numbers = #tpu.dot_dimension_numbers<[1], [0], [0], [1], [0, 0, 1, 1], [], []>} : vector<4x256xbf16>, vector<256x256xbf16>, vector<4x256xf32> -> vector<4x256xf32>
    %169 = arith.addf %161, %168 : vector<4x256xf32>
    %c2_140 = arith.constant 2 : index
    %c0_141 = arith.constant 0 : index
    %c0_142 = arith.constant 0 : index
    %170 = vector.load %arg19[%c2_140, %c0_141, %c0_142] : memref<3x4x8xbf16, #tpu.memory_space<vmem>>, vector<1x4x8xbf16>
    %171 = vector.shape_cast %170 : vector<1x4x8xbf16> to vector<4x8xbf16>
    %cst_143 = arith.constant dense<0.000000e+00> : vector<4x256xf32>
    %172 = tpu.matmul %171, %154, %cst_143 {dimension_numbers = #tpu.dot_dimension_numbers<[1], [0], [0], [1], [0, 0, 1, 1], [], []>} : vector<4x8xbf16>, vector<8x256xbf16>, vector<4x256xf32> -> vector<4x256xf32>
    %173 = arith.truncf %172 : vector<4x256xf32> to vector<4x256xbf16>
    %c2_144 = arith.constant 2 : index
    %c0_145 = arith.constant 0 : index
    %c0_146 = arith.constant 0 : index
    %174 = vector.load %arg20[%c2_144, %c0_145, %c0_146] : memref<3x256x256xbf16, #tpu.memory_space<vmem>>, vector<1x256x256xbf16>
    %175 = vector.shape_cast %174 : vector<1x256x256xbf16> to vector<256x256xbf16>
    %cst_147 = arith.constant dense<0.000000e+00> : vector<4x256xf32>
    %176 = tpu.matmul %173, %175, %cst_147 {dimension_numbers = #tpu.dot_dimension_numbers<[1], [0], [0], [1], [0, 0, 1, 1], [], []>} : vector<4x256xbf16>, vector<256x256xbf16>, vector<4x256xf32> -> vector<4x256xf32>
    %177 = arith.addf %169, %176 : vector<4x256xf32>
    %c0_148 = arith.constant 0 : index
    %c0_149 = arith.constant 0 : index
    %178 = vector.load %arg21[%c0_148, %c0_149] : memref<1x256xf32, #tpu.memory_space<vmem>>, vector<1x256xf32>
    %179 = vector.broadcast %178 : vector<1x256xf32> to vector<4x256xf32>
    %180 = arith.addf %177, %179 : vector<4x256xf32>
    %cst_150 = arith.constant 0.000000e+00 : f32
    %181 = vector.broadcast %cst_150 : f32 to vector<4x256xf32>
    %182 = arith.cmpf oge, %180, %181 : vector<4x256xf32>
    %cst_151 = arith.constant 2.000000e-01 : f32
    %183 = vector.broadcast %cst_151 : f32 to vector<4x256xf32>
    %184 = arith.mulf %183, %180 : vector<4x256xf32>
    %185 = arith.select %182, %180, %184 : vector<4x256xi1>, vector<4x256xf32>
    %cst_152 = arith.constant dense<0.000000e+00> : vector<256xf32>
    %186 = vector.multi_reduction <add>, %185, %cst_152 [0] : vector<4x256xf32> to vector<256xf32>
    %187 = vector.shape_cast %186 : vector<256xf32> to vector<1x256xf32>
    %c0_153 = arith.constant 0 : index
    %c0_154 = arith.constant 0 : index
    %188 = vector.load %arg24[%c0_153, %c0_154] : memref<256x128xf32, #tpu.memory_space<vmem>>, vector<256x128xf32>
    %cst_155 = arith.constant dense<0.000000e+00> : vector<1x128xf32>
    %189 = tpu.matmul %187, %188, %cst_155 {dimension_numbers = #tpu.dot_dimension_numbers<[1], [0], [0], [1], [0, 0, 1, 1], [], []>} : vector<1x256xf32>, vector<256x128xf32>, vector<1x128xf32> -> vector<1x128xf32>
    %cst_156 = arith.constant 8.000000e+00 : f32
    %190 = vector.broadcast %cst_156 : f32 to vector<1x128xf32>
    %191 = arith.divf %189, %190 : vector<1x128xf32>
    %c0_157 = arith.constant 0 : index
    %c0_158 = arith.constant 0 : index
    %192 = vector.load %arg25[%c0_157, %c0_158] : memref<128x256xf32, #tpu.memory_space<vmem>>, vector<128x256xf32>
    %cst_159 = arith.constant dense<0.000000e+00> : vector<1x256xf32>
    %193 = tpu.matmul %191, %192, %cst_159 {dimension_numbers = #tpu.dot_dimension_numbers<[1], [0], [0], [1], [0, 0, 1, 1], [], []>} : vector<1x128xf32>, vector<128x256xf32>, vector<1x256xf32> -> vector<1x256xf32>
    %194 = vector.broadcast %193 : vector<1x256xf32> to vector<4x256xf32>
    %195 = arith.subf %185, %194 : vector<4x256xf32>
    %196 = arith.mulf %195, %195 : vector<4x256xf32>
    %cst_160 = arith.constant dense<0.000000e+00> : vector<256xf32>
    %197 = vector.multi_reduction <add>, %196, %cst_160 [0] : vector<4x256xf32> to vector<256xf32>
    %198 = vector.shape_cast %197 : vector<256xf32> to vector<1x256xf32>
    %c0_161 = arith.constant 0 : index
    %c0_162 = arith.constant 0 : index
    %199 = vector.load %arg24[%c0_161, %c0_162] : memref<256x128xf32, #tpu.memory_space<vmem>>, vector<256x128xf32>
    %cst_163 = arith.constant dense<0.000000e+00> : vector<1x128xf32>
    %200 = tpu.matmul %198, %199, %cst_163 {dimension_numbers = #tpu.dot_dimension_numbers<[1], [0], [0], [1], [0, 0, 1, 1], [], []>} : vector<1x256xf32>, vector<256x128xf32>, vector<1x128xf32> -> vector<1x128xf32>
    %cst_164 = arith.constant 8.000000e+00 : f32
    %201 = vector.broadcast %cst_164 : f32 to vector<1x128xf32>
    %202 = arith.divf %200, %201 : vector<1x128xf32>
    %c0_165 = arith.constant 0 : index
    %c0_166 = arith.constant 0 : index
    %203 = vector.load %arg22[%c0_165, %c0_166] : memref<1x128xf32, #tpu.memory_space<vmem>>, vector<1x128xf32>
    %cst_167 = arith.constant 8.000000e-01 : f32
    %204 = vector.broadcast %cst_167 : f32 to vector<1x128xf32>
    %205 = arith.addf %202, %204 : vector<1x128xf32>
    %206 = math.rsqrt %205 : vector<1x128xf32>
    %207 = arith.mulf %203, %206 : vector<1x128xf32>
    %c0_168 = arith.constant 0 : index
    %c0_169 = arith.constant 0 : index
    %208 = vector.load %arg25[%c0_168, %c0_169] : memref<128x256xf32, #tpu.memory_space<vmem>>, vector<128x256xf32>
    %cst_170 = arith.constant dense<0.000000e+00> : vector<1x256xf32>
    %209 = tpu.matmul %207, %208, %cst_170 {dimension_numbers = #tpu.dot_dimension_numbers<[1], [0], [0], [1], [0, 0, 1, 1], [], []>} : vector<1x128xf32>, vector<128x256xf32>, vector<1x256xf32> -> vector<1x256xf32>
    %210 = vector.broadcast %209 : vector<1x256xf32> to vector<4x256xf32>
    %211 = arith.mulf %195, %210 : vector<4x256xf32>
    %c0_171 = arith.constant 0 : index
    %c0_172 = arith.constant 0 : index
    %212 = vector.load %arg23[%c0_171, %c0_172] : memref<1x256xf32, #tpu.memory_space<vmem>>, vector<1x256xf32>
    %213 = vector.broadcast %212 : vector<1x256xf32> to vector<4x256xf32>
    %214 = arith.addf %211, %213 : vector<4x256xf32>
    %215 = vector.extract_strided_slice %214 {offsets = [0, 0], sizes = [2, 256], strides = [1, 1]} : vector<4x256xf32> to vector<2x256xf32>
    %216 = arith.truncf %215 : vector<2x256xf32> to vector<2x256xbf16>
    %c0_173 = arith.constant 0 : index
    %c0_174 = arith.constant 0 : index
    %c0_175 = arith.constant 0 : index
    %217 = vector.load %arg26[%c0_173, %c0_174, %c0_175] : memref<2x256x300xbf16, #tpu.memory_space<vmem>>, vector<1x256x300xbf16>
    %218 = vector.shape_cast %217 : vector<1x256x300xbf16> to vector<256x300xbf16>
    %cst_176 = arith.constant dense<0.000000e+00> : vector<2x300xf32>
    %219 = tpu.matmul %216, %218, %cst_176 {dimension_numbers = #tpu.dot_dimension_numbers<[1], [0], [0], [1], [0, 0, 1, 1], [], []>} : vector<2x256xbf16>, vector<256x300xbf16>, vector<2x300xf32> -> vector<2x300xf32>
    %220 = vector.extract_strided_slice %214 {offsets = [2, 0], sizes = [2, 256], strides = [1, 1]} : vector<4x256xf32> to vector<2x256xf32>
    %221 = arith.truncf %220 : vector<2x256xf32> to vector<2x256xbf16>
    %c1_177 = arith.constant 1 : index
    %c0_178 = arith.constant 0 : index
    %c0_179 = arith.constant 0 : index
    %222 = vector.load %arg26[%c1_177, %c0_178, %c0_179] : memref<2x256x300xbf16, #tpu.memory_space<vmem>>, vector<1x256x300xbf16>
    %223 = vector.shape_cast %222 : vector<1x256x300xbf16> to vector<256x300xbf16>
    %cst_180 = arith.constant dense<0.000000e+00> : vector<2x300xf32>
    %224 = tpu.matmul %221, %223, %cst_180 {dimension_numbers = #tpu.dot_dimension_numbers<[1], [0], [0], [1], [0, 0, 1, 1], [], []>} : vector<2x256xbf16>, vector<256x300xbf16>, vector<2x300xf32> -> vector<2x300xf32>
    %225 = arith.addf %219, %224 : vector<2x300xf32>
    %c0_181 = arith.constant 0 : index
    %c0_182 = arith.constant 0 : index
    %226 = vector.load %arg27[%c0_181, %c0_182] : memref<1x300xf32, #tpu.memory_space<vmem>>, vector<1x300xf32>
    %227 = vector.broadcast %226 : vector<1x300xf32> to vector<2x300xf32>
    %228 = arith.addf %225, %227 : vector<2x300xf32>
    %cst_183 = arith.constant 0.000000e+00 : f32
    %229 = vector.broadcast %cst_183 : f32 to vector<2x300xf32>
    %230 = arith.maximumf %228, %229 : vector<2x300xf32>
    %231 = arith.truncf %230 : vector<2x300xf32> to vector<2x300xbf16>
    %c0_184 = arith.constant 0 : index
    %c0_185 = arith.constant 0 : index
    %232 = vector.load %arg28[%c0_184, %c0_185] : memref<300x2xbf16, #tpu.memory_space<vmem>>, vector<300x2xbf16>
    %cst_186 = arith.constant dense<0.000000e+00> : vector<2x2xf32>
    %233 = tpu.matmul %231, %232, %cst_186 {dimension_numbers = #tpu.dot_dimension_numbers<[1], [0], [0], [1], [0, 0, 1, 1], [], []>} : vector<2x300xbf16>, vector<300x2xbf16>, vector<2x2xf32> -> vector<2x2xf32>
    %c0_187 = arith.constant 0 : index
    %c0_188 = arith.constant 0 : index
    %234 = vector.load %arg29[%c0_187, %c0_188] : memref<1x2xf32, #tpu.memory_space<vmem>>, vector<1x2xf32>
    %235 = vector.broadcast %234 : vector<1x2xf32> to vector<2x2xf32>
    %236 = arith.addf %233, %235 : vector<2x2xf32>
    %cst_189 = arith.constant dense<0xFF800000> : vector<2xf32>
    %237 = vector.multi_reduction <maximumf>, %236, %cst_189 [1] : vector<2x2xf32> to vector<2xf32>
    %238 = vector.shape_cast %237 : vector<2xf32> to vector<2x1xf32>
    %239 = vector.broadcast %238 : vector<2x1xf32> to vector<2x2xf32>
    %240 = arith.subf %236, %239 : vector<2x2xf32>
    %241 = math.exp %240 : vector<2x2xf32>
    %cst_190 = arith.constant dense<0.000000e+00> : vector<2xf32>
    %242 = vector.multi_reduction <add>, %241, %cst_190 [1] : vector<2x2xf32> to vector<2xf32>
    %243 = vector.shape_cast %242 : vector<2xf32> to vector<2x1xf32>
    %244 = tpu.reciprocal %243 {approx = true} : vector<2x1xf32> -> vector<2x1xf32>
    %245 = vector.broadcast %244 : vector<2x1xf32> to vector<2x2xf32>
    %246 = arith.mulf %241, %245 : vector<2x2xf32>
    %c0_191 = arith.constant 0 : index
    %c0_192 = arith.constant 0 : index
    %247 = vector.load %arg30[%c0_191, %c0_192] : memref<2x2xf32, #tpu.memory_space<vmem>>, vector<2x2xf32>
    tpu.vector_store %arg30[%c0_191, %c0_192], %246 {strides = array<i32>} : memref<2x2xf32, #tpu.memory_space<vmem>>, vector<2x2xf32>,
    return
  }
  func.func @transform_0(%arg0: i32) -> (i32, i32) {
    %c0_i32 = arith.constant 0 : i32
    %c0_i32_0 = arith.constant 0 : i32
    %c0_i32_1 = arith.constant 0 : i32
    return %c0_i32, %c0_i32_0 : i32, i32
  }
  func.func @transform_1(%arg0: i32) -> (i32, i32, i32) {
    %c0_i32 = arith.constant 0 : i32
    %c0_i32_0 = arith.constant 0 : i32
    %c0_i32_1 = arith.constant 0 : i32
    %c0_i32_2 = arith.constant 0 : i32
    return %c0_i32, %c0_i32_0, %c0_i32_1 : i32, i32, i32
  }
  func.func @transform_2(%arg0: i32) -> (i32, i32, i32) {
    %c0_i32 = arith.constant 0 : i32
    %c0_i32_0 = arith.constant 0 : i32
    %c0_i32_1 = arith.constant 0 : i32
    %c0_i32_2 = arith.constant 0 : i32
    return %c0_i32, %c0_i32_0, %c0_i32_1 : i32, i32, i32
  }
  func.func @transform_3(%arg0: i32) -> (i32, i32) {
    %c0_i32 = arith.constant 0 : i32
    %c0_i32_0 = arith.constant 0 : i32
    %c0_i32_1 = arith.constant 0 : i32
    return %c0_i32, %c0_i32_0 : i32, i32
  }
  func.func @transform_4(%arg0: i32) -> (i32, i32, i32) {
    %c0_i32 = arith.constant 0 : i32
    %c0_i32_0 = arith.constant 0 : i32
    %c0_i32_1 = arith.constant 0 : i32
    %c0_i32_2 = arith.constant 0 : i32
    return %c0_i32, %c0_i32_0, %c0_i32_1 : i32, i32, i32
  }
  func.func @transform_5(%arg0: i32) -> (i32, i32, i32) {
    %c0_i32 = arith.constant 0 : i32
    %c0_i32_0 = arith.constant 0 : i32
    %c0_i32_1 = arith.constant 0 : i32
    %c0_i32_2 = arith.constant 0 : i32
    return %c0_i32, %c0_i32_0, %c0_i32_1 : i32, i32, i32
  }
  func.func @transform_6(%arg0: i32) -> (i32, i32) {
    %c0_i32 = arith.constant 0 : i32
    %c0_i32_0 = arith.constant 0 : i32
    %c0_i32_1 = arith.constant 0 : i32
    return %c0_i32, %c0_i32_0 : i32, i32
  }
  func.func @transform_7(%arg0: i32) -> (i32, i32) {
    %c0_i32 = arith.constant 0 : i32
    %c0_i32_0 = arith.constant 0 : i32
    %c0_i32_1 = arith.constant 0 : i32
    return %c0_i32, %c0_i32_0 : i32, i32
  }
  func.func @transform_8(%arg0: i32) -> (i32, i32) {
    %c0_i32 = arith.constant 0 : i32
    %c0_i32_0 = arith.constant 0 : i32
    %c0_i32_1 = arith.constant 0 : i32
    return %c0_i32, %c0_i32_0 : i32, i32
  }
  func.func @transform_9(%arg0: i32) -> (i32, i32) {
    %c0_i32 = arith.constant 0 : i32
    %c0_i32_0 = arith.constant 0 : i32
    %c0_i32_1 = arith.constant 0 : i32
    return %c0_i32, %c0_i32_0 : i32, i32
  }
  func.func @transform_10(%arg0: i32) -> (i32, i32) {
    %c0_i32 = arith.constant 0 : i32
    %c0_i32_0 = arith.constant 0 : i32
    %c0_i32_1 = arith.constant 0 : i32
    return %c0_i32, %c0_i32_0 : i32, i32
  }
  func.func @transform_11(%arg0: i32) -> (i32, i32, i32) {
    %c0_i32 = arith.constant 0 : i32
    %c0_i32_0 = arith.constant 0 : i32
    %c0_i32_1 = arith.constant 0 : i32
    %c0_i32_2 = arith.constant 0 : i32
    return %c0_i32, %c0_i32_0, %c0_i32_1 : i32, i32, i32
  }
  func.func @transform_12(%arg0: i32) -> (i32, i32, i32) {
    %c0_i32 = arith.constant 0 : i32
    %c0_i32_0 = arith.constant 0 : i32
    %c0_i32_1 = arith.constant 0 : i32
    %c0_i32_2 = arith.constant 0 : i32
    return %c0_i32, %c0_i32_0, %c0_i32_1 : i32, i32, i32
  }
  func.func @transform_13(%arg0: i32) -> (i32, i32) {
    %c0_i32 = arith.constant 0 : i32
    %c0_i32_0 = arith.constant 0 : i32
    %c0_i32_1 = arith.constant 0 : i32
    return %c0_i32, %c0_i32_0 : i32, i32
  }
  func.func @transform_14(%arg0: i32) -> (i32, i32) {
    %c0_i32 = arith.constant 0 : i32
    %c0_i32_0 = arith.constant 0 : i32
    %c0_i32_1 = arith.constant 0 : i32
    return %c0_i32, %c0_i32_0 : i32, i32
  }
  func.func @transform_15(%arg0: i32) -> (i32, i32) {
    %c0_i32 = arith.constant 0 : i32
    %c0_i32_0 = arith.constant 0 : i32
    %c0_i32_1 = arith.constant 0 : i32
    return %c0_i32, %c0_i32_0 : i32, i32
  }
  func.func @transform_16(%arg0: i32) -> (i32, i32) {
    %c0_i32 = arith.constant 0 : i32
    %c0_i32_0 = arith.constant 0 : i32
    %c0_i32_1 = arith.constant 0 : i32
    return %c0_i32, %c0_i32_0 : i32, i32
  }
  func.func @transform_17(%arg0: i32) -> (i32, i32) {
    %c0_i32 = arith.constant 0 : i32
    %c0_i32_0 = arith.constant 0 : i32
    %c0_i32_1 = arith.constant 0 : i32
    return %c0_i32, %c0_i32_0 : i32, i32
  }
  func.func @transform_18(%arg0: i32) -> (i32, i32, i32) {
    %c0_i32 = arith.constant 0 : i32
    %c0_i32_0 = arith.constant 0 : i32
    %c0_i32_1 = arith.constant 0 : i32
    %c0_i32_2 = arith.constant 0 : i32
    return %c0_i32, %c0_i32_0, %c0_i32_1 : i32, i32, i32
  }
  func.func @transform_19(%arg0: i32) -> (i32, i32, i32) {
    %c0_i32 = arith.constant 0 : i32
    %c0_i32_0 = arith.constant 0 : i32
    %c0_i32_1 = arith.constant 0 : i32
    %c0_i32_2 = arith.constant 0 : i32
    return %c0_i32, %c0_i32_0, %c0_i32_1 : i32, i32, i32
  }
  func.func @transform_20(%arg0: i32) -> (i32, i32) {
    %c0_i32 = arith.constant 0 : i32
    %c0_i32_0 = arith.constant 0 : i32
    %c0_i32_1 = arith.constant 0 : i32
    return %c0_i32, %c0_i32_0 : i32, i32
  }
  func.func @transform_21(%arg0: i32) -> (i32, i32) {
    %c0_i32 = arith.constant 0 : i32
    %c0_i32_0 = arith.constant 0 : i32
    %c0_i32_1 = arith.constant 0 : i32
    return %c0_i32, %c0_i32_0 : i32, i32
  }
  func.func @transform_22(%arg0: i32) -> (i32, i32) {
    %c0_i32 = arith.constant 0 : i32
    %c0_i32_0 = arith.constant 0 : i32
    %c0_i32_1 = arith.constant 0 : i32
    return %c0_i32, %c0_i32_0 : i32, i32
  }
  func.func @transform_23(%arg0: i32) -> (i32, i32) {
    %c0_i32 = arith.constant 0 : i32
    %c0_i32_0 = arith.constant 0 : i32
    %c0_i32_1 = arith.constant 0 : i32
    return %c0_i32, %c0_i32_0 : i32, i32
  }
  func.func @transform_24(%arg0: i32) -> (i32, i32) {
    %c0_i32 = arith.constant 0 : i32
    %c0_i32_0 = arith.constant 0 : i32
    %c0_i32_1 = arith.constant 0 : i32
    return %c0_i32, %c0_i32_0 : i32, i32
  }
  func.func @transform_25(%arg0: i32) -> (i32, i32, i32) {
    %c0_i32 = arith.constant 0 : i32
    %c0_i32_0 = arith.constant 0 : i32
    %c0_i32_1 = arith.constant 0 : i32
    %c0_i32_2 = arith.constant 0 : i32
    return %c0_i32, %c0_i32_0, %c0_i32_1 : i32, i32, i32
  }
  func.func @transform_26(%arg0: i32) -> (i32, i32) {
    %c0_i32 = arith.constant 0 : i32
    %c0_i32_0 = arith.constant 0 : i32
    %c0_i32_1 = arith.constant 0 : i32
    return %c0_i32, %c0_i32_0 : i32, i32
  }
  func.func @transform_27(%arg0: i32) -> (i32, i32) {
    %c0_i32 = arith.constant 0 : i32
    %c0_i32_0 = arith.constant 0 : i32
    %c0_i32_1 = arith.constant 0 : i32
    return %c0_i32, %c0_i32_0 : i32, i32
  }
  func.func @transform_28(%arg0: i32) -> (i32, i32) {
    %c0_i32 = arith.constant 0 : i32
    %c0_i32_0 = arith.constant 0 : i32
    %c0_i32_1 = arith.constant 0 : i32
    return %c0_i32, %c0_i32_0 : i32, i32
  }
  func.func @transform_29(%arg0: i32) -> (i32, i32) {
    %c0_i32 = arith.constant 0 : i32
    %c0_i32_0 = arith.constant 0 : i32
    %c0_i32_1 = arith.constant 0 : i32
    return %c0_i32, %c0_i32_0 : i32, i32
  }
}

</mosaic_0001>

<bundles_post_ra>
// kernel: forward.1
= control target key start
LH: loop header
LB: loop body
LE: loop exit
PB: predicated region body
PF: predicated region fallthrough
CT: control target
= control target key end

     0   :  { %s8005_s6 = smov 1   ;;  %s8006_s10 = smov 2   ;;  %s9191_s0 = inlined_call_operand.smem [shape: u32[30], index: -1, kind: input, shape index: {}] }
   0x1   :  { %s8046_s5 = sld [smem:[%s9191_s0]]   ;;  %s8007_s14 = smov 3  }
   0x2   :  { %s8051_s9 = sld [smem:[%s9191_s0 + %s8005_s6]]   ;;  %s8008_s18 = smov 4  }
   0x3   :  { %s8056_s13 = sld [smem:[%s9191_s0 + %s8006_s10]]   ;;  %s8009_s22 = smov 5  }
   0x4   :  { %s8061_s17 = sld [smem:[%s9191_s0 + %s8007_s14]]   ;;  %s8010_s26 = smov 6  }
   0x5   :  { %s8066_s21 = sld [smem:[%s9191_s0 + %s8008_s18]]   ;;  %s8011_s30 = smov 7  }
   0x6   :  { %s8071_s25 = sld [smem:[%s9191_s0 + %s8009_s22]]   ;;  %s8012_s4 = smov 8  }
   0x7   :  { %s8076_s29 = sld [smem:[%s9191_s0 + %s8010_s26]]   ;;  %s8013_s10 = smov 9  }
   0x8   :  { %s8081_s3 = sld [smem:[%s9191_s0 + %s8011_s30]]   ;;  %s8014_s15 = smov 10  }
   0x9   :  { %s8086_s8 = sld [smem:[%s9191_s0 + %s8012_s4]]   ;;  %s8015_s20 = smov 11  }
   0xa   :  { %s8091_s14 = sld [smem:[%s9191_s0 + %s8013_s10]]   ;;  %s8016_s26 = smov 12  }
   0xb   :  { %s8096_s19 = sld [smem:[%s9191_s0 + %s8014_s15]]   ;;  %s8017_s1 = smov 13  }
   0xc   :  { %s8101_s24 = sld [smem:[%s9191_s0 + %s8015_s20]]   ;;  %s8018_s7 = smov 14  }
   0xd   :  { %s8106_s30 = sld [smem:[%s9191_s0 + %s8016_s26]]   ;;  %s8019_s15 = smov 15  }
   0xe   :  { %s8111_s6 = sld [smem:[%s9191_s0 + %s8017_s1]]   ;;  %s8020_s22 = smov 16  }
   0xf   :  { %s8116_s12 = sld [smem:[%s9191_s0 + %s8018_s7]]   ;;  %s8021_s28 = smov 17  }
  0x10   :  { %s8121_s20 = sld [smem:[%s9191_s0 + %s8019_s15]]   ;;  %s8022_s7 = smov 18  }
  0x11   :  { %s8126_s27 = sld [smem:[%s9191_s0 + %s8020_s22]]   ;;  %s8023_s15 = smov 19  }
  0x12   :  { %s8131_s4 = sld [smem:[%s9191_s0 + %s8021_s28]]   ;;  %s8024_s22 = smov 20  }
  0x13   :  { %s8025_s28 = smov 21  }
  0x14   :  { %9198 = sst [smem:[#allocation5_spill]] %s8111_s6 }
  0x15   :  { %9199 = sst [smem:[#allocation6_spill]] %s8116_s12 }
  0x16   :  { %9200 = sst [smem:[#allocation7_spill]] %s8121_s20 }
  0x17   :  { %s8136_s12 = sld [smem:[%s9191_s0 + %s8022_s7]]   ;;  %s8026_s7 = smov 22  }
  0x18   :  { %9201 = sst [smem:[#allocation8_spill]] %s8131_s4 }
  0x19   :  { %s8141_s20 = sld [smem:[%s9191_s0 + %s8023_s15]]   ;;  %s8027_s15 = smov 23  }
  0x1a   :  { %s8146_s6 = sld [smem:[%s9191_s0 + %s8024_s22]]   ;;  %s8028_s22 = smov 24  }
  0x1b   :  { %s8151_s4 = sld [smem:[%s9191_s0 + %s8025_s28]]   ;;  %s8029_s28 = smov 25  }
  0x1d   :  { %9202 = sst [smem:[#allocation9_spill]] %s8136_s12 }
  0x1e   :  { %s8156_s12 = sld [smem:[%s9191_s0 + %s8026_s7]]   ;;  %s8030_s7 = smov 26  }
  0x1f   :  { %9203 = sst [smem:[#allocation10_spill]] %s8141_s20 }
  0x20   :  { %9204 = sst [smem:[#allocation11_spill]] %s8146_s6 }
  0x21   :  { %9205 = sst [smem:[#allocation12_spill]] %s8151_s4 }
  0x22   :  { %s8161_s20 = sld [smem:[%s9191_s0 + %s8027_s15]]   ;;  %s8031_s15 = smov 27  }
  0x23   :  { %s8166_s6 = sld [smem:[%s9191_s0 + %s8028_s22]]   ;;  %s8032_s22 = smov 28  }
  0x24   :  { %9206 = sst [smem:[#allocation13_spill]] %s8156_s12 }
  0x25   :  { %s8171_s4 = sld [smem:[%s9191_s0 + %s8029_s28]]   ;;  %s8033_s28 = smov 29  }
  0x26   :  { %s8176_s12 = sld [smem:[%s9191_s0 + %s8030_s7]]  }
  0x28   :  { %9207 = sst [smem:[#allocation14_spill]] %s8161_s20 }
  0x29   :  { %9208 = sst [smem:[#allocation15_spill]] %s8166_s6 }
  0x2a   :  { %s8181_s20 = sld [smem:[%s9191_s0 + %s8031_s15]]  }
  0x2b   :  { %9209 = sst [smem:[#allocation16_spill]] %s8171_s4 }
  0x2c   :  { %s8186_s6 = sld [smem:[%s9191_s0 + %s8032_s22]]  }
  0x2d   :  { %s8191_s4 = sld [smem:[%s9191_s0 + %s8033_s28]]  }
  0x2e   :  { %v7325_v0 = vld [vmem:[%s8046_s5] sm:$0xff]   ;;  %v7326_v1 = vld [vmem:[%s8046_s5 + $0x8] sm:$0xff]   ;;  %v7327_v2 = vld [vmem:[%s8046_s5 + $0x10] sm:$0xff]   ;;  %vm170_vm0 = vcmask 523264   ;;  %v8034_v23 = vmov 0  }
  0x2f   :  { %6930 = vmatprep.subr.bf16.mxu1 %v7325_v0  ;;  %6918 = vmatprep.subr.bf16.mxu0 %v7325_v0  ;;  %v7329_v3 = vld [vmem:[%s8051_s9 + $0x10] sm:$0xff]   ;;  %v7331_v4 = vld [vmem:[%s8051_s9] sm:$0xff]   ;;  %v7328_v5 = vld [vmem:[%s8046_s5 + $0x18] sm:$0xff]  }
  0x30   :  { %6931 = vmatpush3.bf16.msra.mxu1 %v7325_v0  ;;  %6919 = vmatpush3.bf16.msra.mxu0 %v7325_v0  ;;  %v7337_v6 = vld [vmem:[%s8056_s13 + $0x64] ss:$8 sps:$4 sm:$0xff]   ;;  %v7330_v7 = vld [vmem:[%s8051_s9 + $0x18] sm:$0xff]   ;;  %v7335_v10 = vld [vmem:[%s8056_s13 + $0x60] ss:$8 sps:$4 sm:$0xff]  }
  0x31   :  { %6932 = vmatprep.subr.bf16.mxu1 %v7326_v1  ;;  %6920 = vmatprep.subr.bf16.mxu0 %v7326_v1  ;;  %v7332_v8 = vld [vmem:[%s8051_s9 + $0x8] sm:$0xff]   ;;  %v7333_v9 = vld [vmem:[%s8051_s9 + $0x20] sm:$0xff]   ;;  %v7340_v11 = vld [vmem:[%s8056_s13 + $0x74] ss:$8 sps:$4 sm:$0xff]  }
  0x32   :  { %6938 = vmatprep.mubr.msk.bf16.mxu1 %vm170_vm0, %v7329_v3  ;;  %6926 = vmatprep.mubr.msk.bf16.mxu0 %vm170_vm0, %v7331_v4  ;;  %v7338_v12 = vld [vmem:[%s8056_s13 + $0x70] ss:$8 sps:$4 sm:$0xff]   ;;  %v7343_v13 = vld [vmem:[%s8056_s13 + $0x84] ss:$8 sps:$4 sm:$0xff]   ;;  %v7341_v14 = vld [vmem:[%s8056_s13 + $0x80] ss:$8 sps:$4 sm:$0xff]  }
  0x33   :  { %v7346_v15 = vld [vmem:[%s8056_s13 + $0x94] ss:$8 sps:$4 sm:$0xff]   ;;  %v7344_v16 = vld [vmem:[%s8056_s13 + $0x90] ss:$8 sps:$4 sm:$0xff]   ;;  %v7349_v17 = vld [vmem:[%s8056_s13 + $0xa4] ss:$8 sps:$4 sm:$0xff]  }
  0x34   :  { %6933 = vmatpush3.bf16.msra.mxu1 %v7326_v1  ;;  %6921 = vmatpush3.bf16.msra.mxu0 %v7326_v1  ;;  %v7334_v18 = vld [vmem:[%s8051_s9 + $0x28] sm:$0xff]   ;;  %v7352_v20 = vld [vmem:[%s8056_s13 + $0xb4] ss:$8 sps:$4 sm:$0xff]   ;;  %v7350_v21 = vld [vmem:[%s8056_s13 + $0xb0] ss:$8 sps:$4 sm:$0xff]  }
  0x35   :  { %6934 = vmatprep.subr.bf16.mxu1 %v7327_v2  ;;  %6922 = vmatprep.subr.bf16.mxu0 %v7327_v2  ;;  %v7347_v19 = vld [vmem:[%s8056_s13 + $0xa0] ss:$8 sps:$4 sm:$0xff]   ;;  %v7355_v22 = vld [vmem:[%s8056_s13 + $0x4] ss:$8 sps:$4 sm:$0xff]  }
  0x38   :  { %6935 = vmatpush3.bf16.msra.mxu1 %v7327_v2  ;;  %6923 = vmatpush3.bf16.msra.mxu0 %v7327_v2 }
  0x39   :  { %6936 = vmatprep.subr.bf16.mxu1 %v7328_v5  ;;  %6924 = vmatprep.subr.bf16.mxu0 %v7328_v5 }
  0x3c   :  { %6937 = vmatpush3.bf16.msra.mxu1 %v7328_v5  ;;  %6925 = vmatpush3.bf16.msra.mxu0 %v7328_v5 }
  0x3d   :  { %6942 = vmatprep.subr.bf16.mxu1 %v7325_v0  ;;  %392 = vmatprep.subr.bf16.mxu0 %v7337_v6 }
  0x3f   :  { %6939 = vmatmul.mubr.msk.bf16.vlgmr.msra.gmra.mrb[0].mxu1 %vm170_vm0, %v7330_v7  ;;  %6927 = vmatmul.mubr.msk.bf16.vlgmr.msra.gmra.mrb[0].mxu0 %vm170_vm0, %v7332_v8 }
  0x40   :  { %6943 = vmatpush3.bf16.msra.mxu1 %v7325_v0  ;;  %6950 = vmatprep.mubr.msk.bf16.mxu1 %vm170_vm0, %v7333_v9 }
  0x41   :  { %6944 = vmatprep.subr.bf16.mxu1 %v7326_v1  ;;  %393 = vmatpush1.bf16.msra.mxu0 %v7335_v10 }
  0x42   :  { %394 = vmatprep.subr.bf16.mxu0 %v7340_v11  ;;  %424 = vmatprep.mubr.bf16.mxu0 %v8034_v23 }
  0x44   :  { %6945 = vmatpush3.bf16.msra.mxu1 %v7326_v1 }
  0x45   :  { %6946 = vmatprep.subr.bf16.mxu1 %v7327_v2  ;;  %395 = vmatpush1.bf16.msra.mxu0 %v7338_v12 }
  0x46   :  { %396 = vmatprep.subr.bf16.mxu0 %v7343_v13 }
  0x48   :  { %6947 = vmatpush3.bf16.msra.mxu1 %v7327_v2 }
  0x49   :  { %6948 = vmatprep.subr.bf16.mxu1 %v7328_v5  ;;  %397 = vmatpush1.bf16.msra.mxu0 %v7341_v14 }
  0x4a   :  { %398 = vmatprep.subr.bf16.mxu0 %v7346_v15 }
  0x4c   :  { %6949 = vmatpush3.bf16.msra.mxu1 %v7328_v5 }
  0x4d   :  { %399 = vmatpush1.bf16.msra.mxu0 %v7344_v16 }
  0x4e   :  { %400 = vmatprep.subr.bf16.mxu0 %v7349_v17 }
  0x4f   :  { %6951 = vmatmul.mubr.msk.bf16.vlgmr.msra.gmra.mrb[4].mxu1 %vm170_vm0, %v7334_v18 }
  0x50   :  { %955 = vmatprep.mubr.bf16.mxu1 %v8034_v23 }
  0x51   :  { %401 = vmatpush1.bf16.msra.mxu0 %v7347_v19 }
  0x52   :  { %402 = vmatprep.subr.bf16.mxu0 %v7352_v20 }
  0x55   :  { %403 = vmatpush1.bf16.msra.mxu0 %v7350_v21 }
  0x56   :  { %511 = vmatprep.subr.bf16.mxu0 %v7355_v22 }
  0x57   :  { %64 = vsyncpa [#allocation3], 0  ;;  %v7353_v32 = vld [vmem:[%s8056_s13] ss:$8 sps:$4 sm:$0xff]   ;;  %vm385_vm1 = vcmask 785408   ;;  %v778_v1 = vlaneseq  ;;  %vm831_vm10 = vcmask 261120  }
  0x58   :  { %v7358_v36 = vld [vmem:[%s8056_s13 + $0x14] ss:$8 sps:$4 sm:$0xff]   ;;  %v7356_v38 = vld [vmem:[%s8056_s13 + $0x10] ss:$8 sps:$4 sm:$0xff]   ;;  %v7361_v39 = vld [vmem:[%s8056_s13 + $0x24] ss:$8 sps:$4 sm:$0xff]  }
  0x59   :  { %v7359_v40 = vld [vmem:[%s8056_s13 + $0x20] ss:$8 sps:$4 sm:$0xff]   ;;  %v7364_v41 = vld [vmem:[%s8056_s13 + $0x34] ss:$8 sps:$4 sm:$0xff]   ;;  %v7362_v42 = vld [vmem:[%s8056_s13 + $0x30] ss:$8 sps:$4 sm:$0xff]  }
  0x5a   :  { %v7367_v43 = vld [vmem:[%s8056_s13 + $0x44] ss:$8 sps:$4 sm:$0xff]   ;;  %v7365_v47 = vld [vmem:[%s8056_s13 + $0x40] ss:$8 sps:$4 sm:$0xff]   ;;  %v7370_v50 = vld [vmem:[%s8056_s13 + $0x54] ss:$8 sps:$4 sm:$0xff]  }
  0x5b   :  { %v7368_v52 = vld [vmem:[%s8056_s13 + $0x50] ss:$8 sps:$4 sm:$0xff]   ;;  %v7373_v53 = vld [vmem:[%s8056_s13 + $0xc4] ss:$8 sps:$4 sm:$0xff]   ;;  %v7371_v54 = vld [vmem:[%s8056_s13 + $0xc0] ss:$8 sps:$4 sm:$0xff]  }
  0x5c   :  { %v7376_v55 = vld [vmem:[%s8056_s13 + $0xd4] ss:$8 sps:$4 sm:$0xff]   ;;  %v7374_v56 = vld [vmem:[%s8056_s13 + $0xd0] ss:$8 sps:$4 sm:$0xff]   ;;  %v7379_v57 = vld [vmem:[%s8056_s13 + $0xe4] ss:$8 sps:$4 sm:$0xff]  }
  0x5d   :  { %v7377_v58 = vld [vmem:[%s8056_s13 + $0xe0] ss:$8 sps:$4 sm:$0xff]   ;;  %v7382_v59 = vld [vmem:[%s8056_s13 + $0xf4] ss:$8 sps:$4 sm:$0xff]   ;;  %v7380_v60 = vld [vmem:[%s8056_s13 + $0xf0] ss:$8 sps:$4 sm:$0xff]  }
  0x5e   :  { %v7385_v61 = vld [vmem:[%s8056_s13 + $0x104] ss:$8 sps:$4 sm:$0xff]   ;;  %v7383_v62 = vld [vmem:[%s8056_s13 + $0x100] ss:$8 sps:$4 sm:$0xff]   ;;  %v7388_v63 = vld [vmem:[%s8056_s13 + $0x114] ss:$8 sps:$4 sm:$0xff]  }
  0x5f   :  { %v7386_v0 = vld [vmem:[%s8056_s13 + $0x110] ss:$8 sps:$4 sm:$0xff]   ;;  %v8259_v2 = vshrl.u32 %v778_v1, 7  ;;  %v776_v4 = vld [vmem:[%s8061_s17] sm:$0x3]  ;;  %vm2141_vm15 = vcmask 130048  }
  0x60   :  { %v7416_v1 = vld [vmem:[%s8071_s25 + $0x180] ss:$8 sps:$4 sm:$0xff]   ;;  %s9210_s0 = sld [smem:[#allocation8_spill]]  ;;  %s9211_s5 = sld [smem:[#allocation5_spill]] }
  0x61   :  { %v8262_v3 = vsub.s32 0, %v8259_v2  ;;  %v8266_v5 = vsub.s32 1, %v8259_v2  ;;  %s9212_s9 = sld [smem:[#allocation6_spill]]  ;;  %s9213_s13 = sld [smem:[#allocation7_spill]] }
  0x62   :  { %s9214_s17 = sld [smem:[#allocation10_spill]] }
  0x63   :  { %v781_v6 = vrot.slane %v776_v4, %v8262_v3  ;;  %v785_v7 = vrot.slane %v776_v4, %v8266_v5  ;;  %v7421_v4 = vld [vmem:[%s8071_s25 + $0x194] ss:$8 sps:$4 sm:$0xff]  }
 0x112   :  { %v6940_v24 = vpop.f32.mrb[0].mxu1  ;;  %v6928_v25 = vpop.f32.mrb[0].mxu0 }
 0x113   :  { %v295_v26 = vpop.f32.mrb[1].mxu1  ;;  %v211_v27 = vpop.f32.mrb[1].mxu0 }
 0x114   :  { %v6941_v28 = vpop.f32.mrb[2].mxu1  ;;  %v6929_v29 = vpop.f32.mrb[2].mxu0 }
 0x115   :  { %v311_v30 = vpack.c.bf16 %v6941_v28, %v6940_v24  ;;  %v298_v31 = vpop.f32.mrb[3].mxu1  ;;  %v227_v33 = vpack.c.bf16 %v6929_v29, %v6928_v25  ;;  %v214_v34 = vpop.f32.mrb[3].mxu0 }
 0x116   :  { %v310_v35 = vpack.c.bf16 %v298_v31, %v295_v26  ;;  %v226_v37 = vpack.c.bf16 %v214_v34, %v211_v27 }
 0x118   :  { %5882 = vmatmul.mubr.msk.bf16.vlgmr.msra.gmra.mrb[4].mxu0 %vm385_vm1, %v310_v35 }
 0x119   :  { %512 = vmatpush1.bf16.msra.mxu0 %v7353_v32  ;;  %434 = vmatprep.mubr.bf16.mxu0 %v8034_v23 }
 0x11a   :  { %513 = vmatprep.subr.bf16.mxu0 %v7358_v36 }
 0x11d   :  { %514 = vmatpush1.bf16.msra.mxu0 %v7356_v38 }
 0x11e   :  { %515 = vmatprep.subr.bf16.mxu0 %v7361_v39 }
 0x120   :  { %5883 = vmatmul.mubr.msk.bf16.gmra.mrb[8].mxu0 %vm385_vm1, %v311_v30 }
 0x121   :  { %516 = vmatpush1.bf16.msra.mxu0 %v7359_v40  ;;  %543 = vmatprep.mubr.bf16.mxu0 %v8034_v23 }
 0x122   :  { %517 = vmatprep.subr.bf16.mxu0 %v7364_v41  ;;  %v6952_v44 = vpop.f32.mrb[4].mxu1 }
 0x123   :  { %v619_v45 = vpop.f32.mrb[5].mxu1 }
 0x124   :  { %v6953_v46 = vpop.f32.mrb[6].mxu1 }
 0x125   :  { %518 = vmatpush1.bf16.msra.mxu0 %v7362_v42  ;;  %v635_v48 = vpack.c.bf16 %v6953_v46, %v6952_v44  ;;  %v622_v49 = vpop.f32.mrb[7].mxu1  ;;  %v7389_v46 = vld [vmem:[%s8066_s21 + $0x8] sm:$0xff]  }
 0x126   :  { %519 = vmatprep.subr.bf16.mxu0 %v7367_v43  ;;  %v634_v51 = vpack.c.bf16 %v622_v49, %v619_v45  ;;  %v7394_v45 = vld [vmem:[%s8071_s25 + $0x104] ss:$8 sps:$4 sm:$0xff]   ;;  %v7397_v49 = vld [vmem:[%s8071_s25 + $0x114] ss:$8 sps:$4 sm:$0xff]  }
 0x129   :  { %520 = vmatpush1.bf16.msra.mxu0 %v7365_v47  ;;  %v7390_v47 = vld [vmem:[%s8066_s21] sm:$0xff]  }
 0x12a   :  { %521 = vmatprep.subr.bf16.mxu0 %v7370_v50  ;;  %v7395_v50 = vld [vmem:[%s8071_s25 + $0x110] ss:$8 sps:$4 sm:$0xff]  }
 0x12d   :  { %522 = vmatpush1.bf16.msra.mxu0 %v7368_v52  ;;  %v7391_v52 = vld [vmem:[%s8066_s21 + $0x10] sm:$0xff]   ;;  %s9215_s21 = sld [smem:[#allocation9_spill]] }
 0x12e   :  { %715 = vmatprep.subr.bf16.mxu0 %v7373_v53  ;;  %v7398_v53 = vld [vmem:[%s8071_s25 + $0x120] ss:$8 sps:$4 sm:$0xff]  }
 0x130   :  { %5896 = vmatmul.mubr.msk.bf16.vlgmr.msra.gmra.mrb[4].mxu0 %vm385_vm1, %v226_v37 }
 0x131   :  { %716 = vmatpush1.bf16.msra.mxu0 %v7371_v54  ;;  %553 = vmatprep.mubr.bf16.mxu0 %v8034_v23  ;;  %v7403_v54 = vld [vmem:[%s8071_s25 + $0x134] ss:$8 sps:$4 sm:$0xff]  }
 0x132   :  { %717 = vmatprep.subr.bf16.mxu0 %v7376_v55  ;;  %v7401_v55 = vld [vmem:[%s8071_s25 + $0x130] ss:$8 sps:$4 sm:$0xff]  }
 0x135   :  { %718 = vmatpush1.bf16.msra.mxu0 %v7374_v56  ;;  %v7406_v56 = vld [vmem:[%s8071_s25 + $0x144] ss:$8 sps:$4 sm:$0xff]  }
 0x136   :  { %719 = vmatprep.subr.bf16.mxu0 %v7379_v57  ;;  %v7404_v57 = vld [vmem:[%s8071_s25 + $0x140] ss:$8 sps:$4 sm:$0xff]  }
 0x138   :  { %5897 = vmatmul.mubr.msk.bf16.gmra.mrb[8].mxu0 %vm385_vm1, %v227_v33 }
 0x139   :  { %720 = vmatpush1.bf16.msra.mxu0 %v7377_v58  ;;  %747 = vmatprep.mubr.bf16.mxu0 %v8034_v23  ;;  %v7409_v58 = vld [vmem:[%s8071_s25 + $0x154] ss:$8 sps:$4 sm:$0xff]  }
 0x13a   :  { %721 = vmatprep.subr.bf16.mxu0 %v7382_v59  ;;  %v7407_v59 = vld [vmem:[%s8071_s25 + $0x150] ss:$8 sps:$4 sm:$0xff]  }
 0x13d   :  { %722 = vmatpush1.bf16.msra.mxu0 %v7380_v60  ;;  %v7412_v60 = vld [vmem:[%s8071_s25 + $0x164] ss:$8 sps:$4 sm:$0xff]  }
 0x13e   :  { %723 = vmatprep.subr.bf16.mxu0 %v7385_v61  ;;  %v7410_v61 = vld [vmem:[%s8071_s25 + $0x160] ss:$8 sps:$4 sm:$0xff]  }
 0x141   :  { %724 = vmatpush1.bf16.msra.mxu0 %v7383_v62  ;;  %v7415_v62 = vld [vmem:[%s8071_s25 + $0x174] ss:$8 sps:$4 sm:$0xff]  }
 0x142   :  { %725 = vmatprep.subr.bf16.mxu0 %v7388_v63  ;;  %v7413_v63 = vld [vmem:[%s8071_s25 + $0x170] ss:$8 sps:$4 sm:$0xff]  }
 0x145   :  { %726 = vmatpush1.bf16.msra.mxu0 %v7386_v0  ;;  %v7418_v0 = vld [vmem:[%s8071_s25 + $0x184] ss:$8 sps:$4 sm:$0xff]  }
 0x148   :  { %5930 = vmatmul.mubr.msk.bf16.vlgmr.msra.gmra.mrb[4].mxu0 %vm385_vm1, %v634_v51  ;;  %v7400_v51 = vld [vmem:[%s8071_s25 + $0x124] ss:$8 sps:$4 sm:$0xff]  }
 0x149   :  { %757 = vmatprep.mubr.bf16.mxu0 %v8034_v23 }
 0x150   :  { %5931 = vmatmul.mubr.msk.bf16.gmra.mrb[8].mxu0 %vm385_vm1, %v635_v48  ;;  %v7392_v48 = vld [vmem:[%s8071_s25 + $0x100] ss:$8 sps:$4 sm:$0xff]  }
 0x151   :  { %867 = vmatprep.mubr.bf16.mxu0 %v8034_v23 }
 0x21b   :  { %v749_v8 = vpop.f32.mrb[4].mxu0 }
 0x21c   :  { %v788_v9 = vadd.f32 %v781_v6, %v749_v8  ;;  %v751_v10 = vpop.f32.mrb[5].mxu0  ;;  %v7422_v8 = vld [vmem:[%s8071_s25 + $0x1a0] ss:$8 sps:$4 sm:$0xff]  }
 0x21d   :  { %v789_v11 = vadd.f32 %v785_v7, %v751_v10  ;;  %v753_v12 = vpop.f32.mrb[6].mxu0  ;;  %v7425_v10 = vld [vmem:[%s8071_s25 + $0x1b0] ss:$8 sps:$4 sm:$0xff]  }
 0x21e   :  { %v804_v13 = vmul.f32 0.2, %v788_v9  ;;  %v790_v14 = vadd.f32 %v781_v6, %v753_v12  ;;  %v755_v15 = vpop.f32.mrb[7].mxu0  ;;  %vm796_vm2 = vcmp.ge.f32.partialorder %v788_v9, 0.0  ;;  %v7428_v12 = vld [vmem:[%s8071_s25 + $0x1c0] ss:$8 sps:$4 sm:$0xff]  }
 0x21f   :  { %v805_v16 = vmul.f32 0.2, %v789_v11  ;;  %v791_v17 = vadd.f32 %v785_v7, %v755_v15  ;;  %vm797_vm3 = vcmp.ge.f32.partialorder %v789_v11, 0.0  ;;  %v7436_v15 = vld [vmem:[%s8071_s25 + $0x1e4] ss:$8 sps:$4 sm:$0xff]  }
 0x220   :  { %vm798_vm4 = vcmp.ge.f32.partialorder %v790_v14, 0.0  ;;  %v806_v18 = vmul.f32 0.2, %v790_v14  ;;  %v812_v20 = vsel %vm796_vm2, %v788_v9, %v804_v13  ;;  %v7427_v9 = vld [vmem:[%s8071_s25 + $0x1b4] ss:$8 sps:$4 sm:$0xff]  }
 0x221   :  { %vm799_vm5 = vcmp.ge.f32.partialorder %v791_v17, 0.0  ;;  %v807_v19 = vmul.f32 0.2, %v791_v17  ;;  %v813_v25 = vsel %vm797_vm3, %v789_v11, %v805_v16  ;;  %v7430_v11 = vld [vmem:[%s8071_s25 + $0x1c4] ss:$8 sps:$4 sm:$0xff]   ;;  %vm3413_vm3 = vcmask 64512  }
 0x222   :  { %v814_v21 = vsel %vm798_vm4, %v790_v14, %v806_v18  ;;  %v7433_v13 = vld [vmem:[%s8071_s25 + $0x1d4] ss:$8 sps:$4 sm:$0xff]   ;;  %v7431_v14 = vld [vmem:[%s8071_s25 + $0x1d0] ss:$8 sps:$4 sm:$0xff]   ;;  %v7434_v16 = vld [vmem:[%s8071_s25 + $0x1e0] ss:$8 sps:$4 sm:$0xff]  }
 0x223   :  { %v820_v22 = vpack.c.bf16 %v814_v21, %v812_v20  ;;  %v759_v24 = vpop.f32.mrb[8].mxu0  ;;  %v815_v26 = vsel %vm799_vm5, %v791_v17, %v807_v19  ;;  %v7439_v17 = vld [vmem:[%s8071_s25 + $0x1f4] ss:$8 sps:$4 sm:$0xff]   ;;  %v7437_v18 = vld [vmem:[%s8071_s25 + $0x1f0] ss:$8 sps:$4 sm:$0xff]  }
 0x224   :  { %v792_v27 = vadd.f32 %v781_v6, %v759_v24  ;;  %v761_v28 = vpop.f32.mrb[9].mxu0  ;;  %v821_v29 = vpack.c.bf16 %v815_v26, %v813_v25  ;;  %v7442_v19 = vld [vmem:[%s8071_s25 + $0x4] ss:$8 sps:$4 sm:$0xff]  }
 0x225   :  { %v793_v30 = vadd.f32 %v785_v7, %v761_v28  ;;  %v763_v31 = vpop.f32.mrb[10].mxu0 }
 0x226   :  { %v808_v32 = vmul.f32 0.2, %v792_v27  ;;  %v794_v33 = vadd.f32 %v781_v6, %v763_v31  ;;  %v765_v34 = vpop.f32.mrb[11].mxu0  ;;  %835 = vmatprep.subr.bf16.mxu0 %v821_v29  ;;  %923 = vmatprep.subr.bf16.mxu1 %v821_v29  ;;  %vm800_vm6 = vcmp.ge.f32.partialorder %v792_v27, 0.0  ;;  %v7419_v6 = vld [vmem:[%s8071_s25 + $0x190] ss:$8 sps:$4 sm:$0xff]  }
 0x227   :  { %v809_v35 = vmul.f32 0.2, %v793_v30  ;;  %v795_v36 = vadd.f32 %v785_v7, %v765_v34  ;;  %836 = vmatpush1.bf16.msra.mxu0 %v820_v22  ;;  %924 = vmatpush1.bf16.msra.mxu1 %v820_v22  ;;  %vm801_vm7 = vcmp.ge.f32.partialorder %v793_v30, 0.0  ;;  %v7424_v7 = vld [vmem:[%s8071_s25 + $0x1a4] ss:$8 sps:$4 sm:$0xff]  }
 0x228   :  { %vm802_vm8 = vcmp.ge.f32.partialorder %v794_v33, 0.0  ;;  %v810_v37 = vmul.f32 0.2, %v794_v33  ;;  %v816_v39 = vsel %vm800_vm6, %v792_v27, %v808_v32  ;;  %v7440_v32 = vld [vmem:[%s8071_s25] ss:$8 sps:$4 sm:$0xff]   ;;  %vm5702_vm6 = vcmask 1045504  }
 0x229   :  { %vm803_vm9 = vcmp.ge.f32.partialorder %v795_v36, 0.0  ;;  %v811_v38 = vmul.f32 0.2, %v795_v36  ;;  %v817_v42 = vsel %vm801_vm7, %v793_v30, %v809_v35  ;;  %v7445_v34 = vld [vmem:[%s8071_s25 + $0x14] ss:$8 sps:$4 sm:$0xff]   ;;  %vm8036_vm7 = vmmov 0  }
 0x22a   :  { %v818_v40 = vsel %vm802_vm8, %v794_v33, %v810_v37  ;;  %v7443_v35 = vld [vmem:[%s8071_s25 + $0x10] ss:$8 sps:$4 sm:$0xff]   ;;  %v1762_v37 = vld [vmem:[%s8091_s14 + $0x88] sm:$0xff]  ;;  %vm5698_vm8 = vcmask 359424  }
 0x22b   :  { %v822_v41 = vpack.c.bf16 %v818_v40, %v816_v39  ;;  %v819_v43 = vsel %vm803_vm9, %v795_v36, %v811_v38  ;;  %v1761_v36 = vld [vmem:[%s8091_s14 + $0x80] sm:$0xff]  ;;  %vm5786_vm9 = vcmask 9216  }
 0x22c   :  { %v823_v44 = vpack.c.bf16 %v819_v43, %v817_v42  ;;  %v1745_v38 = vld [vmem:[%s8091_s14] sm:$0xff]  ;;  %v8324_v40 = vpack.c.bf16 %v1762_v37, %v1761_v36  ;;  %v1763_v42 = vld [vmem:[%s8091_s14 + $0x90] sm:$0xff]  ;;  %v1764_v43 = vld [vmem:[%s8091_s14 + $0x98] sm:$0xff] }
 0x22d   :  { %v7511_v36 = vld [vmem:[%s8071_s25 + $0x274] ss:$8 sps:$4 sm:$0xff]   ;;  %v7509_v37 = vld [vmem:[%s8071_s25 + $0x270] ss:$8 sps:$4 sm:$0xff]  }
 0x22e   :  { %837 = vmatprep.subr.bf16.mxu0 %v823_v44  ;;  %925 = vmatprep.subr.bf16.mxu1 %v823_v44 }
 0x22f   :  { %838 = vmatpush1.bf16.msra.mxu0 %v822_v41  ;;  %926 = vmatpush1.bf16.msra.mxu1 %v822_v41 }
 0x230   :  { %1418 = vmatprep.subr.bf16.mxu0 %v821_v29  ;;  %1161 = vmatprep.subr.bf16.mxu1 %v7394_v45 }
 0x232   :  { %5937 = vmatmul.mubr.msk.bf16.vlgmr.msra.gmra.mrb[8].mxu1 %vm831_vm10, %v7389_v46  ;;  %5933 = vmatmul.mubr.msk.bf16.vlgmr.msra.gmra.mrb[12].mxu0 %vm831_vm10, %v7390_v47  ;;  %v8334_v47 = vpack.c.bf16 %v1764_v43, %v1763_v42  ;;  %v7517_v42 = vld [vmem:[%s8071_s25 + $0x294] ss:$8 sps:$4 sm:$0xff]   ;;  %v7515_v43 = vld [vmem:[%s8071_s25 + $0x290] ss:$8 sps:$4 sm:$0xff]  }
 0x233   :  { %1419 = vmatpush1.bf16.msra.mxu0 %v820_v22  ;;  %1450 = vmatprep.mubr.bf16.mxu0 %v8034_v23 }
 0x234   :  { %1420 = vmatprep.subr.bf16.mxu0 %v823_v44  ;;  %1162 = vmatpush1.bf16.msra.mxu1 %v7392_v48  ;;  %v7448_v44 = vld [vmem:[%s8071_s25 + $0x24] ss:$8 sps:$4 sm:$0xff]   ;;  %v1747_v48 = vld [vmem:[%s8091_s14 + $0x10] sm:$0xff] }
 0x235   :  { %1163 = vmatprep.subr.bf16.mxu1 %v7397_v49  ;;  %v1748_v49 = vld [vmem:[%s8091_s14 + $0x18] sm:$0xff] }
 0x237   :  { %1421 = vmatpush1.bf16.msra.mxu0 %v822_v41  ;;  %v1746_v41 = vld [vmem:[%s8091_s14 + $0x8] sm:$0xff] }
 0x238   :  { %1164 = vmatpush1.bf16.msra.mxu1 %v7395_v50  ;;  %v8332_v46 = vpack.c.bf16 %v1746_v41, %v1745_v38  ;;  %6965 = vmatprep.subr.bf16.mxu0 %v8324_v40  ;;  %v7514_v38 = vld [vmem:[%s8071_s25 + $0x284] ss:$8 sps:$4 sm:$0xff]   ;;  %v7512_v41 = vld [vmem:[%s8071_s25 + $0x280] ss:$8 sps:$4 sm:$0xff]  }
 0x239   :  { %1165 = vmatprep.subr.bf16.mxu1 %v7400_v51 }
 0x23a   :  { %6037 = vmatmul.mubr.msk.bf16.vlgmr.msra.gmra.mrb[16].mxu0 %vm831_vm10, %v7391_v52 }
 0x23b   :  { %6967 = vmatpush3.bf16.msra.mxu0 %v8332_v46 }
 0x23c   :  { %1166 = vmatpush1.bf16.msra.mxu1 %v7398_v53  ;;  %v8346_v53 = vpack.c.bf16 %v1748_v49, %v1747_v48  ;;  %6969 = vmatprep.subr.bf16.mxu0 %v8334_v47  ;;  %v7523_v48 = vld [vmem:[%s8071_s25 + $0x2b4] ss:$8 sps:$4 sm:$0xff]   ;;  %v7521_v49 = vld [vmem:[%s8071_s25 + $0x2b0] ss:$8 sps:$4 sm:$0xff]  }
 0x23d   :  { %1167 = vmatprep.subr.bf16.mxu1 %v7403_v54  ;;  %v7446_v54 = vld [vmem:[%s8071_s25 + $0x20] ss:$8 sps:$4 sm:$0xff]  }
 0x23f   :  { %6971 = vmatpush3.bf16.msra.mxu0 %v8346_v53 }
 0x240   :  { %1168 = vmatpush1.bf16.msra.mxu1 %v7401_v55 }
 0x241   :  { %1169 = vmatprep.subr.bf16.mxu1 %v7406_v56  ;;  %v7451_v56 = vld [vmem:[%s8071_s25 + $0x34] ss:$8 sps:$4 sm:$0xff]  }
 0x244   :  { %1170 = vmatpush1.bf16.msra.mxu1 %v7404_v57  ;;  %v7449_v57 = vld [vmem:[%s8071_s25 + $0x30] ss:$8 sps:$4 sm:$0xff]  }
 0x245   :  { %1171 = vmatprep.subr.bf16.mxu1 %v7409_v58  ;;  %v7454_v58 = vld [vmem:[%s8071_s25 + $0x44] ss:$8 sps:$4 sm:$0xff]  }
 0x248   :  { %1172 = vmatpush1.bf16.msra.mxu1 %v7407_v59  ;;  %v7452_v59 = vld [vmem:[%s8071_s25 + $0x40] ss:$8 sps:$4 sm:$0xff]  }
 0x249   :  { %1173 = vmatprep.subr.bf16.mxu1 %v7412_v60  ;;  %v7457_v60 = vld [vmem:[%s8071_s25 + $0x54] ss:$8 sps:$4 sm:$0xff]  }
 0x24c   :  { %1174 = vmatpush1.bf16.msra.mxu1 %v7410_v61  ;;  %v7455_v61 = vld [vmem:[%s8071_s25 + $0x50] ss:$8 sps:$4 sm:$0xff]  }
 0x24d   :  { %1175 = vmatprep.subr.bf16.mxu1 %v7415_v62  ;;  %v7460_v62 = vld [vmem:[%s8071_s25 + $0x64] ss:$8 sps:$4 sm:$0xff]  }
 0x250   :  { %1176 = vmatpush1.bf16.msra.mxu1 %v7413_v63  ;;  %v7458_v63 = vld [vmem:[%s8071_s25 + $0x60] ss:$8 sps:$4 sm:$0xff]  }
 0x251   :  { %1177 = vmatprep.subr.bf16.mxu1 %v7418_v0  ;;  %v7463_v0 = vld [vmem:[%s8071_s25 + $0x74] ss:$8 sps:$4 sm:$0xff]  }
 0x254   :  { %1178 = vmatpush1.bf16.msra.mxu1 %v7416_v1  ;;  %v7461_v1 = vld [vmem:[%s8071_s25 + $0x70] ss:$8 sps:$4 sm:$0xff]  }
 0x255   :  { %1179 = vmatprep.subr.bf16.mxu1 %v7421_v4  ;;  %v7466_v4 = vld [vmem:[%s8071_s25 + $0x84] ss:$8 sps:$4 sm:$0xff]  }
 0x258   :  { %1180 = vmatpush1.bf16.msra.mxu1 %v7419_v6  ;;  %v7464_v6 = vld [vmem:[%s8071_s25 + $0x80] ss:$8 sps:$4 sm:$0xff]  }
 0x259   :  { %1181 = vmatprep.subr.bf16.mxu1 %v7424_v7  ;;  %v7469_v7 = vld [vmem:[%s8071_s25 + $0x94] ss:$8 sps:$4 sm:$0xff]  }
 0x25c   :  { %1182 = vmatpush1.bf16.msra.mxu1 %v7422_v8  ;;  %v7467_v8 = vld [vmem:[%s8071_s25 + $0x90] ss:$8 sps:$4 sm:$0xff]  }
 0x25d   :  { %1183 = vmatprep.subr.bf16.mxu1 %v7427_v9  ;;  %v7472_v9 = vld [vmem:[%s8071_s25 + $0xa4] ss:$8 sps:$4 sm:$0xff]  }
 0x260   :  { %1184 = vmatpush1.bf16.msra.mxu1 %v7425_v10  ;;  %v7470_v10 = vld [vmem:[%s8071_s25 + $0xa0] ss:$8 sps:$4 sm:$0xff]  }
 0x261   :  { %1185 = vmatprep.subr.bf16.mxu1 %v7430_v11  ;;  %v7475_v11 = vld [vmem:[%s8071_s25 + $0xb4] ss:$8 sps:$4 sm:$0xff]  }
 0x264   :  { %1186 = vmatpush1.bf16.msra.mxu1 %v7428_v12  ;;  %v7473_v12 = vld [vmem:[%s8071_s25 + $0xb0] ss:$8 sps:$4 sm:$0xff]  }
 0x265   :  { %1187 = vmatprep.subr.bf16.mxu1 %v7433_v13  ;;  %v7478_v13 = vld [vmem:[%s8071_s25 + $0xc4] ss:$8 sps:$4 sm:$0xff]  }
 0x268   :  { %1188 = vmatpush1.bf16.msra.mxu1 %v7431_v14  ;;  %v7476_v14 = vld [vmem:[%s8071_s25 + $0xc0] ss:$8 sps:$4 sm:$0xff]  }
 0x269   :  { %1189 = vmatprep.subr.bf16.mxu1 %v7436_v15  ;;  %v7481_v15 = vld [vmem:[%s8071_s25 + $0xd4] ss:$8 sps:$4 sm:$0xff]  }
 0x26c   :  { %1190 = vmatpush1.bf16.msra.mxu1 %v7434_v16  ;;  %v7479_v16 = vld [vmem:[%s8071_s25 + $0xd0] ss:$8 sps:$4 sm:$0xff]  }
 0x26d   :  { %1191 = vmatprep.subr.bf16.mxu1 %v7439_v17  ;;  %v7484_v17 = vld [vmem:[%s8071_s25 + $0xe4] ss:$8 sps:$4 sm:$0xff]  }
 0x270   :  { %1192 = vmatpush1.bf16.msra.mxu1 %v7437_v18  ;;  %v7482_v18 = vld [vmem:[%s8071_s25 + $0xe0] ss:$8 sps:$4 sm:$0xff]  }
 0x271   :  { %1364 = vmatprep.subr.bf16.mxu1 %v7442_v19  ;;  %v7487_v19 = vld [vmem:[%s8071_s25 + $0xf4] ss:$8 sps:$4 sm:$0xff]  }
 0x305   :  { %v957_v20 = vpop.f32.mrb[8].mxu1  ;;  %v8310_v21 = vpop.f32.mrb[12].mxu0 }
 0x306   :  { %v959_v22 = vpop.f32.mrb[9].mxu1  ;;  %v871_v24 = vpop.f32.mrb[13].mxu0 }
 0x307   :  { %v961_v25 = vpop.f32.mrb[10].mxu1  ;;  %v8312_v26 = vpop.f32.mrb[14].mxu0 }
 0x308   :  { %v966_v27 = vpack.c.bf16 %v961_v25, %v957_v20  ;;  %v963_v28 = vpop.f32.mrb[11].mxu1  ;;  %v878_v29 = vpack.c.bf16 %v8312_v26, %v8310_v21  ;;  %v875_v30 = vpop.f32.mrb[15].mxu0  ;;  %v7485_v20 = vld [vmem:[%s8071_s25 + $0xf0] ss:$8 sps:$4 sm:$0xff]   ;;  %v7493_v25 = vld [vmem:[%s8071_s25 + $0x214] ss:$8 sps:$4 sm:$0xff]  }
 0x309   :  { %v967_v31 = vpack.c.bf16 %v963_v28, %v959_v22  ;;  %v879_v33 = vpack.c.bf16 %v875_v30, %v871_v24  ;;  %v7490_v22 = vld [vmem:[%s8071_s25 + $0x204] ss:$8 sps:$4 sm:$0xff]   ;;  %v7488_v24 = vld [vmem:[%s8071_s25 + $0x200] ss:$8 sps:$4 sm:$0xff]   ;;  %v7497_v21 = vld [vmem:[%s8071_s25 + $0x230] ss:$8 sps:$4 sm:$0xff]  }
 0x30a   :  { %v7496_v28 = vld [vmem:[%s8071_s25 + $0x224] ss:$8 sps:$4 sm:$0xff]   ;;  %v7494_v30 = vld [vmem:[%s8071_s25 + $0x220] ss:$8 sps:$4 sm:$0xff]  }
 0x30b   :  { %1193 = vmatprep.mubr.bf16.mxu1 %v967_v31  ;;  %v7499_v31 = vld [vmem:[%s8071_s25 + $0x234] ss:$8 sps:$4 sm:$0xff]   ;;  %v7502_v26 = vld [vmem:[%s8071_s25 + $0x244] ss:$8 sps:$4 sm:$0xff]  }
 0x30c   :  { %1194 = vmatmul.mubr.bf16.vlgmr.msra.gmra.mrb[12].mxu1 %v966_v27  ;;  %v7491_v27 = vld [vmem:[%s8071_s25 + $0x210] ss:$8 sps:$4 sm:$0xff]  }
 0x30d   :  { %1365 = vmatpush1.bf16.msra.mxu1 %v7440_v32  ;;  %1396 = vmatprep.mubr.bf16.mxu1 %v879_v33  ;;  %v8322_v39 = vpop.f32.mrb[16].mxu0  ;;  %v7505_v32 = vld [vmem:[%s8071_s25 + $0x254] ss:$8 sps:$4 sm:$0xff]   ;;  %v7503_v33 = vld [vmem:[%s8071_s25 + $0x250] ss:$8 sps:$4 sm:$0xff]  }
 0x30e   :  { %1366 = vmatprep.subr.bf16.mxu1 %v7445_v34  ;;  %v8330_v45 = vpop.f32.mrb[17].mxu0  ;;  %v7508_v34 = vld [vmem:[%s8071_s25 + $0x264] ss:$8 sps:$4 sm:$0xff]  }
 0x30f   :  { %v8338_v50 = vpop.f32.mrb[18].mxu0 }
 0x310   :  { %v1461_v51 = vpack.c.bf16 %v8338_v50, %v8322_v39  ;;  %v8343_v52 = vpop.f32.mrb[19].mxu0  ;;  %v1768_v39 = vld [vmem:[%s8091_s14 + $0xb8] sm:$0xff] }
 0x311   :  { %1367 = vmatpush1.bf16.msra.mxu1 %v7443_v35  ;;  %v1462_v55 = vpack.c.bf16 %v8343_v52, %v8330_v45  ;;  %v7506_v35 = vld [vmem:[%s8071_s25 + $0x260] ss:$8 sps:$4 sm:$0xff]   ;;  %v7526_v52 = vld [vmem:[%s8071_s25 + $0x2c4] ss:$8 sps:$4 sm:$0xff]  }
 0x312   :  { %1368 = vmatprep.subr.bf16.mxu1 %v7448_v44  ;;  %v7520_v44 = vld [vmem:[%s8071_s25 + $0x2a4] ss:$8 sps:$4 sm:$0xff]   ;;  %v7518_v45 = vld [vmem:[%s8071_s25 + $0x2a0] ss:$8 sps:$4 sm:$0xff]  }
 0x315   :  { %1369 = vmatpush1.bf16.msra.mxu1 %v7446_v54  ;;  %v7524_v54 = vld [vmem:[%s8071_s25 + $0x2c0] ss:$8 sps:$4 sm:$0xff]  }
 0x316   :  { %1370 = vmatprep.subr.bf16.mxu1 %v7451_v56  ;;  %v7527_v56 = vld [vmem:[%s8071_s25 + $0x2d0] ss:$8 sps:$4 sm:$0xff]  }
 0x319   :  { %1371 = vmatpush1.bf16.msra.mxu1 %v7449_v57  ;;  %v7532_v57 = vld [vmem:[%s8071_s25 + $0x2e4] ss:$8 sps:$4 sm:$0xff]  }
 0x31a   :  { %1372 = vmatprep.subr.bf16.mxu1 %v7454_v58  ;;  %v7530_v58 = vld [vmem:[%s8071_s25 + $0x2e0] ss:$8 sps:$4 sm:$0xff]  }
 0x31d   :  { %1373 = vmatpush1.bf16.msra.mxu1 %v7452_v59  ;;  %v7535_v59 = vld [vmem:[%s8071_s25 + $0x2f4] ss:$8 sps:$4 sm:$0xff]  }
 0x31e   :  { %1374 = vmatprep.subr.bf16.mxu1 %v7457_v60  ;;  %v7533_v60 = vld [vmem:[%s8071_s25 + $0x2f0] ss:$8 sps:$4 sm:$0xff]  }
 0x321   :  { %1375 = vmatpush1.bf16.msra.mxu1 %v7455_v61  ;;  %v1765_v61 = vld [vmem:[%s8091_s14 + $0xa0] sm:$0xff] }
 0x322   :  { %1376 = vmatprep.subr.bf16.mxu1 %v7460_v62  ;;  %v1766_v62 = vld [vmem:[%s8091_s14 + $0xa8] sm:$0xff] }
 0x325   :  { %1377 = vmatpush1.bf16.msra.mxu1 %v7458_v63  ;;  %v8422_v63 = vpack.c.bf16 %v1766_v62, %v1765_v61 }
 0x326   :  { %1378 = vmatprep.subr.bf16.mxu1 %v7463_v0  ;;  %v1749_v0 = vld [vmem:[%s8091_s14 + $0x20] sm:$0xff] }
 0x327   :  { %6973 = vmatprep.subr.bf16.mxu0 %v8422_v63 }
 0x329   :  { %1379 = vmatpush1.bf16.msra.mxu1 %v7461_v1  ;;  %v1750_v1 = vld [vmem:[%s8091_s14 + $0x28] sm:$0xff] }
 0x32a   :  { %1380 = vmatprep.subr.bf16.mxu1 %v7466_v4  ;;  %v8426_v4 = vpack.c.bf16 %v1750_v1, %v1749_v0 }
 0x32c   :  { %6975 = vmatpush3.bf16.msra.mxu0 %v8426_v4 }
 0x32d   :  { %1381 = vmatpush1.bf16.msra.mxu1 %v7464_v6  ;;  %v1767_v6 = vld [vmem:[%s8091_s14 + $0xb0] sm:$0xff] }
 0x32e   :  { %1382 = vmatprep.subr.bf16.mxu1 %v7469_v7  ;;  %v8432_v50 = vpack.c.bf16 %v1768_v39, %v1767_v6  ;;  %v1752_v7 = vld [vmem:[%s8091_s14 + $0x38] sm:$0xff] }
 0x330   :  { %6977 = vmatprep.subr.bf16.mxu0 %v8432_v50 }
 0x331   :  { %1383 = vmatpush1.bf16.msra.mxu1 %v7467_v8 }
 0x332   :  { %1384 = vmatprep.subr.bf16.mxu1 %v7472_v9  ;;  %v1769_v9 = vld [vmem:[%s8091_s14 + $0xc0] sm:$0xff] }
 0x335   :  { %1385 = vmatpush1.bf16.msra.mxu1 %v7470_v10  ;;  %v1770_v10 = vld [vmem:[%s8091_s14 + $0xc8] sm:$0xff] }
 0x336   :  { %1386 = vmatprep.subr.bf16.mxu1 %v7475_v11  ;;  %v8442_v11 = vpack.c.bf16 %v1770_v10, %v1769_v9 }
 0x339   :  { %1387 = vmatpush1.bf16.msra.mxu1 %v7473_v12  ;;  %v1753_v12 = vld [vmem:[%s8091_s14 + $0x40] sm:$0xff] }
 0x33a   :  { %1388 = vmatprep.subr.bf16.mxu1 %v7478_v13  ;;  %v1754_v13 = vld [vmem:[%s8091_s14 + $0x48] sm:$0xff] }
 0x33d   :  { %1389 = vmatpush1.bf16.msra.mxu1 %v7476_v14  ;;  %v8446_v14 = vpack.c.bf16 %v1754_v13, %v1753_v12 }
 0x33e   :  { %1390 = vmatprep.subr.bf16.mxu1 %v7481_v15  ;;  %v1771_v15 = vld [vmem:[%s8091_s14 + $0xd0] sm:$0xff] }
 0x341   :  { %1391 = vmatpush1.bf16.msra.mxu1 %v7479_v16  ;;  %v1772_v16 = vld [vmem:[%s8091_s14 + $0xd8] sm:$0xff] }
 0x342   :  { %1392 = vmatprep.subr.bf16.mxu1 %v7484_v17  ;;  %v8452_v17 = vpack.c.bf16 %v1772_v16, %v1771_v15  ;;  %v1849_v16 = vld [vmem:[%s8096_s19] sm:$0xff] }
 0x345   :  { %1393 = vmatpush1.bf16.msra.mxu1 %v7482_v18  ;;  %v1755_v18 = vld [vmem:[%s8091_s14 + $0x50] sm:$0xff] }
 0x346   :  { %1394 = vmatprep.subr.bf16.mxu1 %v7487_v19  ;;  %v1756_v19 = vld [vmem:[%s8091_s14 + $0x58] sm:$0xff] }
 0x349   :  { %1395 = vmatpush1.bf16.msra.mxu1 %v7485_v20  ;;  %v8456_v20 = vpack.c.bf16 %v1756_v19, %v1755_v18  ;;  %v1851_v18 = vld [vmem:[%s8096_s19 + $0x10] sm:$0xff] }
 0x34a   :  { %1656 = vmatprep.subr.bf16.mxu1 %v7490_v22  ;;  %v1773_v22 = vld [vmem:[%s8091_s14 + $0xe0] sm:$0xff] }
 0x34c   :  { %1397 = vmatmul.mubr.bf16.vlgmr.msra.gmra.mrb[12].mxu1 %v878_v29  ;;  %v7500_v29 = vld [vmem:[%s8071_s25 + $0x240] ss:$8 sps:$4 sm:$0xff]  }
 0x34d   :  { %1657 = vmatpush1.bf16.msra.mxu1 %v7488_v24  ;;  %1688 = vmatprep.mubr.bf16.mxu1 %v1462_v55  ;;  %v7529_v55 = vld [vmem:[%s8071_s25 + $0x2d4] ss:$8 sps:$4 sm:$0xff]   ;;  %v1774_v24 = vld [vmem:[%s8091_s14 + $0xe8] sm:$0xff]  ;;  %s9216_s25 = sld [smem:[#allocation14_spill]] }
 0x34e   :  { %1658 = vmatprep.subr.bf16.mxu1 %v7493_v25  ;;  %v8462_v25 = vpack.c.bf16 %v1774_v24, %v1773_v22  ;;  %v8490_v24 = vpack.c.bf16 %v1851_v18, %v1849_v16  ;;  %v7596_v16 = vld [vmem:[%s8106_s30 + $0x40] ss:$8 sps:$4 sm:$0xff]   ;;  %v7601_v18 = vld [vmem:[%s8106_s30 + $0x54] ss:$8 sps:$4 sm:$0xff]  }
 0x351   :  { %1659 = vmatpush1.bf16.msra.mxu1 %v7491_v27  ;;  %v1757_v27 = vld [vmem:[%s8091_s14 + $0x60] sm:$0xff] }
 0x352   :  { %1660 = vmatprep.subr.bf16.mxu1 %v7496_v28  ;;  %v1758_v28 = vld [vmem:[%s8091_s14 + $0x68] sm:$0xff] }
 0x355   :  { %1661 = vmatpush1.bf16.msra.mxu1 %v7494_v30  ;;  %v1775_v30 = vld [vmem:[%s8091_s14 + $0xf0] sm:$0xff] }
 0x356   :  { %1662 = vmatprep.subr.bf16.mxu1 %v7499_v31  ;;  %v8467_v31 = vpack.c.bf16 %v1758_v28, %v1757_v27  ;;  %v1854_v28 = vld [vmem:[%s8096_s19 + $0x28] sm:$0xff] }
 0x359   :  { %1663 = vmatpush1.bf16.msra.mxu1 %v7497_v21  ;;  %v1776_v21 = vld [vmem:[%s8091_s14 + $0xf8] sm:$0xff] }
 0x35a   :  { %1664 = vmatprep.subr.bf16.mxu1 %v7502_v26  ;;  %v1759_v26 = vld [vmem:[%s8091_s14 + $0x70] sm:$0xff] }
 0x35d   :  { %1665 = vmatpush1.bf16.msra.mxu1 %v7500_v29  ;;  %v1760_v29 = vld [vmem:[%s8091_s14 + $0x78] sm:$0xff] }
 0x35e   :  { %1666 = vmatprep.subr.bf16.mxu1 %v7505_v32  ;;  %v8473_v32 = vpack.c.bf16 %v1776_v21, %v1775_v30  ;;  %v1856_v30 = vld [vmem:[%s8096_s19 + $0x38] sm:$0xff] }
 0x35f   :  { %v7000_v21 = vpack.c.bf16 %v1856_v30, %v1854_v28  ;;  %v7605_v28 = vld [vmem:[%s8106_s30 + $0x70] ss:$8 sps:$4 sm:$0xff]   ;;  %v7610_v30 = vld [vmem:[%s8106_s30 + $0x84] ss:$8 sps:$4 sm:$0xff]  }
 0x361   :  { %1667 = vmatpush1.bf16.msra.mxu1 %v7503_v33  ;;  %v8476_v33 = vpack.c.bf16 %v1760_v29, %v1759_v26  ;;  %v1853_v26 = vld [vmem:[%s8096_s19 + $0x20] sm:$0xff]  ;;  %v1855_v29 = vld [vmem:[%s8096_s19 + $0x30] sm:$0xff] }
 0x362   :  { %1668 = vmatprep.subr.bf16.mxu1 %v7508_v34  ;;  %v1850_v34 = vld [vmem:[%s8096_s19 + $0x8] sm:$0xff] }
 0x365   :  { %1669 = vmatpush1.bf16.msra.mxu1 %v7506_v35  ;;  %v1852_v35 = vld [vmem:[%s8096_s19 + $0x18] sm:$0xff]  ;;  %s9221_s19 = sld [smem:[#allocation13_spill]] }
 0x366   :  { %1670 = vmatprep.subr.bf16.mxu1 %v7511_v36  ;;  %v8482_v36 = vpack.c.bf16 %v1852_v35, %v1850_v34  ;;  %v7002_v34 = vpack.c.bf16 %v1855_v29, %v1853_v26  ;;  %v8035_v35 = vmov 0.0   ;;  %v7613_v26 = vld [vmem:[%s8106_s30 + $0x94] ss:$8 sps:$4 sm:$0xff]   ;;  %v7611_v29 = vld [vmem:[%s8106_s30 + $0x90] ss:$8 sps:$4 sm:$0xff]  }
 0x369   :  { %1671 = vmatpush1.bf16.msra.mxu1 %v7509_v37  ;;  %v1703_v37 = vld [vmem:[%s8076_s29] sm:$0x3]  ;;  %s9217_s29 = sld [smem:[#allocation15_spill]] }
 0x36a   :  { %1672 = vmatprep.subr.bf16.mxu1 %v7514_v38  ;;  %v1708_v38 = vrot.slane %v1703_v37, %v8262_v3 }
 0x36d   :  { %1673 = vmatpush1.bf16.msra.mxu1 %v7512_v41  ;;  %v1712_v41 = vrot.slane %v1703_v37, %v8266_v5 }
 0x36e   :  { %1674 = vmatprep.subr.bf16.mxu1 %v7517_v42 }
 0x371   :  { %1675 = vmatpush1.bf16.msra.mxu1 %v7515_v43 }
 0x372   :  { %1676 = vmatprep.subr.bf16.mxu1 %v7520_v44 }
 0x375   :  { %1677 = vmatpush1.bf16.msra.mxu1 %v7518_v45 }
 0x376   :  { %1678 = vmatprep.subr.bf16.mxu1 %v7523_v48 }
 0x379   :  { %1679 = vmatpush1.bf16.msra.mxu1 %v7521_v49 }
 0x37a   :  { %1680 = vmatprep.subr.bf16.mxu1 %v7526_v52 }
 0x37d   :  { %1681 = vmatpush1.bf16.msra.mxu1 %v7524_v54 }
 0x37e   :  { %1682 = vmatprep.subr.bf16.mxu1 %v7529_v55 }
 0x381   :  { %1683 = vmatpush1.bf16.msra.mxu1 %v7527_v56 }
 0x382   :  { %1684 = vmatprep.subr.bf16.mxu1 %v7532_v57 }
 0x385   :  { %1685 = vmatpush1.bf16.msra.mxu1 %v7530_v58 }
 0x386   :  { %1686 = vmatprep.subr.bf16.mxu1 %v7535_v59 }
 0x389   :  { %1687 = vmatpush1.bf16.msra.mxu1 %v7533_v60 }
 0x38c   :  { %1689 = vmatmul.mubr.bf16.vlgmr.msra.gmra.mrb[12].mxu1 %v1461_v51  ;;  %v1751_v51 = vld [vmem:[%s8091_s14 + $0x30] sm:$0xff]  ;;  %s9220_s14 = sld [smem:[#allocation12_spill]] }
 0x38d   :  { %v8436_v8 = vpack.c.bf16 %v1752_v7, %v1751_v51 }
 0x38f   :  { %6979 = vmatpush3.bf16.msra.mxu0 %v8436_v8 }
 0x390   :  { %6981 = vmatprep.subr.bf16.mxu0 %v8442_v11 }
 0x393   :  { %6983 = vmatpush3.bf16.msra.mxu0 %v8446_v14 }
 0x394   :  { %6985 = vmatprep.subr.bf16.mxu0 %v8452_v17 }
 0x397   :  { %6987 = vmatpush3.bf16.msra.mxu0 %v8456_v20 }
 0x398   :  { %6989 = vmatprep.subr.bf16.mxu0 %v8462_v25 }
 0x39b   :  { %6991 = vmatpush3.bf16.msra.mxu0 %v8467_v31 }
 0x39c   :  { %6993 = vmatprep.subr.bf16.mxu0 %v8473_v32 }
 0x39f   :  { %6995 = vmatpush3.bf16.msra.mxu0 %v8476_v33 }
 0x3a0   :  { %6997 = vmatprep.subr.bf16.mxu0 %v8482_v36 }
 0x45f   :  { %v1690_v42 = vpop.f32.mrb[12].mxu1 }
 0x460   :  { %v1715_v43 = vadd.f32 %v1708_v38, %v1690_v42  ;;  %v1692_v44 = vpop.f32.mrb[13].mxu1 }
 0x461   :  { %v1716_v45 = vadd.f32 %v1712_v41, %v1692_v44  ;;  %v1694_v48 = vpop.f32.mrb[14].mxu1 }
 0x462   :  { %v1723_v49 = vmul.f32 0.2, %v1715_v43  ;;  %v1717_v52 = vadd.f32 %v1708_v38, %v1694_v48  ;;  %v1696_v54 = vpop.f32.mrb[15].mxu1  ;;  %vm1719_vm11 = vcmp.ge.f32.partialorder %v1715_v43, 0.0 }
 0x463   :  { %v1724_v55 = vmul.f32 0.2, %v1716_v45  ;;  %v1718_v56 = vadd.f32 %v1712_v41, %v1696_v54  ;;  %vm1720_vm12 = vcmp.ge.f32.partialorder %v1716_v45, 0.0 }
 0x464   :  { %vm1721_vm13 = vcmp.ge.f32.partialorder %v1717_v52, 0.0  ;;  %v1725_v57 = vmul.f32 0.2, %v1717_v52  ;;  %v1727_v59 = vsel %vm1719_vm11, %v1715_v43, %v1723_v49 }
 0x465   :  { %vm1722_vm14 = vcmp.ge.f32.partialorder %v1718_v56, 0.0  ;;  %v1726_v58 = vmul.f32 0.2, %v1718_v56  ;;  %v1728_v61 = vsel %vm1720_vm12, %v1716_v45, %v1724_v55 }
 0x466   :  { %v1729_v60 = vsel %vm1721_vm13, %v1717_v52, %v1725_v57 }
 0x467   :  { %v1731_v62 = vadd.f32 %v1729_v60, %v1727_v59  ;;  %v1730_v0 = vsel %vm1722_vm14, %v1718_v56, %v1726_v58 }
 0x468   :  { %v1738_v1 = vadd.f32 %v1730_v0, %v1728_v61 }
 0x469   :  { %v1732_v6 = vrot.slane %v1731_v62, 4 }
 0x46a   :  { %v1739_v39 = vrot.slane %v1738_v1, 4 }
 0x46b   :  { %v1733_v51 = vadd.f32 %v1732_v6, %v1731_v62  ;;  %v2032_v62 = vld [vmem:[%s8081_s3] sm:$0x1]  ;;  %s9218_s3 = sld [smem:[#allocation11_spill]] }
 0x46c   :  { %v1740_v7 = vadd.f32 %v1739_v39, %v1738_v1  ;;  %v7584_v6 = vld [vmem:[%s8106_s30] ss:$8 sps:$4 sm:$0xff]   ;;  %v7586_v39 = vld [vmem:[%s8106_s30 + $0x4] ss:$8 sps:$4 sm:$0xff]  }
 0x46d   :  { %v1734_v9 = vrot.slane %v1733_v51, 2  ;;  %2662 = vmatprep.subr.bf16.mxu1 %v7586_v39  ;;  %v7551_v39 = vld [vmem:[%s8106_s30 + $0x150] ss:$8 sps:$4 sm:$0xff]  }
 0x46e   :  { %v1741_v10 = vrot.slane %v1740_v7, 2  ;;  %2663 = vmatpush1.bf16.msra.mxu1 %v7584_v6  ;;  %v7553_v6 = vld [vmem:[%s8106_s30 + $0x154] ss:$8 sps:$4 sm:$0xff]  }
 0x46f   :  { %v1735_v12 = vadd.f32 %v1734_v9, %v1733_v51  ;;  %v7589_v51 = vld [vmem:[%s8106_s30 + $0x14] ss:$8 sps:$4 sm:$0xff]   ;;  %v7592_v9 = vld [vmem:[%s8106_s30 + $0x24] ss:$8 sps:$4 sm:$0xff]  }
 0x470   :  { %v1742_v13 = vadd.f32 %v1741_v10, %v1740_v7  ;;  %v7587_v7 = vld [vmem:[%s8106_s30 + $0x10] ss:$8 sps:$4 sm:$0xff]   ;;  %2664 = vmatprep.subr.bf16.mxu1 %v7589_v51  ;;  %v7590_v10 = vld [vmem:[%s8106_s30 + $0x20] ss:$8 sps:$4 sm:$0xff]   ;;  %v7556_v51 = vld [vmem:[%s8106_s30 + $0x164] ss:$8 sps:$4 sm:$0xff]  }
 0x471   :  { %v1736_v15 = vrot.slane %v1735_v12, 1 }
 0x472   :  { %v1743_v19 = vrot.slane %v1742_v13, 1  ;;  %2665 = vmatpush1.bf16.msra.mxu1 %v7587_v7  ;;  %v7554_v7 = vld [vmem:[%s8106_s30 + $0x160] ss:$8 sps:$4 sm:$0xff]  }
 0x473   :  { %v1737_v27 = vadd.f32 %v1736_v15, %v1735_v12  ;;  %2666 = vmatprep.subr.bf16.mxu1 %v7592_v9  ;;  %v7595_v12 = vld [vmem:[%s8106_s30 + $0x34] ss:$8 sps:$4 sm:$0xff]   ;;  %v7598_v15 = vld [vmem:[%s8106_s30 + $0x44] ss:$8 sps:$4 sm:$0xff]  }
 0x474   :  { %v1744_v22 = vadd.f32 %v1743_v19, %v1742_v13  ;;  %v7593_v13 = vld [vmem:[%s8106_s30 + $0x30] ss:$8 sps:$4 sm:$0xff]   ;;  %v7559_v9 = vld [vmem:[%s8106_s30 + $0x174] ss:$8 sps:$4 sm:$0xff]  }
 0x475   :  { %v7599_v19 = vld [vmem:[%s8106_s30 + $0x50] ss:$8 sps:$4 sm:$0xff]  }
 0x476   :  { %1841 = vmatprep.mubr.f32.mxu0 %v1744_v22  ;;  %2667 = vmatpush1.bf16.msra.mxu1 %v7590_v10  ;;  %v7604_v22 = vld [vmem:[%s8106_s30 + $0x64] ss:$8 sps:$4 sm:$0xff]   ;;  %v7557_v10 = vld [vmem:[%s8106_s30 + $0x170] ss:$8 sps:$4 sm:$0xff]  }
 0x477   :  { %1842 = vmatmul.mubr.f32.vlgmr.msra.gmra.mrb[20].mxu0 %v1737_v27  ;;  %2668 = vmatprep.subr.bf16.mxu1 %v7595_v12  ;;  %v7607_v27 = vld [vmem:[%s8106_s30 + $0x74] ss:$8 sps:$4 sm:$0xff]   ;;  %v7562_v12 = vld [vmem:[%s8106_s30 + $0x184] ss:$8 sps:$4 sm:$0xff]  }
 0x478   :  { %6999 = vmatpush1.bf16.msra.mxu0 %v8490_v24  ;;  %1924 = vmatprep.mubr.f32.mxu0 %v8035_v35 }
 0x479   :  { %7001 = vmatprep.subr.bf16.mxu0 %v7000_v21 }
 0x47a   :  { %2669 = vmatpush1.bf16.msra.mxu1 %v7593_v13  ;;  %v7560_v13 = vld [vmem:[%s8106_s30 + $0x180] ss:$8 sps:$4 sm:$0xff]  }
 0x47b   :  { %2670 = vmatprep.subr.bf16.mxu1 %v7598_v15  ;;  %v7565_v15 = vld [vmem:[%s8106_s30 + $0x194] ss:$8 sps:$4 sm:$0xff]  }
 0x47c   :  { %7003 = vmatpush1.bf16.msra.mxu0 %v7002_v34 }
 0x47d   :  { %7005 = vmatprep.subr.bf16.mxu0 %v8324_v40 }
 0x47e   :  { %2671 = vmatpush1.bf16.msra.mxu1 %v7596_v16  ;;  %v7563_v16 = vld [vmem:[%s8106_s30 + $0x190] ss:$8 sps:$4 sm:$0xff]  }
 0x47f   :  { %2672 = vmatprep.subr.bf16.mxu1 %v7601_v18  ;;  %v7568_v18 = vld [vmem:[%s8106_s30 + $0x1a4] ss:$8 sps:$4 sm:$0xff]  }
 0x482   :  { %2673 = vmatpush1.bf16.msra.mxu1 %v7599_v19  ;;  %v7566_v19 = vld [vmem:[%s8106_s30 + $0x1a0] ss:$8 sps:$4 sm:$0xff]  }
 0x483   :  { %2674 = vmatprep.subr.bf16.mxu1 %v7604_v22  ;;  %v7571_v22 = vld [vmem:[%s8106_s30 + $0x1b4] ss:$8 sps:$4 sm:$0xff]  }
 0x54a   :  { %v6670_v37 = vpop.f32.mrb[20].mxu0 }
 0x54b   :  { %v6671_v38 = vpop.f32.mrb[21].mxu0 }
 0x54c   :  { %v6672_v41 = vadd.f32 %v6671_v38, %v6670_v37  ;;  %v7614_v37 = vld [vmem:[%s8106_s30 + $0xa0] ss:$8 sps:$4 sm:$0xff]   ;;  %v7619_v38 = vld [vmem:[%s8106_s30 + $0xb4] ss:$8 sps:$4 sm:$0xff]  }
 0x54e   :  { %v1848_v42 = vmul.f32 0.0078125, %v6672_v41  ;;  %v2122_v41 = vld [vmem:[%s8086_s8] sm:$0x3]  ;;  %s9219_s8 = sld [smem:[#allocation16_spill]] }
 0x550   :  { %6102 = vmatmul.mubr.msk.f32.vlgmr.msra.gmra.mrb[22].mxu0 %vm831_vm10, %v1848_v42  ;;  %v7617_v42 = vld [vmem:[%s8106_s30 + $0xb0] ss:$8 sps:$4 sm:$0xff]  }
 0x551   :  { %7007 = vmatpush3.bf16.msra.mxu0 %v8332_v46 }
 0x552   :  { %7009 = vmatprep.subr.bf16.mxu0 %v8334_v47 }
 0x555   :  { %7011 = vmatpush3.bf16.msra.mxu0 %v8346_v53 }
 0x556   :  { %7013 = vmatprep.subr.bf16.mxu0 %v8422_v63 }
 0x559   :  { %7015 = vmatpush3.bf16.msra.mxu0 %v8426_v4 }
 0x55a   :  { %7017 = vmatprep.subr.bf16.mxu0 %v8432_v50 }
 0x55d   :  { %7019 = vmatpush3.bf16.msra.mxu0 %v8436_v8 }
 0x55e   :  { %7021 = vmatprep.subr.bf16.mxu0 %v8442_v11 }
 0x561   :  { %7023 = vmatpush3.bf16.msra.mxu0 %v8446_v14 }
 0x562   :  { %7025 = vmatprep.subr.bf16.mxu0 %v8452_v17 }
 0x565   :  { %7027 = vmatpush3.bf16.msra.mxu0 %v8456_v20 }
 0x566   :  { %7029 = vmatprep.subr.bf16.mxu0 %v8462_v25 }
 0x569   :  { %7031 = vmatpush3.bf16.msra.mxu0 %v8467_v31 }
 0x56a   :  { %7033 = vmatprep.subr.bf16.mxu0 %v8473_v32 }
 0x56d   :  { %7035 = vmatpush3.bf16.msra.mxu0 %v8476_v33 }
 0x56e   :  { %7037 = vmatprep.subr.bf16.mxu0 %v8482_v36 }
 0x623   :  { %v1926_v40 = vpop.f32.mrb[22].mxu0 }
 0x624   :  { %v1934_v46 = vrot.slane %v1926_v40, %v8262_v3  ;;  %v1928_v47 = vpop.f32.mrb[23].mxu0 }
 0x625   :  { %v1938_v53 = vrot.slane %v1928_v47, %v8262_v3 }
 0x626   :  { %v8518_v63 = vsub.f32 %v1727_v59, %v1934_v46  ;;  %v8520_v4 = vsub.f32 %v1729_v60, %v1934_v46  ;;  %v7622_v46 = vld [vmem:[%s8106_s30 + $0xc4] ss:$8 sps:$4 sm:$0xff]  }
 0x627   :  { %v8522_v50 = vsub.f32 %v1728_v61, %v1938_v53  ;;  %v8524_v8 = vsub.f32 %v1730_v0, %v1938_v53  ;;  %v2127_v53 = vrot.slane %v2122_v41, %v8262_v3 }
 0x628   :  { %v1943_v11 = vmul.f32 %v8518_v63, %v8518_v63  ;;  %v1945_v14 = vmul.f32 %v8520_v4, %v8520_v4 }
 0x629   :  { %v1944_v17 = vmul.f32 %v8522_v50, %v8522_v50  ;;  %v1946_v20 = vmul.f32 %v8524_v8, %v8524_v8 }
 0x62a   :  { %v1947_v25 = vadd.f32 %v1945_v14, %v1943_v11 }
 0x62b   :  { %v1954_v31 = vadd.f32 %v1946_v20, %v1944_v17  ;;  %v2131_v17 = vrot.slane %v2122_v41, %v8266_v5  ;;  %v7629_v41 = vld [vmem:[%s8106_s30 + $0xf0] ss:$8 sps:$4 sm:$0xff]  }
 0x62c   :  { %v1948_v32 = vrot.slane %v1947_v25, 4 }
 0x62d   :  { %v1955_v33 = vrot.slane %v1954_v31, 4 }
 0x62e   :  { %v1949_v36 = vadd.f32 %v1948_v32, %v1947_v25 }
 0x62f   :  { %v1956_v43 = vadd.f32 %v1955_v33, %v1954_v31  ;;  %v7620_v31 = vld [vmem:[%s8106_s30 + $0xc0] ss:$8 sps:$4 sm:$0xff]  }
 0x630   :  { %v1950_v44 = vrot.slane %v1949_v36, 2 }
 0x631   :  { %v1957_v45 = vrot.slane %v1956_v43, 2 }
 0x632   :  { %v1951_v48 = vadd.f32 %v1950_v44, %v1949_v36  ;;  %v7625_v36 = vld [vmem:[%s8106_s30 + $0xd4] ss:$8 sps:$4 sm:$0xff]  }
 0x633   :  { %v1958_v49 = vadd.f32 %v1957_v45, %v1956_v43 }
 0x634   :  { %v1952_v52 = vrot.slane %v1951_v48, 1 }
 0x635   :  { %v1959_v54 = vrot.slane %v1958_v49, 1 }
 0x636   :  { %v1953_v56 = vadd.f32 %v1952_v52, %v1951_v48 }
 0x637   :  { %v1960_v55 = vadd.f32 %v1959_v54, %v1958_v49  ;;  %v7626_v54 = vld [vmem:[%s8106_s30 + $0xe0] ss:$8 sps:$4 sm:$0xff]  }
 0x639   :  { %2025 = vmatprep.mubr.f32.mxu0 %v1960_v55  ;;  %v7536_v55 = vld [vmem:[%s8106_s30 + $0x100] ss:$8 sps:$4 sm:$0xff]  }
 0x63a   :  { %2026 = vmatmul.mubr.f32.vlgmr.msra.gmra.mrb[24].mxu0 %v1953_v56  ;;  %v6105_v56 = vld [vmem:[%s8101_s24 + $0x4] sm:$0xf] }
 0x63b   :  { %7039 = vmatpush1.bf16.msra.mxu0 %v8490_v24  ;;  %2103 = vmatprep.mubr.f32.mxu0 %v8035_v35  ;;  %v7602_v24 = vld [vmem:[%s8106_s30 + $0x60] ss:$8 sps:$4 sm:$0xff]  }
 0x63c   :  { %7041 = vmatprep.subr.bf16.mxu0 %v7000_v21  ;;  %2675 = vmatpush1.bf16.msra.mxu1 %v7602_v24  ;;  %v7608_v21 = vld [vmem:[%s8106_s30 + $0x80] ss:$8 sps:$4 sm:$0xff]   ;;  %v7569_v24 = vld [vmem:[%s8106_s30 + $0x1b0] ss:$8 sps:$4 sm:$0xff]  }
 0x63d   :  { %2676 = vmatprep.subr.bf16.mxu1 %v7607_v27  ;;  %v7574_v27 = vld [vmem:[%s8106_s30 + $0x1c4] ss:$8 sps:$4 sm:$0xff]  }
 0x63f   :  { %7043 = vmatpush1.bf16.msra.mxu0 %v7002_v34  ;;  %v7616_v34 = vld [vmem:[%s8106_s30 + $0xa4] ss:$8 sps:$4 sm:$0xff]  }
 0x640   :  { %2677 = vmatpush1.bf16.msra.mxu1 %v7605_v28  ;;  %v7572_v28 = vld [vmem:[%s8106_s30 + $0x1c0] ss:$8 sps:$4 sm:$0xff]  }
 0x641   :  { %2678 = vmatprep.subr.bf16.mxu1 %v7610_v30  ;;  %v7577_v30 = vld [vmem:[%s8106_s30 + $0x1d4] ss:$8 sps:$4 sm:$0xff]  }
 0x644   :  { %2679 = vmatpush1.bf16.msra.mxu1 %v7608_v21  ;;  %v7575_v21 = vld [vmem:[%s8106_s30 + $0x1d0] ss:$8 sps:$4 sm:$0xff]  }
 0x645   :  { %2680 = vmatprep.subr.bf16.mxu1 %v7613_v26  ;;  %v7580_v26 = vld [vmem:[%s8106_s30 + $0x1e4] ss:$8 sps:$4 sm:$0xff]  }
 0x648   :  { %2681 = vmatpush1.bf16.msra.mxu1 %v7611_v29  ;;  %v7578_v29 = vld [vmem:[%s8106_s30 + $0x1e0] ss:$8 sps:$4 sm:$0xff]  }
 0x649   :  { %2682 = vmatprep.subr.bf16.mxu1 %v7616_v34  ;;  %v7583_v34 = vld [vmem:[%s8106_s30 + $0x1f4] ss:$8 sps:$4 sm:$0xff]  }
 0x64c   :  { %2683 = vmatpush1.bf16.msra.mxu1 %v7614_v37  ;;  %v7581_v37 = vld [vmem:[%s8106_s30 + $0x1f0] ss:$8 sps:$4 sm:$0xff]  }
 0x64d   :  { %2684 = vmatprep.subr.bf16.mxu1 %v7619_v38  ;;  %v7631_v38 = vld [vmem:[%s8106_s30 + $0xf4] ss:$8 sps:$4 sm:$0xff]  }
 0x650   :  { %2685 = vmatpush1.bf16.msra.mxu1 %v7617_v42 }
 0x651   :  { %2686 = vmatprep.subr.bf16.mxu1 %v7622_v46 }
 0x654   :  { %2687 = vmatpush1.bf16.msra.mxu1 %v7620_v31 }
 0x655   :  { %2688 = vmatprep.subr.bf16.mxu1 %v7625_v36  ;;  %v6203_v36 = vld [vmem:[%s8101_s24 + $0x8] sm:$0xf] }
 0x70d   :  { %v6705_v57 = vpop.f32.mrb[24].mxu0 }
 0x70e   :  { %v6706_v58 = vpop.f32.mrb[25].mxu0 }
 0x70f   :  { %v6707_v59 = vadd.f32 %v6706_v58, %v6705_v57  ;;  %v7541_v57 = vld [vmem:[%s8106_s30 + $0x114] ss:$8 sps:$4 sm:$0xff]   ;;  %v7539_v58 = vld [vmem:[%s8106_s30 + $0x110] ss:$8 sps:$4 sm:$0xff]  }
 0x711   :  { %v2031_v60 = vmul.f32 0.0078125, %v6707_v59  ;;  %v7544_v59 = vld [vmem:[%s8106_s30 + $0x124] ss:$8 sps:$4 sm:$0xff]  }
 0x713   :  { %v2033_v61 = vadd.f32 0.8, %v2031_v60  ;;  %v7542_v60 = vld [vmem:[%s8106_s30 + $0x120] ss:$8 sps:$4 sm:$0xff]  }
 0x715   :  { %7971 = vrsqrt.f32 %v2033_v61  ;;  %v7547_v61 = vld [vmem:[%s8106_s30 + $0x134] ss:$8 sps:$4 sm:$0xff]  }
 0x71f   :  { %v7972_v0 = vpop.eup %7971 }
 0x720   :  { %v2035_v1 = vmul.f32 %v7972_v0, %v2032_v62  ;;  %v7545_v62 = vld [vmem:[%s8106_s30 + $0x130] ss:$8 sps:$4 sm:$0xff]   ;;  %v7550_v0 = vld [vmem:[%s8106_s30 + $0x144] ss:$8 sps:$4 sm:$0xff]  }
 0x722   :  { %6103 = vmatmul.mubr.msk.f32.vlgmr.msra.gmra.mrb[26].mxu0 %vm831_vm10, %v2035_v1  ;;  %v7548_v1 = vld [vmem:[%s8106_s30 + $0x140] ss:$8 sps:$4 sm:$0xff]  }
 0x723   :  { %2177 = vmatprep.mubr.bf16.mxu0 %v8034_v23 }
 0x7f5   :  { %v2105_v40 = vpop.f32.mrb[26].mxu0 }
 0x7f6   :  { %v2113_v47 = vrot.slane %v2105_v40, %v8262_v3  ;;  %v2107_v11 = vpop.f32.mrb[27].mxu0 }
 0x7f7   :  { %v2117_v14 = vrot.slane %v2107_v11, %v8262_v3 }
 0x7f8   :  { %v2118_v20 = vmul.f32 %v2113_v47, %v8518_v63  ;;  %v2120_v25 = vmul.f32 %v2113_v47, %v8520_v4  ;;  %v7623_v63 = vld [vmem:[%s8106_s30 + $0xd0] ss:$8 sps:$4 sm:$0xff]   ;;  %v7628_v4 = vld [vmem:[%s8106_s30 + $0xe4] ss:$8 sps:$4 sm:$0xff]  }
 0x7f9   :  { %v2119_v32 = vmul.f32 %v2117_v14, %v8522_v50  ;;  %v2121_v33 = vmul.f32 %v2117_v14, %v8524_v8  ;;  %v2140_v50 = vld [vmem:[%s8101_s24] sm:$0xf]  ;;  %2689 = vmatpush1.bf16.msra.mxu1 %v7623_v63  ;;  %v7538_v8 = vld [vmem:[%s8106_s30 + $0x104] ss:$8 sps:$4 sm:$0xff]   ;;  %s8037_s24 = smov [#allocation2]  }
 0x7fa   :  { %v2134_v43 = vadd.f32 %v2127_v53, %v2118_v20  ;;  %v2136_v44 = vadd.f32 %v2127_v53, %v2120_v25  ;;  %2690 = vmatprep.subr.bf16.mxu1 %v7628_v4  ;;  %v7638_v63 = vld [vmem:[%s8106_s30 + $0x220] ss:$8 sps:$4 sm:$0xff]   ;;  %v7641_v4 = vld [vmem:[%s8106_s30 + $0x230] ss:$8 sps:$4 sm:$0xff]  }
 0x7fb   :  { %v2135_v45 = vadd.f32 %v2131_v17, %v2119_v32  ;;  %v2137_v48 = vadd.f32 %v2131_v17, %v2121_v33  ;;  %v7634_v33 = vld [vmem:[%s8106_s30 + $0x204] ss:$8 sps:$4 sm:$0xff]  }
 0x7fc   :  { %v8579_v52 = vpack.c.bf16 %v2136_v44, %v2134_v43  ;;  %v7632_v43 = vld [vmem:[%s8106_s30 + $0x200] ss:$8 sps:$4 sm:$0xff]   ;;  %v7637_v44 = vld [vmem:[%s8106_s30 + $0x214] ss:$8 sps:$4 sm:$0xff]  }
 0x7fd   :  { %v8576_v49 = vpack.c.bf16 %v2137_v48, %v2135_v45  ;;  %2691 = vmatpush1.bf16.msra.mxu1 %v7626_v54  ;;  %v7635_v45 = vld [vmem:[%s8106_s30 + $0x210] ss:$8 sps:$4 sm:$0xff]   ;;  %v7640_v48 = vld [vmem:[%s8106_s30 + $0x224] ss:$8 sps:$4 sm:$0xff]  }
 0x7fe   :  { %2692 = vmatprep.subr.bf16.mxu1 %v7631_v38  ;;  %v7647_v54 = vld [vmem:[%s8106_s30 + $0x250] ss:$8 sps:$4 sm:$0xff]   ;;  %v3040_v38 = vld [vmem:[%s8126_s27 + $0xa8] sm:$0xff] }
 0x7ff   :  { %2145 = vmatprep.subr.bf16.mxu0 %v8576_v49 }
 0x800   :  { %2146 = vmatpush1.bf16.msra.mxu0 %v8579_v52 }
 0x801   :  { %2225 = vmatprep.subr.bf16.mxu0 %v8576_v49  ;;  %2693 = vmatpush1.bf16.msra.mxu1 %v7629_v41 }
 0x803   :  { %6104 = vmatmul.mubr.msk.bf16.vlgmr.msra.gmra.mrb[28].mxu0 %vm2141_vm15, %v2140_v50  ;;  %v7644_v50 = vld [vmem:[%s8106_s30 + $0x240] ss:$8 sps:$4 sm:$0xff]  }
 0x804   :  { %2226 = vmatpush1.bf16.msra.mxu0 %v8579_v52  ;;  %2257 = vmatprep.mubr.bf16.mxu0 %v8034_v23 }
 0x805   :  { %2461 = vmatprep.subr.bf16.mxu0 %v7538_v8  ;;  %v7649_v8 = vld [vmem:[%s8106_s30 + $0x254] ss:$8 sps:$4 sm:$0xff]  }
 0x80b   :  { %6106 = vmatmul.mubr.msk.bf16.vlgmr.msra.gmra.mrb[32].mxu0 %vm2141_vm15, %v6105_v56  ;;  %v7650_v56 = vld [vmem:[%s8106_s30 + $0x260] ss:$8 sps:$4 sm:$0xff]  }
 0x80c   :  { %2462 = vmatpush1.bf16.msra.mxu0 %v7536_v55  ;;  %v7652_v55 = vld [vmem:[%s8106_s30 + $0x264] ss:$8 sps:$4 sm:$0xff]  }
 0x80d   :  { %2463 = vmatprep.subr.bf16.mxu0 %v7541_v57  ;;  %v7655_v57 = vld [vmem:[%s8106_s30 + $0x274] ss:$8 sps:$4 sm:$0xff]  }
 0x810   :  { %2464 = vmatpush1.bf16.msra.mxu0 %v7539_v58  ;;  %v7653_v58 = vld [vmem:[%s8106_s30 + $0x270] ss:$8 sps:$4 sm:$0xff]  }
 0x811   :  { %2465 = vmatprep.subr.bf16.mxu0 %v7544_v59  ;;  %v7658_v59 = vld [vmem:[%s8106_s30 + $0x284] ss:$8 sps:$4 sm:$0xff]  }
 0x814   :  { %2466 = vmatpush1.bf16.msra.mxu0 %v7542_v60  ;;  %v7656_v60 = vld [vmem:[%s8106_s30 + $0x280] ss:$8 sps:$4 sm:$0xff]  }
 0x815   :  { %2467 = vmatprep.subr.bf16.mxu0 %v7547_v61  ;;  %v7661_v61 = vld [vmem:[%s8106_s30 + $0x294] ss:$8 sps:$4 sm:$0xff]  }
 0x818   :  { %2468 = vmatpush1.bf16.msra.mxu0 %v7545_v62  ;;  %v7659_v62 = vld [vmem:[%s8106_s30 + $0x290] ss:$8 sps:$4 sm:$0xff]  }
 0x819   :  { %2469 = vmatprep.subr.bf16.mxu0 %v7550_v0  ;;  %v7664_v0 = vld [vmem:[%s8106_s30 + $0x2a4] ss:$8 sps:$4 sm:$0xff]  }
 0x81c   :  { %2470 = vmatpush1.bf16.msra.mxu0 %v7548_v1  ;;  %v7662_v1 = vld [vmem:[%s8106_s30 + $0x2a0] ss:$8 sps:$4 sm:$0xff]  }
 0x81d   :  { %2471 = vmatprep.subr.bf16.mxu0 %v7553_v6  ;;  %v7667_v6 = vld [vmem:[%s8106_s30 + $0x2b4] ss:$8 sps:$4 sm:$0xff]  }
 0x820   :  { %2472 = vmatpush1.bf16.msra.mxu0 %v7551_v39  ;;  %v7665_v39 = vld [vmem:[%s8106_s30 + $0x2b0] ss:$8 sps:$4 sm:$0xff]  }
 0x821   :  { %2473 = vmatprep.subr.bf16.mxu0 %v7556_v51  ;;  %v7668_v51 = vld [vmem:[%s8106_s30 + $0x2c0] ss:$8 sps:$4 sm:$0xff]  }
 0x824   :  { %2474 = vmatpush1.bf16.msra.mxu0 %v7554_v7  ;;  %v7670_v7 = vld [vmem:[%s8106_s30 + $0x2c4] ss:$8 sps:$4 sm:$0xff]  }
 0x825   :  { %2475 = vmatprep.subr.bf16.mxu0 %v7559_v9  ;;  %v7673_v9 = vld [vmem:[%s8106_s30 + $0x2d4] ss:$8 sps:$4 sm:$0xff]  }
 0x828   :  { %2476 = vmatpush1.bf16.msra.mxu0 %v7557_v10  ;;  %v7671_v10 = vld [vmem:[%s8106_s30 + $0x2d0] ss:$8 sps:$4 sm:$0xff]  }
 0x829   :  { %2477 = vmatprep.subr.bf16.mxu0 %v7562_v12  ;;  %v7674_v12 = vld [vmem:[%s8106_s30 + $0x2e0] ss:$8 sps:$4 sm:$0xff]  }
 0x82c   :  { %2478 = vmatpush1.bf16.msra.mxu0 %v7560_v13  ;;  %v7676_v13 = vld [vmem:[%s8106_s30 + $0x2e4] ss:$8 sps:$4 sm:$0xff]  }
 0x82d   :  { %2479 = vmatprep.subr.bf16.mxu0 %v7565_v15  ;;  %v7679_v15 = vld [vmem:[%s8106_s30 + $0x2f4] ss:$8 sps:$4 sm:$0xff]  }
 0x830   :  { %2480 = vmatpush1.bf16.msra.mxu0 %v7563_v16  ;;  %v7677_v16 = vld [vmem:[%s8106_s30 + $0x2f0] ss:$8 sps:$4 sm:$0xff]  }
 0x831   :  { %2481 = vmatprep.subr.bf16.mxu0 %v7568_v18  ;;  %v3035_v18 = vld [vmem:[%s8126_s27 + $0x80] sm:$0xff] }
 0x834   :  { %2482 = vmatpush1.bf16.msra.mxu0 %v7566_v19  ;;  %v3036_v19 = vld [vmem:[%s8126_s27 + $0x88] sm:$0xff] }
 0x835   :  { %2483 = vmatprep.subr.bf16.mxu0 %v7571_v22  ;;  %v3019_v22 = vld [vmem:[%s8126_s27] sm:$0xff] }
 0x838   :  { %2484 = vmatpush1.bf16.msra.mxu0 %v7569_v24  ;;  %v8665_v24 = vpack.c.bf16 %v3036_v19, %v3035_v18 }
 0x839   :  { %2485 = vmatprep.subr.bf16.mxu0 %v7574_v27  ;;  %v3020_v27 = vld [vmem:[%s8126_s27 + $0x8] sm:$0xff] }
 0x83a   :  { %7045 = vmatprep.subr.bf16.mxu1 %v8665_v24 }
 0x83c   :  { %2486 = vmatpush1.bf16.msra.mxu0 %v7572_v28  ;;  %v3037_v28 = vld [vmem:[%s8126_s27 + $0x90] sm:$0xff] }
 0x83d   :  { %2487 = vmatprep.subr.bf16.mxu0 %v7577_v30  ;;  %v3038_v30 = vld [vmem:[%s8126_s27 + $0x98] sm:$0xff] }
 0x840   :  { %2488 = vmatpush1.bf16.msra.mxu0 %v7575_v21  ;;  %v8670_v21 = vpack.c.bf16 %v3020_v27, %v3019_v22  ;;  %v3033_v22 = vld [vmem:[%s8126_s27 + $0x70] sm:$0xff]  ;;  %v3034_v27 = vld [vmem:[%s8126_s27 + $0x78] sm:$0xff] }
 0x841   :  { %2489 = vmatprep.subr.bf16.mxu0 %v7580_v26  ;;  %v8672_v26 = vpack.c.bf16 %v3038_v30, %v3037_v28  ;;  %v8743_v28 = vpack.c.bf16 %v3034_v27, %v3033_v22  ;;  %v3124_v30 = vld [vmem:[%s9210_s0 + $0x8] sm:$0xff] }
 0x844   :  { %2490 = vmatpush1.bf16.msra.mxu0 %v7578_v29  ;;  %v3021_v29 = vld [vmem:[%s8126_s27 + $0x10] sm:$0xff] }
 0x845   :  { %2491 = vmatprep.subr.bf16.mxu0 %v7583_v34  ;;  %v3022_v34 = vld [vmem:[%s8126_s27 + $0x18] sm:$0xff] }
 0x846   :  { %v8680_v41 = vpack.c.bf16 %v3022_v34, %v3021_v29  ;;  %v3126_v29 = vld [vmem:[%s9210_s0 + $0x18] sm:$0xff]  ;;  %v3123_v34 = vld [vmem:[%s9210_s0] sm:$0xff] }
 0x848   :  { %2492 = vmatpush1.bf16.msra.mxu0 %v7581_v37  ;;  %v3039_v37 = vld [vmem:[%s8126_s27 + $0xa0] sm:$0xff] }
 0x849   :  { %2708 = vmatprep.subr.bf16.mxu0 %v8576_v49  ;;  %v7643_v49 = vld [vmem:[%s8106_s30 + $0x234] ss:$8 sps:$4 sm:$0xff]  }
 0x8d6   :  { %v2179_v42 = vpop.f32.mrb[28].mxu0 }
 0x8d7   :  { %v2181_v40 = vpop.f32.mrb[29].mxu0  ;;  %v2186_v53 = vpack.c.bf16 %v2179_v42, %v2179_v42  ;;  %v8683_v42 = vpack.c.bf16 %v3040_v38, %v3039_v37  ;;  %v8751_v37 = vpack.c.bf16 %v3126_v29, %v3124_v30  ;;  %v3125_v38 = vld [vmem:[%s9210_s0 + $0x10] sm:$0xff] }
 0x8d8   :  { %v2187_v46 = vpack.c.bf16 %v2181_v40, %v2181_v40  ;;  %v2183_v47 = vpop.f32.mrb[30].mxu0  ;;  %v3023_v40 = vld [vmem:[%s8126_s27 + $0x20] sm:$0xff] }
 0x8d9   :  { %v2184_v11 = vpop.f32.mrb[31].mxu0 }
 0x8da   :  { %2694 = vmatprep.mubr.bf16.mxu1 %v2187_v46  ;;  %v3024_v46 = vld [vmem:[%s8126_s27 + $0x28] sm:$0xff] }
 0x8db   :  { %2695 = vmatmul.mubr.bf16.vlgmr.msra.gmra.mrb[16].mxu1 %v2186_v53  ;;  %v8688_v47 = vpack.c.bf16 %v3024_v46, %v3023_v40  ;;  %v3128_v40 = vld [vmem:[%s9210_s0 + $0x28] sm:$0xff]  ;;  %v3130_v46 = vld [vmem:[%s9210_s0 + $0x38] sm:$0xff] }
 0x8dc   :  { %7047 = vmatpush3.bf16.msra.mxu1 %v8670_v21 }
 0x8dd   :  { %7049 = vmatprep.subr.bf16.mxu1 %v8672_v26 }
 0x8de   :  { %v2259_v14 = vpop.f32.mrb[32].mxu0 }
 0x8df   :  { %v2261_v17 = vpop.f32.mrb[33].mxu0  ;;  %v2266_v31 = vpack.c.bf16 %v2259_v14, %v2259_v14 }
 0x8e0   :  { %v2267_v20 = vpack.c.bf16 %v2261_v17, %v2261_v17  ;;  %v2263_v25 = vpop.f32.mrb[34].mxu0  ;;  %7051 = vmatpush3.bf16.msra.mxu1 %v8680_v41 }
 0x8e1   :  { %v2264_v32 = vpop.f32.mrb[35].mxu0  ;;  %7053 = vmatprep.subr.bf16.mxu1 %v8683_v42 }
 0x8e2   :  { %2493 = vmatprep.mubr.bf16.mxu0 %v2267_v20 }
 0x8e3   :  { %2494 = vmatmul.mubr.bf16.vlgmr.msra.gmra.mrb[36].mxu0 %v2266_v31 }
 0x8e4   :  { %2709 = vmatpush1.bf16.msra.mxu0 %v8579_v52  ;;  %2740 = vmatprep.mubr.bf16.mxu0 %v8034_v23  ;;  %v7646_v52 = vld [vmem:[%s8106_s30 + $0x244] ss:$8 sps:$4 sm:$0xff]   ;;  %s5805_s30 = sshll.u32 %s8037_s24, 4  ;;  %s5806_s30 = int_to_ptr.vmem [resolvable:$true] %s5805_s30 }
 0x8e5   :  { %2944 = vmatprep.subr.bf16.mxu0 %v7634_v33  ;;  %7055 = vmatpush3.bf16.msra.mxu1 %v8688_v47  ;;  %p7986_p1 = scmp.lt.s32.totalorder %s5806_s30, %s5806_s30 }
 0x8eb   :  { %6204 = vmatmul.mubr.msk.bf16.vlgmr.msra.gmra.mrb[40].mxu0 %vm2141_vm15, %v6203_v36 }
 0x8ec   :  { %2945 = vmatpush1.bf16.msra.mxu0 %v7632_v43 }
 0x8ed   :  { %2946 = vmatprep.subr.bf16.mxu0 %v7637_v44 }
 0x8f0   :  { %2947 = vmatpush1.bf16.msra.mxu0 %v7635_v45 }
 0x8f1   :  { %2948 = vmatprep.subr.bf16.mxu0 %v7640_v48 }
 0x8f4   :  { %2949 = vmatpush1.bf16.msra.mxu0 %v7638_v63 }
 0x8f5   :  { %2950 = vmatprep.subr.bf16.mxu0 %v7643_v49 }
 0x8f8   :  { %2951 = vmatpush1.bf16.msra.mxu0 %v7641_v4  ;;  %v3041_v4 = vld [vmem:[%s8126_s27 + $0xb0] sm:$0xff] }
 0x8f9   :  { %2952 = vmatprep.subr.bf16.mxu0 %v7646_v52  ;;  %v3042_v52 = vld [vmem:[%s8126_s27 + $0xb8] sm:$0xff] }
 0x8fc   :  { %2953 = vmatpush1.bf16.msra.mxu0 %v7644_v50  ;;  %v8699_v50 = vpack.c.bf16 %v3042_v52, %v3041_v4 }
 0x8fd   :  { %2954 = vmatprep.subr.bf16.mxu0 %v7649_v8  ;;  %v3025_v8 = vld [vmem:[%s8126_s27 + $0x30] sm:$0xff] }
 0x8fe   :  { %7057 = vmatprep.subr.bf16.mxu1 %v8699_v50 }
 0x900   :  { %2955 = vmatpush1.bf16.msra.mxu0 %v7647_v54  ;;  %v3026_v54 = vld [vmem:[%s8126_s27 + $0x38] sm:$0xff] }
 0x901   :  { %2956 = vmatprep.subr.bf16.mxu0 %v7652_v55  ;;  %v8703_v55 = vpack.c.bf16 %v3026_v54, %v3025_v8 }
 0x903   :  { %7059 = vmatpush3.bf16.msra.mxu1 %v8703_v55 }
 0x904   :  { %2957 = vmatpush1.bf16.msra.mxu0 %v7650_v56  ;;  %v3043_v56 = vld [vmem:[%s8126_s27 + $0xc0] sm:$0xff] }
 0x905   :  { %2958 = vmatprep.subr.bf16.mxu0 %v7655_v57  ;;  %v3044_v57 = vld [vmem:[%s8126_s27 + $0xc8] sm:$0xff] }
 0x908   :  { %2959 = vmatpush1.bf16.msra.mxu0 %v7653_v58  ;;  %v8709_v58 = vpack.c.bf16 %v3044_v57, %v3043_v56 }
 0x909   :  { %2960 = vmatprep.subr.bf16.mxu0 %v7658_v59  ;;  %v3027_v59 = vld [vmem:[%s8126_s27 + $0x40] sm:$0xff] }
 0x90a   :  { %7061 = vmatprep.subr.bf16.mxu1 %v8709_v58 }
 0x90c   :  { %2961 = vmatpush1.bf16.msra.mxu0 %v7656_v60  ;;  %v3028_v60 = vld [vmem:[%s8126_s27 + $0x48] sm:$0xff] }
 0x90d   :  { %2962 = vmatprep.subr.bf16.mxu0 %v7661_v61  ;;  %v8713_v61 = vpack.c.bf16 %v3028_v60, %v3027_v59 }
 0x90f   :  { %7063 = vmatpush3.bf16.msra.mxu1 %v8713_v61 }
 0x910   :  { %2963 = vmatpush1.bf16.msra.mxu0 %v7659_v62  ;;  %v3045_v62 = vld [vmem:[%s8126_s27 + $0xd0] sm:$0xff] }
 0x911   :  { %2964 = vmatprep.subr.bf16.mxu0 %v7664_v0  ;;  %v3046_v0 = vld [vmem:[%s8126_s27 + $0xd8] sm:$0xff] }
 0x914   :  { %2965 = vmatpush1.bf16.msra.mxu0 %v7662_v1  ;;  %v8719_v1 = vpack.c.bf16 %v3046_v0, %v3045_v62 }
 0x915   :  { %2966 = vmatprep.subr.bf16.mxu0 %v7667_v6  ;;  %v3029_v6 = vld [vmem:[%s8126_s27 + $0x50] sm:$0xff] }
 0x916   :  { %7065 = vmatprep.subr.bf16.mxu1 %v8719_v1 }
 0x918   :  { %2967 = vmatpush1.bf16.msra.mxu0 %v7665_v39  ;;  %v3030_v39 = vld [vmem:[%s8126_s27 + $0x58] sm:$0xff] }
 0x919   :  { %2968 = vmatprep.subr.bf16.mxu0 %v7670_v7  ;;  %v3047_v7 = vld [vmem:[%s8126_s27 + $0xe0] sm:$0xff] }
 0x91c   :  { %2969 = vmatpush1.bf16.msra.mxu0 %v7668_v51  ;;  %v8723_v51 = vpack.c.bf16 %v3030_v39, %v3029_v6 }
 0x91d   :  { %2970 = vmatprep.subr.bf16.mxu0 %v7673_v9  ;;  %v3048_v9 = vld [vmem:[%s8126_s27 + $0xe8] sm:$0xff] }
 0x91e   :  { %7067 = vmatpush3.bf16.msra.mxu1 %v8723_v51 }
 0x920   :  { %2971 = vmatpush1.bf16.msra.mxu0 %v7671_v10  ;;  %v3031_v10 = vld [vmem:[%s8126_s27 + $0x60] sm:$0xff] }
 0x921   :  { %2972 = vmatprep.subr.bf16.mxu0 %v7676_v13  ;;  %v3032_v13 = vld [vmem:[%s8126_s27 + $0x68] sm:$0xff] }
 0x922   :  { %v8735_v18 = vpack.c.bf16 %v3032_v13, %v3031_v10 }
 0x924   :  { %2973 = vmatpush1.bf16.msra.mxu0 %v7674_v12  ;;  %v8730_v12 = vpack.c.bf16 %v3048_v9, %v3047_v7 }
 0x925   :  { %2974 = vmatprep.subr.bf16.mxu0 %v7679_v15  ;;  %v3049_v15 = vld [vmem:[%s8126_s27 + $0xf0] sm:$0xff] }
 0x926   :  { %7069 = vmatprep.subr.bf16.mxu1 %v8730_v12 }
 0x927   :  { %7071 = vmatpush3.bf16.msra.mxu1 %v8735_v18 }
 0x928   :  { %2975 = vmatpush1.bf16.msra.mxu0 %v7677_v16  ;;  %v3050_v16 = vld [vmem:[%s8126_s27 + $0xf8] sm:$0xff] }
 0x929   :  { %v8737_v19 = vpack.c.bf16 %v3050_v16, %v3049_v15  ;;  %7077 = vmatprep.subr.bf16.mxu0 %v8751_v37 }
 0x92b   :  { %7073 = vmatprep.subr.bf16.mxu1 %v8737_v19 }
 0x92c   :  { %7075 = vmatpush3.bf16.msra.mxu1 %v8743_v28 }
 0x92d   :  { %7093 = vmatprep.subr.bf16.mxu1 %v8665_v24  ;;  %v3134_v24 = vld [vmem:[%s9210_s0 + $0x58] sm:$0xff] }
 0x9ae   :  { %v2696_v53 = vpop.f32.mrb[16].mxu1 }
 0x9af   :  { %v2698_v11 = vpop.f32.mrb[17].mxu1 }
 0x9b0   :  { %v2700_v14 = vpop.f32.mrb[18].mxu1 }
 0x9b1   :  { %v2701_v17 = vpop.f32.mrb[19].mxu1  ;;  %v3127_v14 = vld [vmem:[%s9210_s0 + $0x20] sm:$0xff] }
 0x9b2   :  { %v3129_v17 = vld [vmem:[%s9210_s0 + $0x30] sm:$0xff] }
 0x9b6   :  { %v2495_v20 = vpop.f32.mrb[36].mxu0 }
 0x9b7   :  { %v8692_v25 = vadd.f32 %v2696_v53, %v2495_v20  ;;  %v2497_v31 = vpop.f32.mrb[37].mxu0  ;;  %v8756_v53 = vpack.c.bf16 %v3125_v38, %v3123_v34  ;;  %v3132_v20 = vld [vmem:[%s9210_s0 + $0x48] sm:$0xff] }
 0x9b8   :  { %v8694_v32 = vadd.f32 %v2698_v11, %v2497_v31  ;;  %v2499_v33 = vpop.f32.mrb[38].mxu0  ;;  %v8758_v11 = vpack.c.bf16 %v3130_v46, %v3128_v40  ;;  %v8766_v31 = vpack.c.bf16 %v3129_v17, %v3127_v14 }
 0x9b9   :  { %v2500_v36 = vpop.f32.mrb[39].mxu0  ;;  %v8769_v33 = vpack.c.bf16 %v3134_v24, %v3132_v20 }
 0x9ba   :  { %v3131_v36 = vld [vmem:[%s9210_s0 + $0x40] sm:$0xff] }
 0x9be   :  { %v2742_v43 = vpop.f32.mrb[40].mxu0 }
 0x9bf   :  { %v2744_v44 = vpop.f32.mrb[41].mxu0  ;;  %v2749_v63 = vpack.c.bf16 %v2742_v43, %v2742_v43  ;;  %v3133_v43 = vld [vmem:[%s9210_s0 + $0x50] sm:$0xff] }
 0x9c0   :  { %v2750_v45 = vpack.c.bf16 %v2744_v44, %v2744_v44  ;;  %v2746_v48 = vpop.f32.mrb[42].mxu0  ;;  %v8774_v44 = vpack.c.bf16 %v3133_v43, %v3131_v36 }
 0x9c1   :  { %v2747_v49 = vpop.f32.mrb[43].mxu0 }
 0x9c2   :  { %2976 = vmatprep.mubr.bf16.mxu0 %v2750_v45  ;;  %v2987_v45 = vld [vmem:[%s9211_s5] sm:$0x3] }
 0x9c3   :  { %2977 = vmatmul.mubr.bf16.vlgmr.msra.gmra.mrb[44].mxu0 %v2749_v63  ;;  %v2992_v48 = vrot.slane %v2987_v45, %v8262_v3  ;;  %v2996_v49 = vrot.slane %v2987_v45, %v8266_v5 }
 0x9c4   :  { %3206 = vmatprep.mubr.f32.mxu0 %v8035_v35  ;;  %7079 = vmatpush1.bf16.msra.mxu0 %v8756_v53 }
 0x9c5   :  { %7081 = vmatprep.subr.bf16.mxu0 %v8758_v11 }
 0x9c8   :  { %7083 = vmatpush1.bf16.msra.mxu0 %v8766_v31 }
 0x9c9   :  { %7085 = vmatprep.subr.bf16.mxu0 %v8769_v33 }
 0x9cc   :  { %7087 = vmatpush1.bf16.msra.mxu0 %v8774_v44 }
 0xa96   :  { %v2978_v63 = vpop.f32.mrb[44].mxu0 }
 0xa97   :  { %v2985_v4 = vadd.f32 %v2978_v63, %v8692_v25  ;;  %v2980_v52 = vpop.f32.mrb[45].mxu0 }
 0xa98   :  { %v2986_v8 = vadd.f32 %v2980_v52, %v8694_v32  ;;  %v2982_v54 = vpop.f32.mrb[46].mxu0 }
 0xa99   :  { %v2999_v56 = vadd.f32 %v2992_v48, %v2985_v4  ;;  %v2983_v57 = vpop.f32.mrb[47].mxu0 }
 0xa9a   :  { %v3000_v59 = vadd.f32 %v2996_v49, %v2986_v8  ;;  %v3308_v49 = vld [vmem:[%s9212_s9] sm:$0x1] }
 0xa9b   :  { %vm3001_vm1 = vcmp.ge.f32.partialorder %v2999_v56, 0.0  ;;  %v3003_v60 = vmul.f32 0.2, %v2999_v56  ;;  %v3396_v8 = vld [vmem:[%s9213_s13] sm:$0x3] }
 0xa9c   :  { %vm3002_vm2 = vcmp.ge.f32.partialorder %v3000_v59, 0.0  ;;  %v3004_v62 = vmul.f32 0.2, %v3000_v59  ;;  %v3401_v57 = vrot.slane %v3396_v8, %v8262_v3 }
 0xa9d   :  { %v3005_v0 = vsel %vm3001_vm1, %v2999_v56, %v3003_v60 }
 0xa9e   :  { %v3007_v6 = vrot.slane %v3005_v0, 4  ;;  %v3006_v39 = vsel %vm3002_vm2, %v3000_v59, %v3004_v62  ;;  %v3405_v62 = vrot.slane %v3396_v8, %v8266_v5  ;;  %v7758_v8 = vld [vmem:[%s9214_s17 + $0xa0] ss:$8 sps:$4 sm:$0xff]  }
 0xa9f   :  { %v3013_v7 = vrot.slane %v3006_v39, 4 }
 0xaa0   :  { %v3008_v9 = vadd.f32 %v3007_v6, %v3005_v0 }
 0xaa1   :  { %v3014_v10 = vadd.f32 %v3013_v7, %v3006_v39 }
 0xaa2   :  { %v3009_v13 = vrot.slane %v3008_v9, 2 }
 0xaa3   :  { %v3015_v15 = vrot.slane %v3014_v10, 2 }
 0xaa4   :  { %v3010_v25 = vadd.f32 %v3009_v13, %v3008_v9  ;;  %v7682_v13 = vld [vmem:[%s9214_s17 + $0x104] ss:$8 sps:$4 sm:$0xff]  }
 0xaa5   :  { %v3016_v16 = vadd.f32 %v3015_v15, %v3014_v10  ;;  %v7730_v15 = vld [vmem:[%s9214_s17 + $0x4] ss:$8 sps:$4 sm:$0xff]  }
 0xaa6   :  { %v3011_v22 = vrot.slane %v3010_v25, 1 }
 0xaa7   :  { %v3017_v32 = vrot.slane %v3016_v16, 1 }
 0xaa8   :  { %v3012_v30 = vadd.f32 %v3011_v22, %v3010_v25  ;;  %v6273_v22 = vld [vmem:[%s9215_s21 + $0x2] sm:$0x3] }
 0xaa9   :  { %v3018_v27 = vadd.f32 %v3017_v32, %v3016_v16  ;;  %v3412_v16 = vld [vmem:[%s9215_s21] sm:$0x3] }
 0xaaa   :  { %v7680_v32 = vld [vmem:[%s9214_s17 + $0x100] ss:$8 sps:$4 sm:$0xff]  }
 0xaab   :  { %3115 = vmatprep.mubr.f32.mxu1 %v3018_v27  ;;  %v7728_v27 = vld [vmem:[%s9214_s17] ss:$8 sps:$4 sm:$0xff]  }
 0xaac   :  { %3116 = vmatmul.mubr.f32.vlgmr.msra.gmra.mrb[20].mxu1 %v3012_v30  ;;  %v7685_v30 = vld [vmem:[%s9214_s17 + $0x114] ss:$8 sps:$4 sm:$0xff]  }
 0xaad   :  { %7095 = vmatpush3.bf16.msra.mxu1 %v8670_v21  ;;  %v3136_v21 = vld [vmem:[%s9210_s0 + $0x68] sm:$0xff] }
 0xaae   :  { %7097 = vmatprep.subr.bf16.mxu1 %v8672_v26  ;;  %v3138_v26 = vld [vmem:[%s9210_s0 + $0x78] sm:$0xff] }
 0xab1   :  { %7099 = vmatpush3.bf16.msra.mxu1 %v8680_v41  ;;  %v7088_v41 = vpack.c.bf16 %v3138_v26, %v3136_v21  ;;  %v7733_v21 = vld [vmem:[%s9214_s17 + $0x14] ss:$8 sps:$4 sm:$0xff]   ;;  %v7683_v26 = vld [vmem:[%s9214_s17 + $0x110] ss:$8 sps:$4 sm:$0xff]  }
 0xab2   :  { %7101 = vmatprep.subr.bf16.mxu1 %v8683_v42  ;;  %v3135_v42 = vld [vmem:[%s9210_s0 + $0x60] sm:$0xff] }
 0xab3   :  { %7089 = vmatprep.subr.bf16.mxu0 %v7088_v41 }
 0xab5   :  { %7103 = vmatpush3.bf16.msra.mxu1 %v8688_v47  ;;  %v3137_v47 = vld [vmem:[%s9210_s0 + $0x70] sm:$0xff] }
 0xab6   :  { %7105 = vmatprep.subr.bf16.mxu1 %v8699_v50  ;;  %v7090_v50 = vpack.c.bf16 %v3137_v47, %v3135_v42  ;;  %v7688_v42 = vld [vmem:[%s9214_s17 + $0x124] ss:$8 sps:$4 sm:$0xff]  }
 0xab7   :  { %v7736_v47 = vld [vmem:[%s9214_s17 + $0x24] ss:$8 sps:$4 sm:$0xff]  }
 0xab8   :  { %7091 = vmatpush1.bf16.msra.mxu0 %v7090_v50 }
 0xab9   :  { %7107 = vmatpush3.bf16.msra.mxu1 %v8703_v55  ;;  %7125 = vmatprep.subr.bf16.mxu0 %v8751_v37 }
 0xaba   :  { %7109 = vmatprep.subr.bf16.mxu1 %v8709_v58 }
 0xabd   :  { %7111 = vmatpush3.bf16.msra.mxu1 %v8713_v61 }
 0xabe   :  { %7113 = vmatprep.subr.bf16.mxu1 %v8719_v1 }
 0xac1   :  { %7115 = vmatpush3.bf16.msra.mxu1 %v8723_v51 }
 0xac2   :  { %7117 = vmatprep.subr.bf16.mxu1 %v8730_v12 }
 0xac5   :  { %7119 = vmatpush3.bf16.msra.mxu1 %v8735_v18 }
 0xac6   :  { %7121 = vmatprep.subr.bf16.mxu1 %v8737_v19 }
 0xac9   :  { %7123 = vmatpush3.bf16.msra.mxu1 %v8743_v28 }
 0xb7f   :  { %v6740_v55 = vpop.f32.mrb[20].mxu1 }
 0xb80   :  { %v6741_v58 = vpop.f32.mrb[21].mxu1 }
 0xb81   :  { %v6742_v61 = vadd.f32 %v6741_v58, %v6740_v55  ;;  %v7734_v55 = vld [vmem:[%s9214_s17 + $0x20] ss:$8 sps:$4 sm:$0xff]   ;;  %v7691_v58 = vld [vmem:[%s9214_s17 + $0x134] ss:$8 sps:$4 sm:$0xff]  }
 0xb83   :  { %v3122_v1 = vmul.f32 0.03125, %v6742_v61  ;;  %v7739_v61 = vld [vmem:[%s9214_s17 + $0x34] ss:$8 sps:$4 sm:$0xff]  }
 0xb85   :  { %6269 = vmatmul.mubr.msk.f32.vlgmr.msra.gmra.mrb[48].mxu0 %vm170_vm0, %v3122_v1  ;;  %v7689_v1 = vld [vmem:[%s9214_s17 + $0x130] ss:$8 sps:$4 sm:$0xff]  }
 0xb86   :  { %7127 = vmatpush1.bf16.msra.mxu0 %v8756_v53  ;;  %3379 = vmatprep.mubr.f32.mxu0 %v8035_v35 }
 0xb87   :  { %7129 = vmatprep.subr.bf16.mxu0 %v8758_v11 }
 0xb8a   :  { %7131 = vmatpush1.bf16.msra.mxu0 %v8766_v31 }
 0xb8b   :  { %7133 = vmatprep.subr.bf16.mxu0 %v8769_v33 }
 0xb8e   :  { %7135 = vmatpush1.bf16.msra.mxu0 %v8774_v44 }
 0xb8f   :  { %7137 = vmatprep.subr.bf16.mxu0 %v7088_v41  ;;  %v7731_v41 = vld [vmem:[%s9214_s17 + $0x10] ss:$8 sps:$4 sm:$0xff]  }
 0xb92   :  { %7139 = vmatpush1.bf16.msra.mxu0 %v7090_v50  ;;  %v7686_v50 = vld [vmem:[%s9214_s17 + $0x120] ss:$8 sps:$4 sm:$0xff]  }
 0xc58   :  { %v3208_v51 = vpop.f32.mrb[48].mxu0 }
 0xc59   :  { %v3216_v12 = vrot.slane %v3208_v51, %v8262_v3  ;;  %v3210_v18 = vpop.f32.mrb[49].mxu0  ;;  %v7737_v51 = vld [vmem:[%s9214_s17 + $0x30] ss:$8 sps:$4 sm:$0xff]  }
 0xc5a   :  { %v3220_v19 = vrot.slane %v3210_v18, %v8262_v3  ;;  %v7742_v18 = vld [vmem:[%s9214_s17 + $0x44] ss:$8 sps:$4 sm:$0xff]  }
 0xc5b   :  { %v3221_v28 = vsub.f32 %v3005_v0, %v3216_v12  ;;  %v7694_v12 = vld [vmem:[%s9214_s17 + $0x144] ss:$8 sps:$4 sm:$0xff]  }
 0xc5c   :  { %v3222_v29 = vsub.f32 %v3006_v39, %v3220_v19  ;;  %v7692_v19 = vld [vmem:[%s9214_s17 + $0x140] ss:$8 sps:$4 sm:$0xff]  }
 0xc5d   :  { %v3223_v34 = vmul.f32 %v3221_v28, %v3221_v28 }
 0xc5e   :  { %v3224_v37 = vmul.f32 %v3222_v29, %v3222_v29 }
 0xc5f   :  { %v3225_v38 = vrot.slane %v3223_v34, 4 }
 0xc60   :  { %v3231_v40 = vrot.slane %v3224_v37, 4 }
 0xc61   :  { %v3226_v46 = vadd.f32 %v3225_v38, %v3223_v34  ;;  %v7745_v34 = vld [vmem:[%s9214_s17 + $0x54] ss:$8 sps:$4 sm:$0xff]   ;;  %v7743_v38 = vld [vmem:[%s9214_s17 + $0x50] ss:$8 sps:$4 sm:$0xff]  }
 0xc62   :  { %v3232_v53 = vadd.f32 %v3231_v40, %v3224_v37  ;;  %v7695_v37 = vld [vmem:[%s9214_s17 + $0x150] ss:$8 sps:$4 sm:$0xff]   ;;  %v7700_v40 = vld [vmem:[%s9214_s17 + $0x164] ss:$8 sps:$4 sm:$0xff]  }
 0xc63   :  { %v3227_v11 = vrot.slane %v3226_v46, 2 }
 0xc64   :  { %v3233_v14 = vrot.slane %v3232_v53, 2 }
 0xc65   :  { %v3228_v17 = vadd.f32 %v3227_v11, %v3226_v46  ;;  %v7748_v46 = vld [vmem:[%s9214_s17 + $0x64] ss:$8 sps:$4 sm:$0xff]   ;;  %v7746_v11 = vld [vmem:[%s9214_s17 + $0x60] ss:$8 sps:$4 sm:$0xff]  }
 0xc66   :  { %v3234_v20 = vadd.f32 %v3233_v14, %v3232_v53  ;;  %v7698_v53 = vld [vmem:[%s9214_s17 + $0x160] ss:$8 sps:$4 sm:$0xff]   ;;  %v7703_v14 = vld [vmem:[%s9214_s17 + $0x174] ss:$8 sps:$4 sm:$0xff]  }
 0xc67   :  { %v3229_v24 = vrot.slane %v3228_v17, 1 }
 0xc68   :  { %v3235_v31 = vrot.slane %v3234_v20, 1 }
 0xc69   :  { %v3230_v36 = vadd.f32 %v3229_v24, %v3228_v17  ;;  %v7751_v17 = vld [vmem:[%s9214_s17 + $0x74] ss:$8 sps:$4 sm:$0xff]   ;;  %v7749_v24 = vld [vmem:[%s9214_s17 + $0x70] ss:$8 sps:$4 sm:$0xff]  }
 0xc6a   :  { %v3236_v33 = vadd.f32 %v3235_v31, %v3234_v20  ;;  %v7701_v20 = vld [vmem:[%s9214_s17 + $0x170] ss:$8 sps:$4 sm:$0xff]   ;;  %v7706_v31 = vld [vmem:[%s9214_s17 + $0x184] ss:$8 sps:$4 sm:$0xff]  }
 0xc6c   :  { %3301 = vmatprep.mubr.f32.mxu1 %v3236_v33  ;;  %v7754_v33 = vld [vmem:[%s9214_s17 + $0x84] ss:$8 sps:$4 sm:$0xff]  }
 0xc6d   :  { %3302 = vmatmul.mubr.f32.vlgmr.msra.gmra.mrb[22].mxu1 %v3230_v36  ;;  %v7704_v36 = vld [vmem:[%s9214_s17 + $0x180] ss:$8 sps:$4 sm:$0xff]  }
 0xc6e   :  { %3536 = vmatprep.mubr.bf16.mxu1 %v8034_v23 }
 0xd40   :  { %v6775_v43 = vpop.f32.mrb[22].mxu1 }
 0xd41   :  { %v6776_v44 = vpop.f32.mrb[23].mxu1 }
 0xd42   :  { %v6777_v45 = vadd.f32 %v6776_v44, %v6775_v43  ;;  %v7752_v43 = vld [vmem:[%s9214_s17 + $0x80] ss:$8 sps:$4 sm:$0xff]   ;;  %v7709_v44 = vld [vmem:[%s9214_s17 + $0x194] ss:$8 sps:$4 sm:$0xff]  }
 0xd44   :  { %v3307_v48 = vmul.f32 0.03125, %v6777_v45  ;;  %v7757_v45 = vld [vmem:[%s9214_s17 + $0x94] ss:$8 sps:$4 sm:$0xff]  }
 0xd46   :  { %v3309_v63 = vadd.f32 0.8, %v3307_v48  ;;  %v7707_v48 = vld [vmem:[%s9214_s17 + $0x190] ss:$8 sps:$4 sm:$0xff]  }
 0xd48   :  { %7973 = vrsqrt.f32 %v3309_v63  ;;  %v7755_v63 = vld [vmem:[%s9214_s17 + $0x90] ss:$8 sps:$4 sm:$0xff]  }
 0xd52   :  { %v7974_v4 = vpop.eup %7973 }
 0xd53   :  { %v3311_v52 = vmul.f32 %v7974_v4, %v3308_v49  ;;  %v7712_v49 = vld [vmem:[%s9214_s17 + $0x1a4] ss:$8 sps:$4 sm:$0xff]  }
 0xd54   :  { %v7760_v4 = vld [vmem:[%s9214_s17 + $0xa4] ss:$8 sps:$4 sm:$0xff]  }
 0xd55   :  { %6270 = vmatmul.mubr.msk.f32.vlgmr.msra.gmra.mrb[50].mxu0 %vm170_vm0, %v3311_v52  ;;  %vm3417_vm0 = vcmask 1043456   ;;  %v7710_v52 = vld [vmem:[%s9214_s17 + $0x1a0] ss:$8 sps:$4 sm:$0xff]  }
 0xd56   :  { %3456 = vmatprep.mubr.bf16.mxu0 %v8034_v23 }
 0xe28   :  { %v3381_v54 = vpop.f32.mrb[50].mxu0 }
 0xe29   :  { %v3389_v56 = vrot.slane %v3381_v54, %v8262_v3  ;;  %v3383_v59 = vpop.f32.mrb[51].mxu0  ;;  %v7715_v54 = vld [vmem:[%s9214_s17 + $0x1b4] ss:$8 sps:$4 sm:$0xff]  }
 0xe2a   :  { %v3393_v60 = vrot.slane %v3383_v59, %v8262_v3  ;;  %v7761_v59 = vld [vmem:[%s9214_s17 + $0xb0] ss:$8 sps:$4 sm:$0xff]  }
 0xe2b   :  { %v3394_v0 = vmul.f32 %v3389_v56, %v3221_v28  ;;  %v7740_v28 = vld [vmem:[%s9214_s17 + $0x40] ss:$8 sps:$4 sm:$0xff]   ;;  %v7763_v56 = vld [vmem:[%s9214_s17 + $0xb4] ss:$8 sps:$4 sm:$0xff]  }
 0xe2c   :  { %v3395_v6 = vmul.f32 %v3393_v60, %v3222_v29  ;;  %v7697_v29 = vld [vmem:[%s9214_s17 + $0x154] ss:$8 sps:$4 sm:$0xff]   ;;  %v7718_v60 = vld [vmem:[%s9214_s17 + $0x1c4] ss:$8 sps:$4 sm:$0xff]  }
 0xe2d   :  { %v3408_v39 = vadd.f32 %v3401_v57, %v3394_v0  ;;  %v7713_v57 = vld [vmem:[%s9214_s17 + $0x1b0] ss:$8 sps:$4 sm:$0xff]   ;;  %v7716_v0 = vld [vmem:[%s9214_s17 + $0x1c0] ss:$8 sps:$4 sm:$0xff]  }
 0xe2e   :  { %v3409_v7 = vadd.f32 %v3405_v62, %v3395_v6  ;;  %v7766_v62 = vld [vmem:[%s9214_s17 + $0xc4] ss:$8 sps:$4 sm:$0xff]   ;;  %v7764_v6 = vld [vmem:[%s9214_s17 + $0xc0] ss:$8 sps:$4 sm:$0xff]  }
 0xe2f   :  { %v3410_v9 = vpack.c.bf16 %v3408_v39, %v3408_v39  ;;  %v7721_v39 = vld [vmem:[%s9214_s17 + $0x1d4] ss:$8 sps:$4 sm:$0xff]  }
 0xe30   :  { %v8821_v10 = vpack.c.bf16 %v3409_v7, %v3409_v7  ;;  %v7769_v7 = vld [vmem:[%s9214_s17 + $0xd4] ss:$8 sps:$4 sm:$0xff]  }
 0xe31   :  { %v8826_v25 = vsel %vm3417_vm0, %v3410_v9, 0  ;;  %v7719_v9 = vld [vmem:[%s9214_s17 + $0x1d0] ss:$8 sps:$4 sm:$0xff]  }
 0xe32   :  { %6271 = vmatprep.subr.msk.bf16.mxu0 %vm3417_vm0, %v8821_v10  ;;  %6274 = vmatprep.subr.msk.bf16.mxu1 %vm3417_vm0, %v8821_v10 }
 0xe33   :  { %3425 = vmatpush1.bf16.msra.mxu0 %v8826_v25  ;;  %3505 = vmatpush1.bf16.msra.mxu1 %v8826_v25 }
 0xe34   :  { %3740 = vmatprep.subr.bf16.mxu0 %v7682_v13  ;;  %3941 = vmatprep.subr.bf16.mxu1 %v7730_v15  ;;  %v7767_v13 = vld [vmem:[%s9214_s17 + $0xd0] ss:$8 sps:$4 sm:$0xff]   ;;  %v7724_v15 = vld [vmem:[%s9214_s17 + $0x1e4] ss:$8 sps:$4 sm:$0xff]  }
 0xe36   :  { %6272 = vmatmul.mubr.msk.bf16.vlgmr.msra.gmra.mrb[52].mxu0 %vm3413_vm3, %v3412_v16  ;;  %6275 = vmatmul.mubr.msk.bf16.vlgmr.msra.gmra.mrb[24].mxu1 %vm3413_vm3, %v6273_v22  ;;  %v7772_v16 = vld [vmem:[%s9214_s17 + $0xe4] ss:$8 sps:$4 sm:$0xff]   ;;  %v7722_v22 = vld [vmem:[%s9214_s17 + $0x1e0] ss:$8 sps:$4 sm:$0xff]  }
 0xe37   :  { %3741 = vmatpush1.bf16.msra.mxu0 %v7680_v32  ;;  %3942 = vmatpush1.bf16.msra.mxu1 %v7728_v27  ;;  %v7770_v32 = vld [vmem:[%s9214_s17 + $0xe0] ss:$8 sps:$4 sm:$0xff]   ;;  %v7727_v27 = vld [vmem:[%s9214_s17 + $0x1f4] ss:$8 sps:$4 sm:$0xff]  }
 0xe38   :  { %3742 = vmatprep.subr.bf16.mxu0 %v7685_v30  ;;  %3943 = vmatprep.subr.bf16.mxu1 %v7733_v21  ;;  %v7725_v30 = vld [vmem:[%s9214_s17 + $0x1f0] ss:$8 sps:$4 sm:$0xff]   ;;  %v7775_v21 = vld [vmem:[%s9214_s17 + $0xf4] ss:$8 sps:$4 sm:$0xff]  }
 0xe3b   :  { %3743 = vmatpush1.bf16.msra.mxu0 %v7683_v26  ;;  %3944 = vmatpush1.bf16.msra.mxu1 %v7731_v41  ;;  %v7773_v26 = vld [vmem:[%s9214_s17 + $0xf0] ss:$8 sps:$4 sm:$0xff]   ;;  %v7778_v41 = vld [vmem:[%s9214_s17 + $0x204] ss:$8 sps:$4 sm:$0xff]  }
 0xe3c   :  { %3744 = vmatprep.subr.bf16.mxu0 %v7688_v42  ;;  %3945 = vmatprep.subr.bf16.mxu1 %v7736_v47 }
 0xe3f   :  { %3745 = vmatpush1.bf16.msra.mxu0 %v7686_v50  ;;  %3946 = vmatpush1.bf16.msra.mxu1 %v7734_v55 }
 0xe40   :  { %3746 = vmatprep.subr.bf16.mxu0 %v7691_v58  ;;  %3947 = vmatprep.subr.bf16.mxu1 %v7739_v61 }
 0xe43   :  { %3747 = vmatpush1.bf16.msra.mxu0 %v7689_v1  ;;  %3948 = vmatpush1.bf16.msra.mxu1 %v7737_v51 }
 0xe44   :  { %3748 = vmatprep.subr.bf16.mxu0 %v7694_v12  ;;  %3949 = vmatprep.subr.bf16.mxu1 %v7742_v18 }
 0xe47   :  { %3749 = vmatpush1.bf16.msra.mxu0 %v7692_v19  ;;  %3950 = vmatpush1.bf16.msra.mxu1 %v7740_v28  ;;  %v7776_v28 = vld [vmem:[%s9214_s17 + $0x200] ss:$8 sps:$4 sm:$0xff]  }
 0xe48   :  { %3750 = vmatprep.subr.bf16.mxu0 %v7697_v29  ;;  %3951 = vmatprep.subr.bf16.mxu1 %v7745_v34  ;;  %v7781_v29 = vld [vmem:[%s9214_s17 + $0x214] ss:$8 sps:$4 sm:$0xff]   ;;  %v7779_v34 = vld [vmem:[%s9214_s17 + $0x210] ss:$8 sps:$4 sm:$0xff]  }
 0xe4b   :  { %3751 = vmatpush1.bf16.msra.mxu0 %v7695_v37  ;;  %3952 = vmatpush1.bf16.msra.mxu1 %v7743_v38  ;;  %v7784_v37 = vld [vmem:[%s9214_s17 + $0x224] ss:$8 sps:$4 sm:$0xff]  }
 0xe4c   :  { %3752 = vmatprep.subr.bf16.mxu0 %v7700_v40  ;;  %3953 = vmatprep.subr.bf16.mxu1 %v7748_v46  ;;  %v6372_v38 = vld [vmem:[%s9215_s21 + $0x4] sm:$0x3]  ;;  %v7782_v40 = vld [vmem:[%s9214_s17 + $0x220] ss:$8 sps:$4 sm:$0xff]   ;;  %v7787_v46 = vld [vmem:[%s9214_s17 + $0x234] ss:$8 sps:$4 sm:$0xff]  }
 0xe4f   :  { %3753 = vmatpush1.bf16.msra.mxu0 %v7698_v53  ;;  %3954 = vmatpush1.bf16.msra.mxu1 %v7746_v11  ;;  %v7788_v53 = vld [vmem:[%s9214_s17 + $0x240] ss:$8 sps:$4 sm:$0xff]   ;;  %v7793_v11 = vld [vmem:[%s9214_s17 + $0x254] ss:$8 sps:$4 sm:$0xff]  }
 0xe50   :  { %3754 = vmatprep.subr.bf16.mxu0 %v7703_v14  ;;  %3955 = vmatprep.subr.bf16.mxu1 %v7751_v17  ;;  %v7791_v14 = vld [vmem:[%s9214_s17 + $0x250] ss:$8 sps:$4 sm:$0xff]   ;;  %v7796_v17 = vld [vmem:[%s9214_s17 + $0x264] ss:$8 sps:$4 sm:$0xff]  }
 0xe53   :  { %3755 = vmatpush1.bf16.msra.mxu0 %v7701_v20  ;;  %3956 = vmatpush1.bf16.msra.mxu1 %v7749_v24  ;;  %v7794_v20 = vld [vmem:[%s9214_s17 + $0x260] ss:$8 sps:$4 sm:$0xff]   ;;  %v7799_v24 = vld [vmem:[%s9214_s17 + $0x274] ss:$8 sps:$4 sm:$0xff]  }
 0xe54   :  { %3756 = vmatprep.subr.bf16.mxu0 %v7706_v31  ;;  %3957 = vmatprep.subr.bf16.mxu1 %v7754_v33  ;;  %v7797_v31 = vld [vmem:[%s9214_s17 + $0x270] ss:$8 sps:$4 sm:$0xff]   ;;  %v7802_v33 = vld [vmem:[%s9214_s17 + $0x284] ss:$8 sps:$4 sm:$0xff]  }
 0xe57   :  { %3757 = vmatpush1.bf16.msra.mxu0 %v7704_v36  ;;  %3958 = vmatpush1.bf16.msra.mxu1 %v7752_v43  ;;  %v7800_v36 = vld [vmem:[%s9214_s17 + $0x280] ss:$8 sps:$4 sm:$0xff]   ;;  %v7805_v43 = vld [vmem:[%s9214_s17 + $0x294] ss:$8 sps:$4 sm:$0xff]  }
 0xe58   :  { %3758 = vmatprep.subr.bf16.mxu0 %v7709_v44  ;;  %3959 = vmatprep.subr.bf16.mxu1 %v7757_v45  ;;  %v7803_v44 = vld [vmem:[%s9214_s17 + $0x290] ss:$8 sps:$4 sm:$0xff]   ;;  %v7808_v45 = vld [vmem:[%s9214_s17 + $0x2a4] ss:$8 sps:$4 sm:$0xff]  }
 0xe5b   :  { %3759 = vmatpush1.bf16.msra.mxu0 %v7707_v48  ;;  %3960 = vmatpush1.bf16.msra.mxu1 %v7755_v63  ;;  %v7806_v48 = vld [vmem:[%s9214_s17 + $0x2a0] ss:$8 sps:$4 sm:$0xff]   ;;  %v7811_v63 = vld [vmem:[%s9214_s17 + $0x2b4] ss:$8 sps:$4 sm:$0xff]  }
 0xe5c   :  { %3760 = vmatprep.subr.bf16.mxu0 %v7712_v49  ;;  %3961 = vmatprep.subr.bf16.mxu1 %v7760_v4  ;;  %v7809_v49 = vld [vmem:[%s9214_s17 + $0x2b0] ss:$8 sps:$4 sm:$0xff]   ;;  %v7814_v4 = vld [vmem:[%s9214_s17 + $0x2c4] ss:$8 sps:$4 sm:$0xff]  }
 0xe5f   :  { %3761 = vmatpush1.bf16.msra.mxu0 %v7710_v52  ;;  %3962 = vmatpush1.bf16.msra.mxu1 %v7758_v8  ;;  %v7812_v52 = vld [vmem:[%s9214_s17 + $0x2c0] ss:$8 sps:$4 sm:$0xff]   ;;  %v7817_v8 = vld [vmem:[%s9214_s17 + $0x2d4] ss:$8 sps:$4 sm:$0xff]  }
 0xe60   :  { %3762 = vmatprep.subr.bf16.mxu0 %v7715_v54  ;;  %3963 = vmatprep.subr.bf16.mxu1 %v7763_v56  ;;  %v7815_v54 = vld [vmem:[%s9214_s17 + $0x2d0] ss:$8 sps:$4 sm:$0xff]   ;;  %v7818_v56 = vld [vmem:[%s9214_s17 + $0x2e0] ss:$8 sps:$4 sm:$0xff]  }
 0xe63   :  { %3763 = vmatpush1.bf16.msra.mxu0 %v7713_v57  ;;  %3964 = vmatpush1.bf16.msra.mxu1 %v7761_v59  ;;  %v7820_v57 = vld [vmem:[%s9214_s17 + $0x2e4] ss:$8 sps:$4 sm:$0xff]   ;;  %v7823_v59 = vld [vmem:[%s9214_s17 + $0x2f4] ss:$8 sps:$4 sm:$0xff]  }
 0xe64   :  { %3764 = vmatprep.subr.bf16.mxu0 %v7718_v60  ;;  %3965 = vmatprep.subr.bf16.mxu1 %v7766_v62  ;;  %v7821_v60 = vld [vmem:[%s9214_s17 + $0x2f0] ss:$8 sps:$4 sm:$0xff]   ;;  %v4316_v62 = vld [vmem:[%s9216_s25 + $0x80] sm:$0xff] }
 0xe67   :  { %3765 = vmatpush1.bf16.msra.mxu0 %v7716_v0  ;;  %3966 = vmatpush1.bf16.msra.mxu1 %v7764_v6  ;;  %v4317_v0 = vld [vmem:[%s9216_s25 + $0x88] sm:$0xff]  ;;  %v4300_v6 = vld [vmem:[%s9216_s25] sm:$0xff] }
 0xe68   :  { %3766 = vmatprep.subr.bf16.mxu0 %v7721_v39  ;;  %3967 = vmatprep.subr.bf16.mxu1 %v7769_v7  ;;  %v7140_v39 = vpack.c.bf16 %v4317_v0, %v4316_v62  ;;  %v4301_v7 = vld [vmem:[%s9216_s25 + $0x8] sm:$0xff]  ;;  %v4314_v0 = vld [vmem:[%s9216_s25 + $0x70] sm:$0xff] }
 0xe6b   :  { %3767 = vmatpush1.bf16.msra.mxu0 %v7719_v9  ;;  %3968 = vmatpush1.bf16.msra.mxu1 %v7767_v13  ;;  %v4318_v9 = vld [vmem:[%s9216_s25 + $0x90] sm:$0xff]  ;;  %v4319_v13 = vld [vmem:[%s9216_s25 + $0x98] sm:$0xff] }
 0xe6c   :  { %3768 = vmatprep.subr.bf16.mxu0 %v7724_v15  ;;  %3969 = vmatprep.subr.bf16.mxu1 %v7772_v16  ;;  %v7142_v15 = vpack.c.bf16 %v4301_v7, %v4300_v6  ;;  %v7144_v16 = vpack.c.bf16 %v4319_v13, %v4318_v9  ;;  %v4315_v6 = vld [vmem:[%s9216_s25 + $0x78] sm:$0xff]  ;;  %v4405_v7 = vld [vmem:[%s9217_s29 + $0x8] sm:$0xff] }
 0xe6d   :  { %v4407_v9 = vld [vmem:[%s9217_s29 + $0x18] sm:$0xff] }
 0xe6e   :  { %v8976_v13 = vpack.c.bf16 %v4407_v9, %v4405_v7 }
 0xe6f   :  { %3769 = vmatpush1.bf16.msra.mxu0 %v7722_v22  ;;  %3970 = vmatpush1.bf16.msra.mxu1 %v7770_v32  ;;  %v4302_v22 = vld [vmem:[%s9216_s25 + $0x10] sm:$0xff]  ;;  %v4303_v32 = vld [vmem:[%s9216_s25 + $0x18] sm:$0xff] }
 0xe70   :  { %3770 = vmatprep.subr.bf16.mxu0 %v7727_v27  ;;  %3971 = vmatprep.subr.bf16.mxu1 %v7775_v21  ;;  %v4320_v27 = vld [vmem:[%s9216_s25 + $0xa0] sm:$0xff]  ;;  %v7146_v21 = vpack.c.bf16 %v4303_v32, %v4302_v22 }
 0xe73   :  { %3771 = vmatpush1.bf16.msra.mxu0 %v7725_v30  ;;  %3972 = vmatpush1.bf16.msra.mxu1 %v7773_v26  ;;  %v4321_v30 = vld [vmem:[%s9216_s25 + $0xa8] sm:$0xff] }
 0xe74   :  { %6373 = vmatprep.subr.msk.bf16.mxu0 %vm3417_vm0, %v8821_v10  ;;  %4223 = vmatprep.subr.bf16.mxu1 %v7778_v41  ;;  %v7148_v26 = vpack.c.bf16 %v4321_v30, %v4320_v27 }
 0xf09   :  { %v3458_v42 = vpop.f32.mrb[52].mxu0  ;;  %v3538_v47 = vpop.f32.mrb[24].mxu1 }
 0xf0a   :  { %v3465_v50 = vpack.c.bf16 %v3458_v42, %v3458_v42  ;;  %v3460_v55 = vpop.f32.mrb[53].mxu0  ;;  %v3540_v58 = vpop.f32.mrb[25].mxu1  ;;  %v3545_v10 = vpack.c.bf16 %v3538_v47, %v3538_v47 }
 0xf0b   :  { %v3466_v61 = vpack.c.bf16 %v3460_v55, %v3460_v55  ;;  %v3546_v1 = vpack.c.bf16 %v3540_v58, %v3540_v58  ;;  %v3542_v51 = vpop.f32.mrb[26].mxu1  ;;  %v3462_v12 = vpop.f32.mrb[54].mxu0 }
 0xf0c   :  { %v3543_v18 = vpop.f32.mrb[27].mxu1  ;;  %v3463_v19 = vpop.f32.mrb[55].mxu0 }
 0xf0d   :  { %3772 = vmatprep.mubr.bf16.mxu0 %v3546_v1  ;;  %3973 = vmatprep.mubr.bf16.mxu1 %v3466_v61 }
 0xf0e   :  { %3773 = vmatmul.mubr.bf16.vlgmr.msra.gmra.mrb[56].mxu0 %v3545_v10  ;;  %3974 = vmatmul.mubr.bf16.vlgmr.msra.gmra.mrb[28].mxu1 %v3465_v50 }
 0xf0f   :  { %3988 = vmatpush1.bf16.msra.mxu0 %v8826_v25  ;;  %4019 = vmatprep.mubr.bf16.mxu0 %v8034_v23  ;;  %v7785_v25 = vld [vmem:[%s9214_s17 + $0x230] ss:$8 sps:$4 sm:$0xff]   ;;  %v7790_v23 = vld [vmem:[%s9214_s17 + $0x244] ss:$8 sps:$4 sm:$0xff]  }
 0xf10   :  { %4224 = vmatpush1.bf16.msra.mxu1 %v7776_v28  ;;  %7141 = vmatprep.subr.bf16.mxu0 %v7140_v39 }
 0xf11   :  { %4225 = vmatprep.subr.bf16.mxu1 %v7781_v29 }
 0xf14   :  { %4226 = vmatpush1.bf16.msra.mxu1 %v7779_v34 }
 0xf15   :  { %4227 = vmatprep.subr.bf16.mxu1 %v7784_v37  ;;  %v4304_v37 = vld [vmem:[%s9216_s25 + $0x20] sm:$0xff] }
 0xf16   :  { %6374 = vmatmul.mubr.msk.bf16.vlgmr.msra.gmra.mrb[60].mxu0 %vm3413_vm3, %v6372_v38  ;;  %v4305_v38 = vld [vmem:[%s9216_s25 + $0x28] sm:$0xff] }
 0xf17   :  { %7143 = vmatpush3.bf16.msra.mxu0 %v7142_v15 }
 0xf18   :  { %4228 = vmatpush1.bf16.msra.mxu1 %v7782_v40  ;;  %7145 = vmatprep.subr.bf16.mxu0 %v7144_v16  ;;  %v7150_v40 = vpack.c.bf16 %v4305_v38, %v4304_v37 }
 0xf19   :  { %4229 = vmatprep.subr.bf16.mxu1 %v7787_v46  ;;  %v4322_v46 = vld [vmem:[%s9216_s25 + $0xb0] sm:$0xff] }
 0xf1b   :  { %7147 = vmatpush3.bf16.msra.mxu0 %v7146_v21 }
 0xf1c   :  { %4230 = vmatpush1.bf16.msra.mxu1 %v7785_v25  ;;  %7149 = vmatprep.subr.bf16.mxu0 %v7148_v26  ;;  %v4323_v25 = vld [vmem:[%s9216_s25 + $0xb8] sm:$0xff] }
 0xf1d   :  { %4231 = vmatprep.subr.bf16.mxu1 %v7790_v23  ;;  %v7152_v23 = vpack.c.bf16 %v4323_v25, %v4322_v46  ;;  %v4406_v46 = vld [vmem:[%s9217_s29 + $0x10] sm:$0xff] }
 0xf1f   :  { %7151 = vmatpush3.bf16.msra.mxu0 %v7150_v40 }
 0xf20   :  { %4232 = vmatpush1.bf16.msra.mxu1 %v7788_v53  ;;  %v4306_v53 = vld [vmem:[%s9216_s25 + $0x30] sm:$0xff]  ;;  %7153 = vmatprep.subr.bf16.mxu0 %v7152_v23 }
 0xf21   :  { %4233 = vmatprep.subr.bf16.mxu1 %v7793_v11  ;;  %v4307_v11 = vld [vmem:[%s9216_s25 + $0x38] sm:$0xff] }
 0xf24   :  { %4234 = vmatpush1.bf16.msra.mxu1 %v7791_v14  ;;  %v7154_v14 = vpack.c.bf16 %v4307_v11, %v4306_v53  ;;  %v4411_v53 = vld [vmem:[%s9217_s29 + $0x38] sm:$0xff] }
 0xf25   :  { %4235 = vmatprep.subr.bf16.mxu1 %v7796_v17  ;;  %v4324_v17 = vld [vmem:[%s9216_s25 + $0xc0] sm:$0xff] }
 0xf26   :  { %7155 = vmatpush3.bf16.msra.mxu0 %v7154_v14 }
 0xf28   :  { %4236 = vmatpush1.bf16.msra.mxu1 %v7794_v20  ;;  %v4325_v20 = vld [vmem:[%s9216_s25 + $0xc8] sm:$0xff] }
 0xf29   :  { %4237 = vmatprep.subr.bf16.mxu1 %v7799_v24  ;;  %v7156_v24 = vpack.c.bf16 %v4325_v20, %v4324_v17 }
 0xf2b   :  { %7157 = vmatprep.subr.bf16.mxu0 %v7156_v24 }
 0xf2c   :  { %4238 = vmatpush1.bf16.msra.mxu1 %v7797_v31  ;;  %v4308_v31 = vld [vmem:[%s9216_s25 + $0x40] sm:$0xff] }
 0xf2d   :  { %4239 = vmatprep.subr.bf16.mxu1 %v7802_v33  ;;  %v4309_v33 = vld [vmem:[%s9216_s25 + $0x48] sm:$0xff] }
 0xf30   :  { %4240 = vmatpush1.bf16.msra.mxu1 %v7800_v36  ;;  %v7158_v36 = vpack.c.bf16 %v4309_v33, %v4308_v31  ;;  %v4410_v31 = vld [vmem:[%s9217_s29 + $0x30] sm:$0xff]  ;;  %v4413_v33 = vld [vmem:[%s9217_s29 + $0x48] sm:$0xff] }
 0xf31   :  { %4241 = vmatprep.subr.bf16.mxu1 %v7805_v43  ;;  %v4326_v43 = vld [vmem:[%s9216_s25 + $0xd0] sm:$0xff] }
 0xf32   :  { %7159 = vmatpush3.bf16.msra.mxu0 %v7158_v36 }
 0xf34   :  { %4242 = vmatpush1.bf16.msra.mxu1 %v7803_v44  ;;  %v4327_v44 = vld [vmem:[%s9216_s25 + $0xd8] sm:$0xff] }
 0xf35   :  { %4243 = vmatprep.subr.bf16.mxu1 %v7808_v45  ;;  %v7160_v45 = vpack.c.bf16 %v4327_v44, %v4326_v43 }
 0xf37   :  { %7161 = vmatprep.subr.bf16.mxu0 %v7160_v45 }
 0xf38   :  { %4244 = vmatpush1.bf16.msra.mxu1 %v7806_v48  ;;  %v4310_v48 = vld [vmem:[%s9216_s25 + $0x50] sm:$0xff] }
 0xf39   :  { %4245 = vmatprep.subr.bf16.mxu1 %v7811_v63  ;;  %v4311_v63 = vld [vmem:[%s9216_s25 + $0x58] sm:$0xff] }
 0xf3c   :  { %4246 = vmatpush1.bf16.msra.mxu1 %v7809_v49  ;;  %v7162_v49 = vpack.c.bf16 %v4311_v63, %v4310_v48  ;;  %v4414_v48 = vld [vmem:[%s9217_s29 + $0x50] sm:$0xff]  ;;  %v4417_v63 = vld [vmem:[%s9217_s29 + $0x68] sm:$0xff] }
 0xf3d   :  { %4247 = vmatprep.subr.bf16.mxu1 %v7814_v4  ;;  %v4328_v4 = vld [vmem:[%s9216_s25 + $0xe0] sm:$0xff] }
 0xf3e   :  { %7163 = vmatpush3.bf16.msra.mxu0 %v7162_v49 }
 0xf40   :  { %4248 = vmatpush1.bf16.msra.mxu1 %v7812_v52  ;;  %v4329_v52 = vld [vmem:[%s9216_s25 + $0xe8] sm:$0xff] }
 0xf41   :  { %4249 = vmatprep.subr.bf16.mxu1 %v7817_v8  ;;  %v4312_v8 = vld [vmem:[%s9216_s25 + $0x60] sm:$0xff] }
 0xf44   :  { %4250 = vmatpush1.bf16.msra.mxu1 %v7815_v54  ;;  %v7164_v54 = vpack.c.bf16 %v4329_v52, %v4328_v4 }
 0xf45   :  { %4251 = vmatprep.subr.bf16.mxu1 %v7820_v57  ;;  %v4330_v57 = vld [vmem:[%s9216_s25 + $0xf0] sm:$0xff] }
 0xf46   :  { %7165 = vmatprep.subr.bf16.mxu0 %v7164_v54 }
 0xf48   :  { %4252 = vmatpush1.bf16.msra.mxu1 %v7818_v56  ;;  %v4313_v56 = vld [vmem:[%s9216_s25 + $0x68] sm:$0xff] }
 0xf49   :  { %4253 = vmatprep.subr.bf16.mxu1 %v7823_v59  ;;  %v4331_v59 = vld [vmem:[%s9216_s25 + $0xf8] sm:$0xff] }
 0xf4a   :  { %v7168_v62 = vpack.c.bf16 %v4331_v59, %v4330_v57  ;;  %v4423_v57 = vld [vmem:[%s9217_s29 + $0x98] sm:$0xff] }
 0xf4c   :  { %4254 = vmatpush1.bf16.msra.mxu1 %v7821_v60  ;;  %v7166_v60 = vpack.c.bf16 %v4313_v56, %v4312_v8  ;;  %v4416_v8 = vld [vmem:[%s9217_s29 + $0x60] sm:$0xff]  ;;  %v4421_v56 = vld [vmem:[%s9217_s29 + $0x88] sm:$0xff] }
 0xf4d   :  { %7205 = vmatprep.subr.bf16.mxu1 %v7140_v39  ;;  %v7170_v39 = vpack.c.bf16 %v4315_v6, %v4314_v0  ;;  %v4422_v0 = vld [vmem:[%s9217_s29 + $0x90] sm:$0xff]  ;;  %v4425_v6 = vld [vmem:[%s9217_s29 + $0xa8] sm:$0xff] }
 0xf4e   :  { %7167 = vmatpush3.bf16.msra.mxu0 %v7166_v60 }
 0xf4f   :  { %7169 = vmatprep.subr.bf16.mxu0 %v7168_v62 }
 0xf52   :  { %7171 = vmatpush3.bf16.msra.mxu0 %v7170_v39 }
 0xf53   :  { %7173 = vmatprep.subr.bf16.mxu0 %v8976_v13 }
 0xfe1   :  { %v3774_v41 = vpop.f32.mrb[56].mxu0  ;;  %v3975_v42 = vpop.f32.mrb[28].mxu1 }
 0xfe2   :  { %v8948_v47 = vadd.f32 %v3975_v42, %v3774_v41  ;;  %v3776_v50 = vpop.f32.mrb[57].mxu0  ;;  %v3977_v55 = vpop.f32.mrb[29].mxu1 }
 0xfe3   :  { %v8950_v58 = vadd.f32 %v3977_v55, %v3776_v50  ;;  %v3778_v61 = vpop.f32.mrb[58].mxu0  ;;  %v3979_v1 = vpop.f32.mrb[30].mxu1 }
 0xfe4   :  { %v3779_v51 = vpop.f32.mrb[59].mxu0  ;;  %v3980_v12 = vpop.f32.mrb[31].mxu1 }
 0xfe9   :  { %v4021_v10 = vpop.f32.mrb[60].mxu0 }
 0xfea   :  { %v4023_v18 = vpop.f32.mrb[61].mxu0  ;;  %v4028_v29 = vpack.c.bf16 %v4021_v10, %v4021_v10 }
 0xfeb   :  { %v4029_v19 = vpack.c.bf16 %v4023_v18, %v4023_v18  ;;  %v4025_v28 = vpop.f32.mrb[62].mxu0 }
 0xfec   :  { %v4026_v34 = vpop.f32.mrb[63].mxu0 }
 0xfed   :  { %4255 = vmatprep.mubr.bf16.mxu1 %v4029_v19 }
 0xfee   :  { %4256 = vmatmul.mubr.bf16.vlgmr.msra.gmra.mrb[32].mxu1 %v4028_v29 }
 0xfef   :  { %7207 = vmatpush3.bf16.msra.mxu1 %v7142_v15  ;;  %v4266_v15 = vld [vmem:[%s9218_s3] sm:$0x3] }
 0xff0   :  { %7209 = vmatprep.subr.bf16.mxu1 %v7144_v16  ;;  %v4271_v16 = vrot.slane %v4266_v15, %v8262_v3  ;;  %v4275_v32 = vrot.slane %v4266_v15, %v8266_v5  ;;  %v4424_v15 = vld [vmem:[%s9217_s29 + $0xa0] sm:$0xff] }
 0xff3   :  { %7211 = vmatpush3.bf16.msra.mxu1 %v7146_v21 }
 0xff4   :  { %7213 = vmatprep.subr.bf16.mxu1 %v7148_v26 }
 0xff7   :  { %7215 = vmatpush3.bf16.msra.mxu1 %v7150_v40  ;;  %v4404_v40 = vld [vmem:[%s9217_s29] sm:$0xff] }
 0xff8   :  { %7217 = vmatprep.subr.bf16.mxu1 %v7152_v23  ;;  %v4409_v23 = vld [vmem:[%s9217_s29 + $0x28] sm:$0xff] }
 0xff9   :  { %v8998_v20 = vpack.c.bf16 %v4411_v53, %v4409_v23 }
 0xffb   :  { %7219 = vmatpush3.bf16.msra.mxu1 %v7154_v14  ;;  %v8996_v14 = vpack.c.bf16 %v4406_v46, %v4404_v40 }
 0xffc   :  { %7221 = vmatprep.subr.bf16.mxu1 %v7156_v24  ;;  %v4408_v24 = vld [vmem:[%s9217_s29 + $0x20] sm:$0xff] }
 0xffd   :  { %v7178_v43 = vpack.c.bf16 %v4410_v31, %v4408_v24 }
 0xfff   :  { %7223 = vmatpush3.bf16.msra.mxu1 %v7158_v36  ;;  %v4415_v36 = vld [vmem:[%s9217_s29 + $0x58] sm:$0xff] }
0x1000   :  { %7225 = vmatprep.subr.bf16.mxu1 %v7160_v45  ;;  %v7180_v44 = vpack.c.bf16 %v4415_v36, %v4413_v33  ;;  %v4412_v45 = vld [vmem:[%s9217_s29 + $0x40] sm:$0xff] }
0x1001   :  { %v7182_v4 = vpack.c.bf16 %v4414_v48, %v4412_v45  ;;  %v7826_v45 = vld [vmem:[%s9219_s8 + $0x184] ss:$12 sps:$4 sm:$0xff]   ;;  %v7829_v48 = vld [vmem:[%s9219_s8 + $0x19c] ss:$12 sps:$4 sm:$0xff]  }
0x1003   :  { %7227 = vmatpush3.bf16.msra.mxu1 %v7162_v49  ;;  %v4419_v49 = vld [vmem:[%s9217_s29 + $0x78] sm:$0xff] }
0x1004   :  { %7229 = vmatprep.subr.bf16.mxu1 %v7164_v54  ;;  %v7184_v52 = vpack.c.bf16 %v4419_v49, %v4417_v63  ;;  %v4418_v54 = vld [vmem:[%s9217_s29 + $0x70] sm:$0xff]  ;;  %v7827_v63 = vld [vmem:[%s9219_s8 + $0x198] ss:$12 sps:$4 sm:$0xff]  }
0x1005   :  { %v7186_v59 = vpack.c.bf16 %v4418_v54, %v4416_v8  ;;  %v7832_v49 = vld [vmem:[%s9219_s8 + $0x1b4] ss:$12 sps:$4 sm:$0xff]   ;;  %v7835_v8 = vld [vmem:[%s9219_s8 + $0x1cc] ss:$12 sps:$4 sm:$0xff]  }
0x1006   :  { %v7833_v54 = vld [vmem:[%s9219_s8 + $0x1c8] ss:$12 sps:$4 sm:$0xff]  }
0x1007   :  { %7231 = vmatpush3.bf16.msra.mxu1 %v7166_v60  ;;  %v7188_v60 = vpack.c.bf16 %v4423_v57, %v4421_v56  ;;  %v7838_v56 = vld [vmem:[%s9219_s8 + $0x1e4] ss:$12 sps:$4 sm:$0xff]   ;;  %v7836_v57 = vld [vmem:[%s9219_s8 + $0x1e0] ss:$12 sps:$4 sm:$0xff]  }
0x1008   :  { %7233 = vmatprep.subr.bf16.mxu1 %v7168_v62  ;;  %v4420_v62 = vld [vmem:[%s9217_s29 + $0x80] sm:$0xff] }
0x1009   :  { %v7190_v7 = vpack.c.bf16 %v4422_v0, %v4420_v62  ;;  %v7844_v62 = vld [vmem:[%s9219_s8 + $0x214] ss:$12 sps:$4 sm:$0xff]   ;;  %v7842_v0 = vld [vmem:[%s9219_s8 + $0x210] ss:$12 sps:$4 sm:$0xff]  }
0x100b   :  { %7235 = vmatpush3.bf16.msra.mxu1 %v7170_v39  ;;  %v4427_v39 = vld [vmem:[%s9217_s29 + $0xb8] sm:$0xff] }
0x100c   :  { %v7192_v9 = vpack.c.bf16 %v4427_v39, %v4425_v6  ;;  %5096 = vmatprep.subr.bf16.mxu1 %v7826_v45  ;;  %v7847_v6 = vld [vmem:[%s9219_s8 + $0x22c] ss:$12 sps:$4 sm:$0xff]   ;;  %v7845_v39 = vld [vmem:[%s9219_s8 + $0x228] ss:$12 sps:$4 sm:$0xff]  }
0x10c1   :  { %v4257_v22 = vpop.f32.mrb[32].mxu1 }
0x10c2   :  { %v4264_v27 = vadd.f32 %v4257_v22, %v8948_v47  ;;  %v4259_v30 = vpop.f32.mrb[33].mxu1  ;;  %v4429_v22 = vld [vmem:[%s9217_s29 + $0xc8] sm:$0xff] }
0x10c3   :  { %v4265_v21 = vadd.f32 %v4259_v30, %v8950_v58  ;;  %v4261_v26 = vpop.f32.mrb[34].mxu1 }
0x10c4   :  { %v4278_v41 = vadd.f32 %v4271_v16, %v4264_v27  ;;  %v4262_v42 = vpop.f32.mrb[35].mxu1  ;;  %v4426_v16 = vld [vmem:[%s9217_s29 + $0xb0] sm:$0xff] }
0x10c5   :  { %v4279_v50 = vadd.f32 %v4275_v32, %v4265_v21  ;;  %v4431_v32 = vld [vmem:[%s9217_s29 + $0xd8] sm:$0xff]  ;;  %v7194_v27 = vpack.c.bf16 %v4426_v16, %v4424_v15  ;;  %v4428_v21 = vld [vmem:[%s9217_s29 + $0xc0] sm:$0xff]  ;;  %v4430_v26 = vld [vmem:[%s9217_s29 + $0xd0] sm:$0xff] }
0x10c6   :  { %vm4280_vm4 = vcmp.ge.f32.partialorder %v4278_v41, 0.0  ;;  %v4282_v55 = vmul.f32 0.2, %v4278_v41  ;;  %v7196_v30 = vpack.c.bf16 %v4431_v32, %v4429_v22  ;;  %v4433_v42 = vld [vmem:[%s9217_s29 + $0xe8] sm:$0xff]  ;;  %v7853_v16 = vld [vmem:[%s9219_s8 + $0x258] ss:$12 sps:$4 sm:$0xff]  }
0x10c7   :  { %vm4281_vm5 = vcmp.ge.f32.partialorder %v4279_v50, 0.0  ;;  %v4283_v61 = vmul.f32 0.2, %v4279_v50  ;;  %v7855_v15 = vld [vmem:[%s9219_s8 + $0x25c] ss:$12 sps:$4 sm:$0xff]  }
0x10c8   :  { %v8984_v1 = vsel %vm4280_vm4, %v4278_v41, %v4282_v55  ;;  %v7198_v41 = vpack.c.bf16 %v4430_v26, %v4428_v21  ;;  %v7860_v22 = vld [vmem:[%s9219_s8 + $0x274] ss:$12 sps:$4 sm:$0xff]   ;;  %v7858_v32 = vld [vmem:[%s9219_s8 + $0x270] ss:$12 sps:$4 sm:$0xff]  }
0x10c9   :  { %v4286_v51 = vsel %vm3417_vm0, %v8984_v1, 0.0  ;;  %v8988_v47 = vsel %vm4281_vm5, %v4279_v50, %v4283_v61  ;;  %v4435_v50 = vld [vmem:[%s9217_s29 + $0xf8] sm:$0xff]  ;;  %v4432_v61 = vld [vmem:[%s9217_s29 + $0xe0] sm:$0xff] }
0x10ca   :  { %v4287_v58 = vrot.slane %v4286_v51, 4  ;;  %v4293_v12 = vsel %vm3417_vm0, %v8988_v47, 0.0  ;;  %v7200_v55 = vpack.c.bf16 %v4435_v50, %v4433_v42  ;;  %v7870_v21 = vld [vmem:[%s9219_s8 + $0x2a4] ss:$12 sps:$4 sm:$0xff]   ;;  %v7868_v26 = vld [vmem:[%s9219_s8 + $0x2a0] ss:$12 sps:$4 sm:$0xff]  }
0x10cb   :  { %v4294_v10 = vrot.slane %v4293_v12, 4 }
0x10cc   :  { %v4288_v18 = vadd.f32 %v4287_v58, %v4286_v51  ;;  %v4434_v51 = vld [vmem:[%s9217_s29 + $0xf0] sm:$0xff] }
0x10cd   :  { %v4295_v19 = vadd.f32 %v4294_v10, %v4293_v12  ;;  %v7202_v58 = vpack.c.bf16 %v4434_v51, %v4432_v61  ;;  %v4604_v51 = vld [vmem:[%s9220_s14] sm:$0x1] }
0x10ce   :  { %v4289_v28 = vrot.slane %v4288_v18, 2 }
0x10cf   :  { %v4296_v29 = vrot.slane %v4295_v19, 2 }
0x10d0   :  { %v4290_v34 = vadd.f32 %v4289_v28, %v4288_v18 }
0x10d1   :  { %v4297_v37 = vadd.f32 %v4296_v29, %v4295_v19 }
0x10d2   :  { %v4291_v38 = vrot.slane %v4290_v34, 1 }
0x10d3   :  { %v4298_v25 = vrot.slane %v4297_v37, 1 }
0x10d4   :  { %v4292_v17 = vadd.f32 %v4291_v38, %v4290_v34 }
0x10d5   :  { %v4299_v11 = vadd.f32 %v4298_v25, %v4297_v37 }
0x10d7   :  { %4396 = vmatprep.mubr.f32.mxu0 %v4299_v11 }
0x10d8   :  { %4397 = vmatmul.mubr.f32.vlgmr.msra.gmra.mrb[64].mxu0 %v4292_v17 }
0x10d9   :  { %7175 = vmatpush1.bf16.msra.mxu0 %v8996_v14  ;;  %4500 = vmatprep.mubr.f32.mxu0 %v8035_v35 }
0x10da   :  { %7177 = vmatprep.subr.bf16.mxu0 %v8998_v20 }
0x10dd   :  { %7179 = vmatpush1.bf16.msra.mxu0 %v7178_v43 }
0x10de   :  { %7181 = vmatprep.subr.bf16.mxu0 %v7180_v44 }
0x10e1   :  { %7183 = vmatpush1.bf16.msra.mxu0 %v7182_v4 }
0x10e2   :  { %7185 = vmatprep.subr.bf16.mxu0 %v7184_v52 }
0x10e5   :  { %7187 = vmatpush1.bf16.msra.mxu0 %v7186_v59 }
0x10e6   :  { %7189 = vmatprep.subr.bf16.mxu0 %v7188_v60 }
0x10e9   :  { %7191 = vmatpush1.bf16.msra.mxu0 %v7190_v7 }
0x10ea   :  { %7193 = vmatprep.subr.bf16.mxu0 %v7192_v9 }
0x10ed   :  { %7195 = vmatpush1.bf16.msra.mxu0 %v7194_v27 }
0x10ee   :  { %7197 = vmatprep.subr.bf16.mxu0 %v7196_v30 }
0x10f1   :  { %7199 = vmatpush1.bf16.msra.mxu0 %v7198_v41 }
0x10f2   :  { %7201 = vmatprep.subr.bf16.mxu0 %v7200_v55 }
0x10f5   :  { %7203 = vmatpush1.bf16.msra.mxu0 %v7202_v58 }
0x10f6   :  { %7237 = vmatprep.subr.bf16.mxu0 %v8976_v13 }
0x11ab   :  { %v6810_v12 = vpop.f32.mrb[64].mxu0 }
0x11ac   :  { %v6811_v10 = vpop.f32.mrb[65].mxu0 }
0x11ad   :  { %v6812_v18 = vadd.f32 %v6811_v10, %v6810_v12  ;;  %v7852_v12 = vld [vmem:[%s9219_s8 + $0x188] ss:$12 sps:$4 sm:$0xff]  }
0x11af   :  { %v4403_v19 = vmul.f32 0.125, %v6812_v18  ;;  %v7856_v18 = vld [vmem:[%s9219_s8 + $0x260] ss:$12 sps:$4 sm:$0xff]  }
0x11b1   :  { %4501 = vmatmul.mubr.f32.vlgmr.msra.gmra.mrb[66].mxu0 %v4403_v19  ;;  %v7857_v19 = vld [vmem:[%s9219_s8 + $0x1a0] ss:$12 sps:$4 sm:$0xff]  }
0x11b2   :  { %7239 = vmatpush1.bf16.msra.mxu0 %v8996_v14  ;;  %4672 = vmatprep.mubr.f32.mxu0 %v8035_v35 }
0x11b3   :  { %7241 = vmatprep.subr.bf16.mxu0 %v8998_v20 }
0x11b6   :  { %7243 = vmatpush1.bf16.msra.mxu0 %v7178_v43 }
0x11b7   :  { %7245 = vmatprep.subr.bf16.mxu0 %v7180_v44  ;;  %v7824_v44 = vld [vmem:[%s9219_s8 + $0x180] ss:$12 sps:$4 sm:$0xff]  }
0x11ba   :  { %7247 = vmatpush1.bf16.msra.mxu0 %v7182_v4  ;;  %v7851_v4 = vld [vmem:[%s9219_s8 + $0x248] ss:$12 sps:$4 sm:$0xff]  }
0x11bb   :  { %7249 = vmatprep.subr.bf16.mxu0 %v7184_v52  ;;  %v7830_v52 = vld [vmem:[%s9219_s8 + $0x1b0] ss:$12 sps:$4 sm:$0xff]  }
0x11be   :  { %7251 = vmatpush1.bf16.msra.mxu0 %v7186_v59  ;;  %v7841_v59 = vld [vmem:[%s9219_s8 + $0x1fc] ss:$12 sps:$4 sm:$0xff]  }
0x11bf   :  { %7253 = vmatprep.subr.bf16.mxu0 %v7188_v60  ;;  %v7839_v60 = vld [vmem:[%s9219_s8 + $0x1f8] ss:$12 sps:$4 sm:$0xff]  }
0x11c2   :  { %7255 = vmatpush1.bf16.msra.mxu0 %v7190_v7  ;;  %v7850_v7 = vld [vmem:[%s9219_s8 + $0x244] ss:$12 sps:$4 sm:$0xff]  }
0x11c3   :  { %7257 = vmatprep.subr.bf16.mxu0 %v7192_v9  ;;  %v7848_v9 = vld [vmem:[%s9219_s8 + $0x240] ss:$12 sps:$4 sm:$0xff]  }
0x11c6   :  { %7259 = vmatpush1.bf16.msra.mxu0 %v7194_v27  ;;  %v7865_v27 = vld [vmem:[%s9219_s8 + $0x28c] ss:$12 sps:$4 sm:$0xff]  }
0x11c7   :  { %7261 = vmatprep.subr.bf16.mxu0 %v7196_v30  ;;  %v7863_v30 = vld [vmem:[%s9219_s8 + $0x288] ss:$12 sps:$4 sm:$0xff]  }
0x11ca   :  { %7263 = vmatpush1.bf16.msra.mxu0 %v7198_v41 }
0x11cb   :  { %7265 = vmatprep.subr.bf16.mxu0 %v7200_v55 }
0x11ce   :  { %7267 = vmatpush1.bf16.msra.mxu0 %v7202_v58 }
0x11cf   :  { %6848 = vmatprep.subr.bf16.mxu0 %v7851_v4 }
0x1284   :  { %v4502_v13 = vpop.f32.mrb[66].mxu0 }
0x1285   :  { %v4510_v28 = vrot.slane %v4502_v13, %v8262_v3  ;;  %v4504_v29 = vpop.f32.mrb[67].mxu0  ;;  %v7861_v13 = vld [vmem:[%s9219_s8 + $0x278] ss:$12 sps:$4 sm:$0xff]  }
0x1286   :  { %v4514_v34 = vrot.slane %v4504_v29, %v8262_v3  ;;  %v7866_v29 = vld [vmem:[%s9219_s8 + $0x290] ss:$12 sps:$4 sm:$0xff]  }
0x1287   :  { %v9036_v37 = vsub.f32 %v8984_v1, %v4510_v28  ;;  %v7862_v28 = vld [vmem:[%s9219_s8 + $0x1b8] ss:$12 sps:$4 sm:$0xff]  }
0x1288   :  { %v9039_v38 = vsub.f32 %v8988_v47, %v4514_v34  ;;  %v7867_v34 = vld [vmem:[%s9219_s8 + $0x1d0] ss:$12 sps:$4 sm:$0xff]  }
0x1289   :  { %v4517_v40 = vmul.f32 %v9036_v37, %v9036_v37 }
0x128a   :  { %v4518_v46 = vmul.f32 %v9039_v38, %v9039_v38 }
0x128b   :  { %v4519_v25 = vsel %vm3417_vm0, %v4517_v40, 0.0  ;;  %v7871_v40 = vld [vmem:[%s9219_s8 + $0x2a8] ss:$12 sps:$4 sm:$0xff]  }
0x128c   :  { %v4520_v23 = vrot.slane %v4519_v25, 4  ;;  %v4526_v53 = vsel %vm3417_vm0, %v4518_v46, 0.0  ;;  %v7872_v46 = vld [vmem:[%s9219_s8 + $0x1e8] ss:$12 sps:$4 sm:$0xff]  }
0x128d   :  { %v4527_v11 = vrot.slane %v4526_v53, 4 }
0x128e   :  { %v4521_v1 = vadd.f32 %v4520_v23, %v4519_v25  ;;  %v7875_v25 = vld [vmem:[%s9219_s8 + $0x2bc] ss:$12 sps:$4 sm:$0xff]   ;;  %v7876_v23 = vld [vmem:[%s9219_s8 + $0x2c0] ss:$12 sps:$4 sm:$0xff]  }
0x128f   :  { %v4528_v14 = vadd.f32 %v4527_v11, %v4526_v53  ;;  %v7873_v53 = vld [vmem:[%s9219_s8 + $0x2b8] ss:$12 sps:$4 sm:$0xff]   ;;  %v7877_v11 = vld [vmem:[%s9219_s8 + $0x200] ss:$12 sps:$4 sm:$0xff]  }
0x1290   :  { %v4522_v47 = vrot.slane %v4521_v1, 2 }
0x1291   :  { %v4529_v17 = vrot.slane %v4528_v14, 2 }
0x1292   :  { %v4523_v20 = vadd.f32 %v4522_v47, %v4521_v1  ;;  %v7880_v1 = vld [vmem:[%s9219_s8 + $0x2d4] ss:$12 sps:$4 sm:$0xff]   ;;  %v7878_v47 = vld [vmem:[%s9219_s8 + $0x2d0] ss:$12 sps:$4 sm:$0xff]  }
0x1293   :  { %v4530_v24 = vadd.f32 %v4529_v17, %v4528_v14  ;;  %v7881_v14 = vld [vmem:[%s9219_s8 + $0x2d8] ss:$12 sps:$4 sm:$0xff]  }
0x1294   :  { %v4524_v31 = vrot.slane %v4523_v20, 1  ;;  %v7882_v17 = vld [vmem:[%s9219_s8 + $0x218] ss:$12 sps:$4 sm:$0xff]  }
0x1295   :  { %v4531_v33 = vrot.slane %v4530_v24, 1 }
0x1296   :  { %v4525_v43 = vadd.f32 %v4524_v31, %v4523_v20  ;;  %v7885_v20 = vld [vmem:[%s9219_s8 + $0x2ec] ss:$12 sps:$4 sm:$0xff]   ;;  %v7883_v31 = vld [vmem:[%s9219_s8 + $0x2e8] ss:$12 sps:$4 sm:$0xff]  }
0x1297   :  { %v4532_v36 = vadd.f32 %v4531_v33, %v4530_v24  ;;  %v7886_v24 = vld [vmem:[%s9219_s8 + $0x2f0] ss:$12 sps:$4 sm:$0xff]  }
0x1298   :  { %v7887_v33 = vld [vmem:[%s9219_s8 + $0x230] ss:$12 sps:$4 sm:$0xff]  }
0x1299   :  { %4597 = vmatprep.mubr.f32.mxu1 %v4532_v36  ;;  %v7890_v36 = vld [vmem:[%s9219_s8 + $0x4] ss:$12 sps:$4 sm:$0xff]  }
0x129a   :  { %4598 = vmatmul.mubr.f32.vlgmr.msra.gmra.mrb[36].mxu1 %v4525_v43  ;;  %v7891_v43 = vld [vmem:[%s9219_s8 + $0xc8] ss:$12 sps:$4 sm:$0xff]  }
0x129b   :  { %5097 = vmatpush1.bf16.msra.mxu1 %v7824_v44  ;;  %v4689_v44 = vld [vmem:[%s9221_s19] sm:$0x3] }
0x129c   :  { %5098 = vmatprep.subr.bf16.mxu1 %v7829_v48 }
0x129f   :  { %5099 = vmatpush1.bf16.msra.mxu1 %v7827_v63  ;;  %v4694_v63 = vrot.slane %v4689_v44, %v8262_v3 }
0x12a0   :  { %5100 = vmatprep.subr.bf16.mxu1 %v7832_v49 }
0x12a3   :  { %5101 = vmatpush1.bf16.msra.mxu1 %v7830_v52  ;;  %v4698_v52 = vrot.slane %v4689_v44, %v8266_v5  ;;  %v7949_v44 = vld [vmem:[%s9219_s8 + $0x168] ss:$12 sps:$4 sm:$0xff]  }
0x12a4   :  { %5102 = vmatprep.subr.bf16.mxu1 %v7835_v8 }
0x12a7   :  { %5103 = vmatpush1.bf16.msra.mxu1 %v7833_v54 }
0x12a8   :  { %5104 = vmatprep.subr.bf16.mxu1 %v7838_v56 }
0x12ab   :  { %5105 = vmatpush1.bf16.msra.mxu1 %v7836_v57 }
0x12ac   :  { %5106 = vmatprep.subr.bf16.mxu1 %v7841_v59 }
0x12af   :  { %5107 = vmatpush1.bf16.msra.mxu1 %v7839_v60 }
0x12b0   :  { %5108 = vmatprep.subr.bf16.mxu1 %v7844_v62 }
0x12b3   :  { %5109 = vmatpush1.bf16.msra.mxu1 %v7842_v0  ;;  %v7888_v0 = vld [vmem:[%s9219_s8] ss:$12 sps:$4 sm:$0xff]  }
0x12b4   :  { %5110 = vmatprep.subr.bf16.mxu1 %v7847_v6  ;;  %v7892_v6 = vld [vmem:[%s9219_s8 + $0x8] ss:$12 sps:$4 sm:$0xff]  }
0x12b7   :  { %5111 = vmatpush1.bf16.msra.mxu1 %v7845_v39 }
0x12b8   :  { %5112 = vmatprep.subr.bf16.mxu1 %v7850_v7  ;;  %v7895_v7 = vld [vmem:[%s9219_s8 + $0x1c] ss:$12 sps:$4 sm:$0xff]  }
0x12bb   :  { %5113 = vmatpush1.bf16.msra.mxu1 %v7848_v9  ;;  %v7897_v9 = vld [vmem:[%s9219_s8 + $0x20] ss:$12 sps:$4 sm:$0xff]  }
0x12bc   :  { %5114 = vmatprep.subr.bf16.mxu1 %v7855_v15  ;;  %v7900_v15 = vld [vmem:[%s9219_s8 + $0x34] ss:$12 sps:$4 sm:$0xff]  }
0x12bf   :  { %5115 = vmatpush1.bf16.msra.mxu1 %v7853_v16  ;;  %v7901_v16 = vld [vmem:[%s9219_s8 + $0xf8] ss:$12 sps:$4 sm:$0xff]  }
0x12c0   :  { %5116 = vmatprep.subr.bf16.mxu1 %v7860_v22  ;;  %v7898_v22 = vld [vmem:[%s9219_s8 + $0x30] ss:$12 sps:$4 sm:$0xff]  }
0x12c3   :  { %5117 = vmatpush1.bf16.msra.mxu1 %v7858_v32  ;;  %v7902_v32 = vld [vmem:[%s9219_s8 + $0x38] ss:$12 sps:$4 sm:$0xff]  }
0x12c4   :  { %5118 = vmatprep.subr.bf16.mxu1 %v7865_v27  ;;  %v7905_v27 = vld [vmem:[%s9219_s8 + $0x4c] ss:$12 sps:$4 sm:$0xff]  }
0x12c7   :  { %5119 = vmatpush1.bf16.msra.mxu1 %v7863_v30  ;;  %v7906_v30 = vld [vmem:[%s9219_s8 + $0x110] ss:$12 sps:$4 sm:$0xff]  }
0x12c8   :  { %5120 = vmatprep.subr.bf16.mxu1 %v7870_v21  ;;  %v7903_v21 = vld [vmem:[%s9219_s8 + $0x48] ss:$12 sps:$4 sm:$0xff]  }
0x12cb   :  { %5121 = vmatpush1.bf16.msra.mxu1 %v7868_v26  ;;  %v7907_v26 = vld [vmem:[%s9219_s8 + $0x50] ss:$12 sps:$4 sm:$0xff]  }
0x12cc   :  { %5122 = vmatprep.subr.bf16.mxu1 %v7875_v25  ;;  %v7928_v25 = vld [vmem:[%s9219_s8 + $0xc0] ss:$12 sps:$4 sm:$0xff]  }
0x12cf   :  { %5123 = vmatpush1.bf16.msra.mxu1 %v7873_v53  ;;  %v7931_v53 = vld [vmem:[%s9219_s8 + $0xd8] ss:$12 sps:$4 sm:$0xff]  }
0x12d0   :  { %5124 = vmatprep.subr.bf16.mxu1 %v7880_v1  ;;  %v7934_v1 = vld [vmem:[%s9219_s8 + $0xf0] ss:$12 sps:$4 sm:$0xff]  }
0x12d3   :  { %5125 = vmatpush1.bf16.msra.mxu1 %v7878_v47  ;;  %v7937_v47 = vld [vmem:[%s9219_s8 + $0x108] ss:$12 sps:$4 sm:$0xff]  }
0x12d4   :  { %5126 = vmatprep.subr.bf16.mxu1 %v7885_v20  ;;  %v7940_v20 = vld [vmem:[%s9219_s8 + $0x120] ss:$12 sps:$4 sm:$0xff]  }
0x12d7   :  { %5127 = vmatpush1.bf16.msra.mxu1 %v7883_v31  ;;  %v7943_v31 = vld [vmem:[%s9219_s8 + $0x138] ss:$12 sps:$4 sm:$0xff]  }
0x12d8   :  { %6870 = vmatprep.subr.bf16.mxu1 %v7891_v43  ;;  %v7951_v43 = vld [vmem:[%s9219_s8 + $0x16c] ss:$12 sps:$4 sm:$0xff]  }
0x136d   :  { %v6845_v41 = vpop.f32.mrb[36].mxu1 }
0x136e   :  { %v6846_v42 = vpop.f32.mrb[37].mxu1 }
0x136f   :  { %v6847_v50 = vadd.f32 %v6846_v42, %v6845_v41  ;;  %v7910_v41 = vld [vmem:[%s9219_s8 + $0x64] ss:$12 sps:$4 sm:$0xff]   ;;  %v7911_v42 = vld [vmem:[%s9219_s8 + $0x128] ss:$12 sps:$4 sm:$0xff]  }
0x1371   :  { %v4603_v55 = vmul.f32 0.125, %v6847_v50  ;;  %v7908_v50 = vld [vmem:[%s9219_s8 + $0x60] ss:$12 sps:$4 sm:$0xff]  }
0x1373   :  { %v4605_v61 = vadd.f32 0.8, %v4603_v55  ;;  %v7912_v55 = vld [vmem:[%s9219_s8 + $0x68] ss:$12 sps:$4 sm:$0xff]  }
0x1375   :  { %7975 = vrsqrt.f32 %v4605_v61  ;;  %v7915_v61 = vld [vmem:[%s9219_s8 + $0x7c] ss:$12 sps:$4 sm:$0xff]  }
0x137f   :  { %v7976_v58 = vpop.eup %7975 }
0x1380   :  { %v4607_v10 = vmul.f32 %v7976_v58, %v4604_v51  ;;  %v7916_v51 = vld [vmem:[%s9219_s8 + $0x140] ss:$12 sps:$4 sm:$0xff]   ;;  %v7913_v58 = vld [vmem:[%s9219_s8 + $0x78] ss:$12 sps:$4 sm:$0xff]  }
0x1382   :  { %4673 = vmatmul.mubr.f32.vlgmr.msra.gmra.mrb[68].mxu0 %v4607_v10  ;;  %v7920_v10 = vld [vmem:[%s9219_s8 + $0x94] ss:$12 sps:$4 sm:$0xff]  }
0x1383   :  { %6849 = vmatpush3.bf16.msra.mxu0 %v7852_v12  ;;  %v7917_v12 = vld [vmem:[%s9219_s8 + $0x80] ss:$12 sps:$4 sm:$0xff]  }
0x1384   :  { %6850 = vmatprep.subr.bf16.mxu0 %v7856_v18  ;;  %v7921_v18 = vld [vmem:[%s9219_s8 + $0x158] ss:$12 sps:$4 sm:$0xff]  }
0x1387   :  { %6851 = vmatpush3.bf16.msra.mxu0 %v7857_v19  ;;  %v7918_v19 = vld [vmem:[%s9219_s8 + $0x90] ss:$12 sps:$4 sm:$0xff]  }
0x1388   :  { %6852 = vmatprep.subr.bf16.mxu0 %v7861_v13  ;;  %v7922_v13 = vld [vmem:[%s9219_s8 + $0x98] ss:$12 sps:$4 sm:$0xff]  }
0x138b   :  { %6853 = vmatpush3.bf16.msra.mxu0 %v7862_v28  ;;  %v7925_v28 = vld [vmem:[%s9219_s8 + $0xac] ss:$12 sps:$4 sm:$0xff]  }
0x138c   :  { %6854 = vmatprep.subr.bf16.mxu0 %v7866_v29  ;;  %v7926_v29 = vld [vmem:[%s9219_s8 + $0x170] ss:$12 sps:$4 sm:$0xff]  }
0x138f   :  { %6855 = vmatpush3.bf16.msra.mxu0 %v7867_v34  ;;  %v7923_v34 = vld [vmem:[%s9219_s8 + $0xa8] ss:$12 sps:$4 sm:$0xff]  }
0x1390   :  { %6856 = vmatprep.subr.bf16.mxu0 %v7871_v40  ;;  %v7927_v40 = vld [vmem:[%s9219_s8 + $0xb0] ss:$12 sps:$4 sm:$0xff]  }
0x1393   :  { %6857 = vmatpush3.bf16.msra.mxu0 %v7872_v46  ;;  %v7930_v46 = vld [vmem:[%s9219_s8 + $0xc4] ss:$12 sps:$4 sm:$0xff]  }
0x1394   :  { %6858 = vmatprep.subr.bf16.mxu0 %v7876_v23  ;;  %v7933_v23 = vld [vmem:[%s9219_s8 + $0xdc] ss:$12 sps:$4 sm:$0xff]  }
0x1397   :  { %6859 = vmatpush3.bf16.msra.mxu0 %v7877_v11  ;;  %v7936_v11 = vld [vmem:[%s9219_s8 + $0xf4] ss:$12 sps:$4 sm:$0xff]  }
0x1398   :  { %6860 = vmatprep.subr.bf16.mxu0 %v7881_v14  ;;  %v7939_v14 = vld [vmem:[%s9219_s8 + $0x10c] ss:$12 sps:$4 sm:$0xff]  }
0x139b   :  { %6861 = vmatpush3.bf16.msra.mxu0 %v7882_v17  ;;  %v7942_v17 = vld [vmem:[%s9219_s8 + $0x124] ss:$12 sps:$4 sm:$0xff]  }
0x139c   :  { %6862 = vmatprep.subr.bf16.mxu0 %v7886_v24  ;;  %v7945_v24 = vld [vmem:[%s9219_s8 + $0x13c] ss:$12 sps:$4 sm:$0xff]  }
0x139f   :  { %6863 = vmatpush3.bf16.msra.mxu0 %v7887_v33  ;;  %v7948_v33 = vld [vmem:[%s9219_s8 + $0x154] ss:$12 sps:$4 sm:$0xff]  }
0x13a0   :  { %5433 = vmatprep.subr.bf16.mxu0 %v7890_v36  ;;  %v7946_v36 = vld [vmem:[%s9219_s8 + $0x150] ss:$12 sps:$4 sm:$0xff]  }
0x1455   :  { %v4674_v45 = vpop.f32.mrb[68].mxu0 }
0x1456   :  { %v4682_v48 = vrot.slane %v4674_v45, %v8262_v3  ;;  %v4676_v49 = vpop.f32.mrb[69].mxu0  ;;  %v7952_v45 = vld [vmem:[%s8181_s20 + $0x80] sm:$0xff]  }
0x1457   :  { %v4686_v4 = vrot.slane %v4676_v49, %v8262_v3 }
0x1458   :  { %v4687_v8 = vmul.f32 %v4682_v48, %v9036_v37  ;;  %v7896_v37 = vld [vmem:[%s9219_s8 + $0xe0] ss:$12 sps:$4 sm:$0xff]  }
0x1459   :  { %v4688_v54 = vmul.f32 %v4686_v4, %v9039_v38  ;;  %v7893_v38 = vld [vmem:[%s9219_s8 + $0x18] ss:$12 sps:$4 sm:$0xff]   ;;  %v7953_v48 = vld [vmem:[%s8181_s20 + $0x88] sm:$0xff]  }
0x145a   :  { %v4701_v56 = vadd.f32 %v4694_v63, %v4687_v8  ;;  %v7954_v63 = vld [vmem:[%s8181_s20 + $0x90] sm:$0x3f]   ;;  %v7955_v4 = vld [vmem:[%s8181_s20 + $0x40] sm:$0xff]   ;;  %v7957_v8 = vld [vmem:[%s8181_s20 + $0x48] sm:$0xff]  }
0x145b   :  { %v4702_v57 = vadd.f32 %v4698_v52, %v4688_v54  ;;  %v5704_v49 = vsel %vm5702_vm6, %v7954_v63, 0  ;;  %v7956_v52 = vld [vmem:[%s8181_s20] sm:$0xff]   ;;  %v7958_v54 = vld [vmem:[%s8181_s20 + $0x8] sm:$0xff]  }
0x145c   :  { %v9105_v59 = vpack.c.bf16 %v4701_v56, %v4701_v56  ;;  %v7959_v56 = vld [vmem:[%s8181_s20 + $0x50] sm:$0xff]  }
0x145d   :  { %v4704_v60 = vpack.c.bf16 %v4702_v57, %v4702_v57  ;;  %v7960_v57 = vld [vmem:[%s8181_s20 + $0x10] sm:$0xff]  }
0x145e   :  { %v4836_v39 = vrot.slane %v9105_v59, 1 }
0x145f   :  { %v4837_v62 = vrot.slane %v4704_v60, 1 }
0x1461   :  { %5128 = vmatprep.mubr.bf16.mxu1 %v4837_v62  ;;  %5169 = vmatprep.mubr.bf16.mxu0 %v4837_v62  ;;  %v7963_v62 = vld [vmem:[%s8181_s20 + $0x60] sm:$0xff]  }
0x1462   :  { %5129 = vmatmul.mubr.bf16.vlgmr.msra.gmra.mrb[40].mxu1 %v4836_v39  ;;  %5170 = vmatmul.mubr.bf16.vlgmr.msra.gmra.mrb[72].mxu0 %v4836_v39  ;;  %v7967_v39 = vld [vmem:[%s8181_s20 + $0x70] sm:$0xff]  }
0x1463   :  { %5434 = vmatpush1.bf16.msra.mxu0 %v7888_v0  ;;  %6871 = vmatpush3.bf16.msra.mxu1 %v7892_v6  ;;  %v7965_v0 = vld [vmem:[%s8181_s20 + $0x68] sm:$0xff]  }
0x1464   :  { %5465 = vmatprep.mubr.bf16.mxu0 %v4704_v60  ;;  %5506 = vmatprep.mubr.bf16.mxu1 %v4704_v60  ;;  %v7962_v60 = vld [vmem:[%s8181_s20 + $0x18] sm:$0xff]   ;;  %v7966_v6 = vld [vmem:[%s8181_s20 + $0x28] sm:$0xff]  }
0x1465   :  { %5435 = vmatprep.subr.bf16.mxu0 %v7895_v7  ;;  %6872 = vmatprep.subr.bf16.mxu1 %v7896_v37  ;;  %v7968_v7 = vld [vmem:[%s8181_s20 + $0x30] sm:$0xff]   ;;  %v7969_v37 = vld [vmem:[%s8181_s20 + $0x78] sm:$0xff]  }
0x1467   :  { %5436 = vmatpush1.bf16.msra.mxu0 %v7893_v38  ;;  %6873 = vmatpush3.bf16.msra.mxu1 %v7897_v9  ;;  %v7970_v38 = vld [vmem:[%s8181_s20 + $0x38] sm:$0xff]  }
0x1468   :  { %5437 = vmatprep.subr.bf16.mxu0 %v7900_v15  ;;  %6874 = vmatprep.subr.bf16.mxu1 %v7901_v16 }
0x146b   :  { %5438 = vmatpush1.bf16.msra.mxu0 %v7898_v22  ;;  %6875 = vmatpush3.bf16.msra.mxu1 %v7902_v32 }
0x146c   :  { %5439 = vmatprep.subr.bf16.mxu0 %v7905_v27  ;;  %6876 = vmatprep.subr.bf16.mxu1 %v7906_v30 }
0x146f   :  { %5440 = vmatpush1.bf16.msra.mxu0 %v7903_v21  ;;  %6877 = vmatpush3.bf16.msra.mxu1 %v7907_v26 }
0x1470   :  { %5441 = vmatprep.subr.bf16.mxu0 %v7910_v41  ;;  %6878 = vmatprep.subr.bf16.mxu1 %v7911_v42  ;;  %v5526_v41 = vsub.s32 2, %v8259_v2  ;;  %v5514_v42 = vld [vmem:[%s8176_s12] sm:$0x7] }
0x1473   :  { %5442 = vmatpush1.bf16.msra.mxu0 %v7908_v50  ;;  %6879 = vmatpush3.bf16.msra.mxu1 %v7912_v55 }
0x1474   :  { %5443 = vmatprep.subr.bf16.mxu0 %v7915_v61  ;;  %6880 = vmatprep.subr.bf16.mxu1 %v7916_v51  ;;  %v5527_v51 = vrot.slane %v5514_v42, %v5526_v41 }
0x1477   :  { %5444 = vmatpush1.bf16.msra.mxu0 %v7913_v58  ;;  %6881 = vmatpush3.bf16.msra.mxu1 %v7917_v12 }
0x1478   :  { %5445 = vmatprep.subr.bf16.mxu0 %v7920_v10  ;;  %6882 = vmatprep.subr.bf16.mxu1 %v7921_v18 }
0x147b   :  { %5446 = vmatpush1.bf16.msra.mxu0 %v7918_v19  ;;  %6883 = vmatpush3.bf16.msra.mxu1 %v7922_v13 }
0x147c   :  { %5447 = vmatprep.subr.bf16.mxu0 %v7925_v28  ;;  %6884 = vmatprep.subr.bf16.mxu1 %v7926_v29  ;;  %v5519_v28 = vrot.slane %v5514_v42, %v8262_v3 }
0x147f   :  { %5448 = vmatpush1.bf16.msra.mxu0 %v7923_v34  ;;  %6885 = vmatpush3.bf16.msra.mxu1 %v7927_v40  ;;  %v5523_v34 = vrot.slane %v5514_v42, %v8266_v5  ;;  %v6599_v5 = vld [vmem:[%s8186_s6] ss:$0 sm:$0xff]  ;;  %s7981_s6 = scalar_lea.vmem %s5806_s30, 32 }
0x1480   :  { %5449 = vmatprep.subr.bf16.mxu0 %v7930_v46  ;;  %6892 = vmatprep.subr.bf16.mxu1 %v7955_v4  ;;  %p7982_p0 = scmp.ne.s32.totalorder %s5806_s30, %s7981_s6  ;;  %p7987_p2 = scmp.lt.s32.totalorder %s7981_s6, %s7981_s6 }
0x1482   :  { %5507 = vmatmul.mubr.bf16.vlgmr.msra.gmra.mrb[44].mxu1 %v9105_v59  ;;  %p7988_p3 = por %p7987_p2, %p7986_p1 }
0x1483   :  { %5450 = vmatpush1.bf16.msra.mxu0 %v7928_v25  ;;  %6893 = vmatpush3.bf16.msra.mxu1 %v7956_v52 }
0x1484   :  { %5451 = vmatprep.subr.bf16.mxu0 %v7933_v23  ;;  %6894 = vmatprep.subr.bf16.mxu1 %v7957_v8  ;;  %p7989_p4 = pnand %p7988_p3, %p7982_p0 }
0x1487   :  { %5452 = vmatpush1.bf16.msra.mxu0 %v7931_v53  ;;  %6895 = vmatpush3.bf16.msra.mxu1 %v7958_v54 }
0x1488   :  { %5453 = vmatprep.subr.bf16.mxu0 %v7936_v11  ;;  %6896 = vmatprep.subr.bf16.mxu1 %v7959_v56 }
0x148b   :  { %5454 = vmatpush1.bf16.msra.mxu0 %v7934_v1  ;;  %6897 = vmatpush3.bf16.msra.mxu1 %v7960_v57 }
0x148c   :  { %5455 = vmatprep.subr.bf16.mxu0 %v7939_v14 }
0x148f   :  { %5456 = vmatpush1.bf16.msra.mxu0 %v7937_v47 }
0x1490   :  { %5457 = vmatprep.subr.bf16.mxu0 %v7942_v17 }
0x1493   :  { %5458 = vmatpush1.bf16.msra.mxu0 %v7940_v20 }
0x1494   :  { %5459 = vmatprep.subr.bf16.mxu0 %v7945_v24 }
0x1497   :  { %5460 = vmatpush1.bf16.msra.mxu0 %v7943_v31 }
0x1498   :  { %5461 = vmatprep.subr.bf16.mxu0 %v7948_v33 }
0x149b   :  { %5462 = vmatpush1.bf16.msra.mxu0 %v7946_v36 }
0x149c   :  { %5463 = vmatprep.subr.bf16.mxu0 %v7951_v43 }
0x149f   :  { %5464 = vmatpush1.bf16.msra.mxu0 %v7949_v44 }
0x14a0   :  { %6954 = vmatprep.subr.bf16.mxu0 %v8035_v35 }
0x14a2   :  { %5466 = vmatmul.mubr.bf16.vlgmr.msra.gmra.mrb[76].mxu0 %v9105_v59  ;;  %v7961_v59 = vld [vmem:[%s8181_s20 + $0x58] sm:$0xff]  }
0x14a3   :  { %6955 = vmatpush3.bf16.msra.mxu0 %v7952_v45  ;;  %6960 = vmatprep.mubr.msk.bf16.mxu0 %vm8036_vm7, %v8035_v35 }
0x14a4   :  { %6956 = vmatprep.subr.bf16.mxu0 %v8035_v35  ;;  %6898 = vmatprep.subr.bf16.mxu1 %v7961_v59 }
0x14a5   :  { %6899 = vmatpush3.bf16.msra.mxu1 %v7962_v60 }
0x14a6   :  { %6900 = vmatprep.subr.bf16.mxu1 %v7963_v62 }
0x14a7   :  { %6957 = vmatpush3.bf16.msra.mxu0 %v7953_v48 }
0x14a8   :  { %6958 = vmatprep.subr.bf16.mxu0 %v8035_v35  ;;  %v7964_v35 = vld [vmem:[%s8181_s20 + $0x20] sm:$0xff]  }
0x14a9   :  { %6901 = vmatpush3.bf16.msra.mxu1 %v7964_v35 }
0x14aa   :  { %6902 = vmatprep.subr.bf16.mxu1 %v7965_v0 }
0x14ab   :  { %6959 = vmatpush3.bf16.msra.mxu0 %v5704_v49 }
0x14ad   :  { %6903 = vmatpush3.bf16.msra.mxu1 %v7966_v6 }
0x14ae   :  { %6904 = vmatprep.subr.bf16.mxu1 %v7967_v39 }
0x14b1   :  { %6905 = vmatpush3.bf16.msra.mxu1 %v7968_v7 }
0x14b2   :  { %6906 = vmatprep.subr.bf16.mxu1 %v7969_v37 }
0x14b5   :  { %6907 = vmatpush3.bf16.msra.mxu1 %v7970_v38 }
0x1535   :  { %v5130_v9 = vpop.f32.mrb[40].mxu1  ;;  %v6864_v15 = vpop.f32.mrb[72].mxu0 }
0x1536   :  { %v5132_v16 = vpop.f32.mrb[41].mxu1  ;;  %v6865_v22 = vpop.f32.mrb[73].mxu0 }
0x1537   :  { %v6866_v32 = vadd.f32 %v6865_v22, %v6864_v15  ;;  %v5134_v27 = vpop.f32.mrb[42].mxu1  ;;  %v6867_v30 = vpop.f32.mrb[74].mxu0 }
0x1538   :  { %v5135_v21 = vpop.f32.mrb[43].mxu1  ;;  %v6868_v26 = vpop.f32.mrb[75].mxu0 }
0x1555   :  { %v6886_v50 = vpop.f32.mrb[44].mxu1 }
0x1556   :  { %v6887_v55 = vpop.f32.mrb[45].mxu1 }
0x1557   :  { %v6888_v61 = vadd.f32 %v6887_v55, %v6886_v50  ;;  %v6889_v58 = vpop.f32.mrb[46].mxu1 }
0x1558   :  { %v6890_v12 = vpop.f32.mrb[47].mxu1 }
0x1559   :  { %v5509_v10 = vadd.f32 %v6888_v61, %v6866_v32 }
0x155b   :  { %v5533_v18 = vadd.f32 %v5527_v51, %v5509_v10 }
0x155d   :  { %v5536_v19 = vmax.f32 %v5533_v18, 0.0 }
0x155f   :  { %v5539_v13 = vpack.c.bf16 %v5536_v19, %v5536_v19 }
0x1561   :  { %6961 = vmatmul.mubr.msk.bf16.vlgmr.msra.gmra.mrb[80].mxu0 %vm5698_vm8, %v5539_v13 }
0x1575   :  { %v5467_v29 = vpop.f32.mrb[76].mxu0 }
0x1576   :  { %v5468_v40 = vadd.f32 %v5467_v29, %v5130_v9  ;;  %v5469_v2 = vpop.f32.mrb[77].mxu0 }
0x1577   :  { %v5470_v46 = vadd.f32 %v5469_v2, %v5132_v16  ;;  %v5471_v25 = vpop.f32.mrb[78].mxu0 }
0x1578   :  { %v5531_v23 = vadd.f32 %v5519_v28, %v5468_v40  ;;  %v5472_v53 = vpop.f32.mrb[79].mxu0 }
0x1579   :  { %v5532_v11 = vadd.f32 %v5523_v34, %v5470_v46 }
0x157a   :  { %v5534_v1 = vmax.f32 %v5531_v23, 0.0 }
0x157b   :  { %v5535_v14 = vmax.f32 %v5532_v11, 0.0 }
0x157c   :  { %v5537_v17 = vpack.c.bf16 %v5534_v1, %v5534_v1 }
0x157d   :  { %v5538_v47 = vpack.c.bf16 %v5535_v14, %v5535_v14 }
0x157f   :  { %5738 = vmatprep.mubr.bf16.mxu1 %v5538_v47 }
0x1580   :  { %5739 = vmatmul.mubr.bf16.vlgmr.msra.gmra.mrb[48].mxu1 %v5537_v17 }
0x1634   :  { %v5780_v20 = vpop.f32.mrb[80].mxu0 }
0x1635   :  { %v6962_v24 = vpop.f32.mrb[81].mxu0 }
0x1636   :  { %v5783_v3 = vpop.f32.mrb[82].mxu0 }
0x1637   :  { %v6963_v31 = vpop.f32.mrb[83].mxu0 }
0x1653   :  { %v6908_v33 = vpop.f32.mrb[48].mxu1 }
0x1654   :  { %v6909_v36 = vpop.f32.mrb[49].mxu1 }
0x1655   :  { %v6910_v43 = vadd.f32 %v6909_v36, %v6908_v33  ;;  %v6911_v44 = vpop.f32.mrb[50].mxu1 }
0x1656   :  { %v6912_v45 = vpop.f32.mrb[51].mxu1 }
0x1657   :  { %v5741_v48 = vadd.f32 %v6910_v43, %v6599_v5 }
0x1659   :  { %v5781_v63 = vadd.f32 %v5780_v20, %v5741_v48 }
0x165b   :  { %v5787_v49 = vsel %vm5786_vm9, %v5781_v63, -inf }
0x165c   :  { %5788 = vmax.xlane.f32.xlu0 %v5787_v49 }
0x16e9   :  { %v5789_v4 = vpop.xlane.xlu0 %5788 }
0x16ea   :  { %v5790_v52 = vsub.f32 %v5781_v63, %v5789_v4 }
0x16ec   :  { %v5791_v8 = vmul.f32 1.442695, %v5790_v52 }
0x16ee   :  { %7977 = vpow2.f32 %v5791_v8 }
0x16f8   :  { %v7978_v54 = vpop.eup %7977 }
0x16f9   :  { %v5793_v56 = vsel %vm5786_vm9, %v7978_v54, 0.0 }
0x16fa   :  { %5794 = vadd.xlane.f32.xlu0 %v5793_v56 }
0x1787   :  { %v5795_v57 = vpop.xlane.xlu0 %5794 }
0x1788   :  { %7979 = vrcp.f32 %v5795_v57 }
0x1792   :  { %v7980_v59 = vpop.eup %7979 }
0x1793   :  { %v5797_v60 = vmul.f32 %v7980_v59, %v7978_v54 }
0x1795   :  { %5798 = vst.msk [vmem:[#allocation2] sm:$0x3] %vm5786_vm9, %v5797_v60 }
0x1796   :  { %7992 = shalt.err (!%p7989_p4)
}
0x1797   :  { %s7993_s12 = scalar_lea.hbm %s8191_s4, 32 }
0x1798   :  { %p7994_p5 = scmp.ne.s32.totalorder %s8191_s4, %s7993_s12  ;;  %p7997_p6 = scmp.lt.u32.totalorder %s7993_s12, %s8191_s4 }
0x179a   :  { %p7999_p7 = pnand %p7997_p6, %p7994_p5 }
0x179c   :  { %8002 = shalt.err (!%p7999_p7)
}
0x179d   :  { %5808 = dma.vmem_to_hbm [thread:$0]  %s5806_s30, 32, %s8191_s4, [#allocation3]  }
0x179e   :  { %8003 = dma.done.wait [#allocation3], 32  }
0x179f   :  { %8004 = vsyncadd [#allocation3], 4294967264 }
0x17a0   :  { %5812 = vsyncpa [#allocation3], 1 }

</bundles_post_ra>
